<compile_context>
chip_gen: v5e
topology: v5e:2x2
jax: 0.10.0
libtpu: 0.0.40
codegen_flags: <defaults>
</compile_context>

<pallas_src>
import functools

import jax
import jax.numpy as jnp
from jax.experimental import pallas as pl
from jax.experimental.pallas import tpu as pltpu


def _round_up(x, m):
    return (x + m - 1) // m * m


# ----------------------------------------------------------------------------
# Exact-erf GELU from ops with guaranteed Mosaic lowerings (exp on EUP, VPU mul/add).
# Abramowitz & Stegun 7.1.26, |abs err| < 1.5e-7  -> numerically matches nn.GELU().
# ----------------------------------------------------------------------------
_SQRT_HALF = 0.7071067811865476


def _erf_approx(x):
    a1, a2, a3, a4, a5 = 0.254829592, -0.284496736, 1.421413741, -1.453152027, 1.061405429
    p = 0.3275911
    sign = jnp.where(x >= 0.0, 1.0, -1.0)
    z = jnp.abs(x)
    t = 1.0 / (1.0 + p * z)
    poly = ((((a5 * t + a4) * t + a3) * t + a2) * t + a1) * t
    return sign * (1.0 - poly * jnp.exp(-z * z))


def _gelu_exact(x):
    return 0.5 * x * (1.0 + _erf_approx(x * _SQRT_HALF))


# ----------------------------------------------------------------------------
# Pallas kernel: in-kernel im2col (9 lane-window taps from a halo'd activation)
#   -> single K=9*Cin_pad MXU matmul -> GroupNorm(1, C) with folded affine
#   -> [optional residual add] -> [optional exact GELU].
# One grid step == one batch sample.  All compute in (Cout, H*W) layout.
# ----------------------------------------------------------------------------
def _make_conv_gn_kernel(*, W, HW, cin_pad, cout, eps, add_residual, apply_gelu):
    taps = [(kh, kw) for kh in range(3) for kw in range(3)]

    def kernel(*refs):
        i = 0
        x_ref = refs[i]; i += 1        # (1, cin_pad, (H+2)*W + 2)  bf16 halo'd activation
        w_ref = refs[i]; i += 1        # (cout, 9*cin_pad)          bf16 weight matrix
        m_ref = refs[i]; i += 1        # (2, HW)                    bf16 column-edge masks
        g_ref = refs[i]; i += 1        # (1, cout, 1)               f32  GN gamma
        b_ref = refs[i]; i += 1        # (1, cout, 1)               f32  GN beta (maybe per-sample)
        res_ref = None
        if add_residual:
            res_ref = refs[i]; i += 1  # (1, cout, HW)              bf16 residual
        o_ref = refs[i]; i += 1        # (1, cout, HW)
        patch_ref = refs[i]            # (9*cin_pad, HW)            bf16 VMEM patch slab

        not_left_edge = m_ref[0:1, :]    # 0 where c == 0
        not_right_edge = m_ref[1:2, :]   # 0 where c == W-1

        # In-kernel im2col: tap (kh, kw) is the contiguous lane window starting at
        # kh*W + kw of the halo'd flattened activation; only the horizontal taps
        # need a boundary-column mask (row boundaries are real zero padding).
        for tap_idx, (kh, kw) in enumerate(taps):
            off = kh * W + kw
            tap = x_ref[0, :, off:off + HW]                     # (cin_pad, HW)
            if kw == 0:
                tap = tap * not_left_edge
            elif kw == 2:
                tap = tap * not_right_edge
            patch_ref[tap_idx * cin_pad:(tap_idx + 1) * cin_pad, :] = tap

        # Single MXU matmul, accumulation stays inside the MXU (f32).
        acc = jnp.dot(w_ref[...], patch_ref[...],
                      preferred_element_type=jnp.float32)       # (cout, HW)

        # GroupNorm(num_groups=1): one-pass f32 moments, affine folded to scale/shift.
        inv_n = 1.0 / float(cout * HW)
        s1 = jnp.sum(acc)
        s2 = jnp.sum(acc * acc)
        mean = s1 * inv_n
        var = jnp.maximum(s2 * inv_n - mean * mean, 0.0)
        scale = g_ref[0] * jax.lax.rsqrt(var + eps)             # (cout, 1)
        shift = b_ref[0] - mean * scale                         # (cout, 1)
        y = acc * scale + shift

        if add_residual:
            y = y + res_ref[0].astype(jnp.float32)
        if apply_gelu:
            y = _gelu_exact(y)                                  # exact-erf GELU

        o_ref[0] = y.astype(o_ref.dtype)

    return kernel


def _derive_vmem_limit(block_bytes_per_step, scratch_bytes):
    """Derive the scoped-VMEM budget from the actual block sizes (review item) and cap
    it against the physical VMEM of the local chip (128 MiB v5e/v6e, 64 MiB v7x)."""
    needed = 2 * block_bytes_per_step + scratch_bytes + (8 << 20)   # x2: double buffering
    try:
        physical = int(pltpu.get_tpu_info().vmem_capacity_bytes)
    except Exception:
        physical = 64 << 20            # conservative (v7x-sized) fallback
    ceiling = max(int(physical * 0.85), 32 << 20)
    return int(min(max(needed, 32 << 20), ceiling))


def conv3x3_gn(x, w_hwio, gamma, beta, *, residual=None, apply_gelu=False,
               out_dtype=jnp.bfloat16, eps=1e-5):
    """Fused 3x3 conv (pad=1, no bias) + GroupNorm(1, Cout) [+ residual] [+ GELU].

    x:        (N, Cin, H, W) NCHW activations (any float dtype; computed as bf16).
    w_hwio:   (3, 3, Cin, Cout) conv weight.
    gamma:    (Cout,) GN scale.
    beta:     (Cout,) shared GN shift, or (N, Cout) per-sample shift (emb/mass fold).
    residual: optional (N, Cout, H, W) added after GN, before GELU.
    Returns (N, Cout, H, W) in out_dtype.
    """
    N, Cin, H, W = x.shape
    Cout = w_hwio.shape[-1]
    HW = H * W
    cin_pad = max(_round_up(Cin, 8), 8)       # aligned sublane blocks in the patch slab
    K = 9 * cin_pad
    Hp = H + 2
    L = Hp * W + 2                            # halo'd, flattened, lane-padded length

    # --- halo'd activation: channel pad to sublane multiple, 1-row H halo, flatten,
    #     1-element lane pad each side (so every tap is a non-negative window). ---
    xb = x.astype(jnp.bfloat16)
    xp = jnp.pad(xb, ((0, 0), (0, cin_pad - Cin), (1, 1), (0, 0)))   # (N, cin_pad, Hp, W)
    xf = jnp.pad(xp.reshape(N, cin_pad, Hp * W), ((0, 0), (0, 0), (1, 1)))  # (N, cin_pad, L)

    # Weight as (Cout, 9*cin_pad), tap-major, zero in the padded-channel columns.
    w9 = jnp.transpose(w_hwio, (3, 0, 1, 2)).reshape(Cout, 9, Cin)
    w9 = jnp.pad(w9, ((0, 0), (0, 0), (0, cin_pad - Cin)))
    w_mat = w9.reshape(Cout, K).astype(jnp.bfloat16)

    # Boundary-column masks for the horizontal taps (precomputed; avoids in-kernel iota/mod).
    col = jnp.arange(HW, dtype=jnp.int32) % W
    colmask = jnp.stack([col != 0, col != (W - 1)], axis=0).astype(jnp.bfloat16)  # (2, HW)

    g = gamma.reshape(1, Cout, 1).astype(jnp.float32)
    per_sample_beta = (beta.ndim == 2)
    b = beta.reshape(-1, Cout, 1).astype(jnp.float32)
    beta_idx = (lambda n: (n, 0, 0)) if per_sample_beta else (lambda n: (0, 0, 0))

    add_residual = residual is not None

    in_specs = [
        pl.BlockSpec((1, cin_pad, L), lambda n: (n, 0, 0)),     # halo'd activation
        pl.BlockSpec((Cout, K), lambda n: (0, 0)),              # weight   (constant)
        pl.BlockSpec((2, HW), lambda n: (0, 0)),                # col mask (constant)
        pl.BlockSpec((1, Cout, 1), lambda n: (0, 0, 0)),        # gamma    (constant)
        pl.BlockSpec((1, Cout, 1), beta_idx),                   # beta
    ]
    args = [xf, w_mat, colmask, g, b]
    if add_residual:
        in_specs.append(pl.BlockSpec((1, Cout, HW), lambda n: (n, 0, 0)))
        args.append(residual.reshape(N, Cout, HW).astype(jnp.bfloat16))

    out_itemsize = jnp.dtype(out_dtype).itemsize
    block_bytes = (cin_pad * L * 2 + Cout * K * 2 + 2 * HW * 2 + 2 * Cout * 4
                   + (Cout * HW * 2 if add_residual else 0) + Cout * HW * out_itemsize)
    scratch_bytes = K * HW * 2 + Cout * HW * 4            # patch slab + f32 acc estimate
    vmem_limit = _derive_vmem_limit(block_bytes, scratch_bytes)

    kernel = _make_conv_gn_kernel(W=W, HW=HW, cin_pad=cin_pad, cout=Cout, eps=eps,
                                  add_residual=add_residual, apply_gelu=apply_gelu)

    out = pl.pallas_call(
        kernel,
        out_shape=jax.ShapeDtypeStruct((N, Cout, HW), out_dtype),
        grid=(N,),
        in_specs=in_specs,
        out_specs=pl.BlockSpec((1, Cout, HW), lambda n: (n, 0, 0)),
        scratch_shapes=[pltpu.VMEM((K, HW), jnp.bfloat16)],     # in-kernel patch slab
        compiler_params=pltpu.CompilerParams(
            dimension_semantics=("parallel",),
            vmem_limit_bytes=vmem_limit),
    )(*args)

    return out.reshape(N, Cout, H, W)


# ----------------------------------------------------------------------------
# Plain-XLA glue: bilinear 2x upsample (align_corners=True) as two dense
# interpolation matmuls (MXU-friendly, no gathers).
# ----------------------------------------------------------------------------
def _interp_matrix_1d(n_in, n_out):
    if n_in == 1:
        return jnp.ones((n_out, 1), jnp.float32)
    src = jnp.arange(n_out, dtype=jnp.float32) * (float(n_in - 1) / float(n_out - 1))
    i0 = jnp.clip(jnp.floor(src).astype(jnp.int32), 0, n_in - 1)
    i1 = jnp.clip(i0 + 1, 0, n_in - 1)
    frac = src - i0.astype(jnp.float32)
    return (jax.nn.one_hot(i0, n_in, dtype=jnp.float32) * (1.0 - frac)[:, None]
            + jax.nn.one_hot(i1, n_in, dtype=jnp.float32) * frac[:, None])


def upsample_bilinear_2x_align_corners(x):
    N, C, H, W = x.shape
    R = _interp_matrix_1d(H, 2 * H)      # (Ho, H)
    Cw = _interp_matrix_1d(W, 2 * W)     # (Wo, W)
    y = jnp.einsum("oh,nchw->ncow", R, x)
    y = jnp.einsum("pw,ncow->ncop", Cw, y)
    return y


# ----------------------------------------------------------------------------
# Full Up_mass forward (NCHW in, NCHW out — no layout transposes anywhere)
# ----------------------------------------------------------------------------
def up_mass_forward(params, x_nchw, skip_nchw, t, m):
    p = params

    x = upsample_bilinear_2x_align_corners(x_nchw.astype(jnp.float32))
    xc = jnp.concatenate([skip_nchw.astype(jnp.float32), x], axis=1).astype(jnp.bfloat16)

    # DoubleConv(in, in, residual=True): gelu(x + GN(conv(GELU(GN(conv(x))))))
    h = conv3x3_gn(xc, p["w1"], p["g1"], p["b1"], apply_gelu=True)
    h = conv3x3_gn(h, p["w2"], p["g2"], p["b2"], residual=xc, apply_gelu=True)
    # DoubleConv(in, out, mid=in//2): GN(conv(GELU(GN(conv(x)))))
    h = conv3x3_gn(h, p["w3"], p["g3"], p["b3"], apply_gelu=True)

    # emb_layer(t) + mass_emb_layer(m): one fused SiLU+matmul (tiny, lane-sparse ->
    # plain XLA) folded into the GN beta of the last conv (no GELU after that GN).
    tm = jax.nn.silu(jnp.concatenate([t, m], axis=-1).astype(jnp.float32))
    w_cat = jnp.concatenate([p["we"], p["wm"]], axis=0)
    chan_bias = tm @ w_cat + p["be"] + p["bm"]                   # (N, Cout)
    beta_eff = p["b4"][None, :] + chan_bias

    h = conv3x3_gn(h, p["w4"], p["g4"], beta_eff,
                   apply_gelu=False, out_dtype=jnp.float32)
    return h                                                     # (N, Cout, H, W)


# ----------------------------------------------------------------------------
# Pure-JAX f32 reference (for correctness validation only)
# ----------------------------------------------------------------------------
def up_mass_reference(params, x, skip, t, m):
    p = params

    def conv(a, w):
        return jax.lax.conv_general_dilated(
            a, w, (1, 1), "SAME", dimension_numbers=("NCHW", "HWIO", "NCHW"))

    def gn(a, g, b, eps=1e-5):
        mu = jnp.mean(a, axis=(1, 2, 3), keepdims=True)
        var = jnp.mean((a - mu) ** 2, axis=(1, 2, 3), keepdims=True)
        an = (a - mu) * jax.lax.rsqrt(var + eps)
        return an * g[None, :, None, None] + b[None, :, None, None]

    gelu = lambda a: jax.nn.gelu(a, approximate=False)

    xu = upsample_bilinear_2x_align_corners(x)
    xc = jnp.concatenate([skip, xu], axis=1)
    h = gelu(gn(conv(xc, p["w1"]), p["g1"], p["b1"]))
    h = gelu(xc + gn(conv(h, p["w2"]), p["g2"], p["b2"]))
    h = gelu(gn(conv(h, p["w3"]), p["g3"], p["b3"]))
    h = gn(conv(h, p["w4"]), p["g4"], p["b4"])
    emb = jax.nn.silu(t) @ p["we"] + p["be"]
    mass = jax.nn.silu(m) @ p["wm"] + p["bm"]
    return h + emb[:, :, None, None] + mass[:, :, None, None]


def init_params(key, in_channels, out_channels, emb_dim):
    mid = in_channels // 2
    ks = jax.random.split(key, 12)

    def nrm(k, shape, scale=0.1):
        return (scale * jax.random.normal(k, shape)).astype(jnp.float32)

    return {
        # DoubleConv 1 (residual): in -> in -> in
        "w1": nrm(ks[0], (3, 3, in_channels, in_channels)),
        "g1": 1.0 + nrm(ks[1], (in_channels,)),
        "b1": nrm(ks[2], (in_channels,)),
        "w2": nrm(ks[3], (3, 3, in_channels, in_channels)),
        "g2": 1.0 + nrm(ks[4], (in_channels,)),
        "b2": nrm(ks[5], (in_channels,)),
        # DoubleConv 2: in -> mid -> out
        "w3": nrm(ks[6], (3, 3, in_channels, mid)),
        "g3": 1.0 + nrm(ks[7], (mid,)),
        "b3": nrm(ks[8], (mid,)),
        "w4": nrm(ks[9], (3, 3, mid, out_channels)),
        "g4": jnp.ones((out_channels,), jnp.float32),
        "b4": jnp.zeros((out_channels,), jnp.float32),
        # emb / mass linear layers, stored (emb_dim, out): Linear(t) = t @ W + b
        "we": nrm(ks[10], (emb_dim, out_channels)),
        "be": jnp.zeros((out_channels,), jnp.float32),
        "wm": nrm(ks[11], (emb_dim, out_channels)),
        "bm": jnp.zeros((out_channels,), jnp.float32),
    }


if __name__ == "__main__":
    # Small shapes consistent with Up_mass: x comes from the lower resolution
    # (half spatial, in_channels//2 channels), skip_x from the encoder.
    N = 2
    in_channels = 8       # channels after concat([skip_x, upsample(x)])
    out_channels = 4
    emb_dim = 32
    Hs, Ws = 16, 16       # skip spatial size; x is (Hs//2, Ws//2)

    key = jax.random.PRNGKey(0)
    kx, ks_, kt, km, kp = jax.random.split(key, 5)

    x = jax.random.normal(kx, (N, in_channels // 2, Hs // 2, Ws // 2), dtype=jnp.float32)
    skip_x = jax.random.normal(ks_, (N, in_channels // 2, Hs, Ws), dtype=jnp.float32)
    t = jax.random.normal(kt, (N, emb_dim), dtype=jnp.float32)
    m = jax.random.normal(km, (N, emb_dim), dtype=jnp.float32)

    params = init_params(kp, in_channels, out_channels, emb_dim)

    out = jax.jit(functools.partial(up_mass_forward, params))(x, skip_x, t, m)
    out = jax.block_until_ready(out)
    assert out.shape == (N, out_channels, Hs, Ws), out.shape
    assert jnp.all(jnp.isfinite(out))

    # Correctness vs pure-JAX f32 reference (kernel path runs conv in bf16 -> loose tol).
    ref = up_mass_reference(params, x, skip_x, t, m)
    rel = jnp.linalg.norm(out - ref) / (jnp.linalg.norm(ref) + 1e-6)
    maxabs = jnp.max(jnp.abs(out - ref))
    assert (float(rel) < 0.12) and (float(maxabs) < 0.75), (float(rel), float(maxabs))

    print("KERNEL_OK")
</pallas_src>

<mosaic_0001>
module attributes {stable_mosaic.version = 11 : i64} {
  func.func @kernel(%arg0: i32, %arg1: memref<1x8x290xbf16, #tpu.memory_space<vmem>>, %arg2: memref<8x72xbf16, #tpu.memory_space<vmem>>, %arg3: memref<2x256xbf16, #tpu.memory_space<vmem>>, %arg4: memref<1x8x1xf32, #tpu.memory_space<vmem>>, %arg5: memref<1x8x1xf32, #tpu.memory_space<vmem>>, %arg6: memref<1x8x256xbf16, #tpu.memory_space<vmem>>, %arg7: memref<72x256xbf16, #tpu.memory_space<vmem>>) attributes {dimension_semantics = [#tpu.dimension_semantics<parallel>], iteration_bounds = array<i64: 2>, scalar_prefetch = 0 : i64, scratch_operands = 1 : i64, tpu.core_type = #tpu.core_type<tc>, window_params = [{transform_indices = @transform_0, window_bounds = array<i64: 1, 8, 290>}, {pipeline_mode = #tpu.pipeline_mode<synchronous>, transform_indices = @transform_1, window_bounds = array<i64: 8, 72>}, {pipeline_mode = #tpu.pipeline_mode<synchronous>, transform_indices = @transform_2, window_bounds = array<i64: 2, 256>}, {pipeline_mode = #tpu.pipeline_mode<synchronous>, transform_indices = @transform_3, window_bounds = array<i64: 1, 8, 1>}, {pipeline_mode = #tpu.pipeline_mode<synchronous>, transform_indices = @transform_4, window_bounds = array<i64: 1, 8, 1>}, {transform_indices = @transform_5, window_bounds = array<i64: 1, 8, 256>}]} {
    %c0 = arith.constant 0 : index
    %c0_0 = arith.constant 0 : index
    %0 = vector.load %arg3[%c0, %c0_0] : memref<2x256xbf16, #tpu.memory_space<vmem>>, vector<1x256xbf16>
    %c1 = arith.constant 1 : index
    %c0_1 = arith.constant 0 : index
    %1 = vector.load %arg3[%c1, %c0_1] : memref<2x256xbf16, #tpu.memory_space<vmem>>, vector<1x256xbf16>
    %c0_2 = arith.constant 0 : index
    %c0_3 = arith.constant 0 : index
    %c0_4 = arith.constant 0 : index
    %2 = vector.load %arg1[%c0_2, %c0_3, %c0_4] : memref<1x8x290xbf16, #tpu.memory_space<vmem>>, vector<1x8x256xbf16>
    %3 = vector.shape_cast %2 : vector<1x8x256xbf16> to vector<8x256xbf16>
    %4 = vector.broadcast %0 : vector<1x256xbf16> to vector<8x256xbf16>
    %5 = arith.mulf %3, %4 : vector<8x256xbf16>
    %c0_5 = arith.constant 0 : index
    %c0_6 = arith.constant 0 : index
    %6 = vector.load %arg7[%c0_5, %c0_6] : memref<72x256xbf16, #tpu.memory_space<vmem>>, vector<8x256xbf16>
    tpu.vector_store %arg7[%c0_5, %c0_6], %5 {strides = array<i32>} : memref<72x256xbf16, #tpu.memory_space<vmem>>, vector<8x256xbf16>,
    %c0_7 = arith.constant 0 : index
    %c0_8 = arith.constant 0 : index
    %c1_9 = arith.constant 1 : index
    %7 = vector.load %arg1[%c0_7, %c0_8, %c1_9] : memref<1x8x290xbf16, #tpu.memory_space<vmem>>, vector<1x8x256xbf16>
    %8 = vector.shape_cast %7 : vector<1x8x256xbf16> to vector<8x256xbf16>
    %c8 = arith.constant 8 : index
    %c0_10 = arith.constant 0 : index
    %9 = vector.load %arg7[%c8, %c0_10] : memref<72x256xbf16, #tpu.memory_space<vmem>>, vector<8x256xbf16>
    tpu.vector_store %arg7[%c8, %c0_10], %8 {strides = array<i32>} : memref<72x256xbf16, #tpu.memory_space<vmem>>, vector<8x256xbf16>,
    %c0_11 = arith.constant 0 : index
    %c0_12 = arith.constant 0 : index
    %c2 = arith.constant 2 : index
    %10 = vector.load %arg1[%c0_11, %c0_12, %c2] : memref<1x8x290xbf16, #tpu.memory_space<vmem>>, vector<1x8x256xbf16>
    %11 = vector.shape_cast %10 : vector<1x8x256xbf16> to vector<8x256xbf16>
    %12 = vector.broadcast %1 : vector<1x256xbf16> to vector<8x256xbf16>
    %13 = arith.mulf %11, %12 : vector<8x256xbf16>
    %c16 = arith.constant 16 : index
    %c0_13 = arith.constant 0 : index
    %14 = vector.load %arg7[%c16, %c0_13] : memref<72x256xbf16, #tpu.memory_space<vmem>>, vector<8x256xbf16>
    tpu.vector_store %arg7[%c16, %c0_13], %13 {strides = array<i32>} : memref<72x256xbf16, #tpu.memory_space<vmem>>, vector<8x256xbf16>,
    %c0_14 = arith.constant 0 : index
    %c0_15 = arith.constant 0 : index
    %c16_16 = arith.constant 16 : index
    %15 = vector.load %arg1[%c0_14, %c0_15, %c16_16] : memref<1x8x290xbf16, #tpu.memory_space<vmem>>, vector<1x8x256xbf16>
    %16 = vector.shape_cast %15 : vector<1x8x256xbf16> to vector<8x256xbf16>
    %17 = vector.broadcast %0 : vector<1x256xbf16> to vector<8x256xbf16>
    %18 = arith.mulf %16, %17 : vector<8x256xbf16>
    %c24 = arith.constant 24 : index
    %c0_17 = arith.constant 0 : index
    %19 = vector.load %arg7[%c24, %c0_17] : memref<72x256xbf16, #tpu.memory_space<vmem>>, vector<8x256xbf16>
    tpu.vector_store %arg7[%c24, %c0_17], %18 {strides = array<i32>} : memref<72x256xbf16, #tpu.memory_space<vmem>>, vector<8x256xbf16>,
    %c0_18 = arith.constant 0 : index
    %c0_19 = arith.constant 0 : index
    %c17 = arith.constant 17 : index
    %20 = vector.load %arg1[%c0_18, %c0_19, %c17] : memref<1x8x290xbf16, #tpu.memory_space<vmem>>, vector<1x8x256xbf16>
    %21 = vector.shape_cast %20 : vector<1x8x256xbf16> to vector<8x256xbf16>
    %c32 = arith.constant 32 : index
    %c0_20 = arith.constant 0 : index
    %22 = vector.load %arg7[%c32, %c0_20] : memref<72x256xbf16, #tpu.memory_space<vmem>>, vector<8x256xbf16>
    tpu.vector_store %arg7[%c32, %c0_20], %21 {strides = array<i32>} : memref<72x256xbf16, #tpu.memory_space<vmem>>, vector<8x256xbf16>,
    %c0_21 = arith.constant 0 : index
    %c0_22 = arith.constant 0 : index
    %c18 = arith.constant 18 : index
    %23 = vector.load %arg1[%c0_21, %c0_22, %c18] : memref<1x8x290xbf16, #tpu.memory_space<vmem>>, vector<1x8x256xbf16>
    %24 = vector.shape_cast %23 : vector<1x8x256xbf16> to vector<8x256xbf16>
    %25 = vector.broadcast %1 : vector<1x256xbf16> to vector<8x256xbf16>
    %26 = arith.mulf %24, %25 : vector<8x256xbf16>
    %c40 = arith.constant 40 : index
    %c0_23 = arith.constant 0 : index
    %27 = vector.load %arg7[%c40, %c0_23] : memref<72x256xbf16, #tpu.memory_space<vmem>>, vector<8x256xbf16>
    tpu.vector_store %arg7[%c40, %c0_23], %26 {strides = array<i32>} : memref<72x256xbf16, #tpu.memory_space<vmem>>, vector<8x256xbf16>,
    %c0_24 = arith.constant 0 : index
    %c0_25 = arith.constant 0 : index
    %c32_26 = arith.constant 32 : index
    %28 = vector.load %arg1[%c0_24, %c0_25, %c32_26] : memref<1x8x290xbf16, #tpu.memory_space<vmem>>, vector<1x8x256xbf16>
    %29 = vector.shape_cast %28 : vector<1x8x256xbf16> to vector<8x256xbf16>
    %30 = vector.broadcast %0 : vector<1x256xbf16> to vector<8x256xbf16>
    %31 = arith.mulf %29, %30 : vector<8x256xbf16>
    %c48 = arith.constant 48 : index
    %c0_27 = arith.constant 0 : index
    %32 = vector.load %arg7[%c48, %c0_27] : memref<72x256xbf16, #tpu.memory_space<vmem>>, vector<8x256xbf16>
    tpu.vector_store %arg7[%c48, %c0_27], %31 {strides = array<i32>} : memref<72x256xbf16, #tpu.memory_space<vmem>>, vector<8x256xbf16>,
    %c0_28 = arith.constant 0 : index
    %c0_29 = arith.constant 0 : index
    %c33 = arith.constant 33 : index
    %33 = vector.load %arg1[%c0_28, %c0_29, %c33] : memref<1x8x290xbf16, #tpu.memory_space<vmem>>, vector<1x8x256xbf16>
    %34 = vector.shape_cast %33 : vector<1x8x256xbf16> to vector<8x256xbf16>
    %c56 = arith.constant 56 : index
    %c0_30 = arith.constant 0 : index
    %35 = vector.load %arg7[%c56, %c0_30] : memref<72x256xbf16, #tpu.memory_space<vmem>>, vector<8x256xbf16>
    tpu.vector_store %arg7[%c56, %c0_30], %34 {strides = array<i32>} : memref<72x256xbf16, #tpu.memory_space<vmem>>, vector<8x256xbf16>,
    %c0_31 = arith.constant 0 : index
    %c0_32 = arith.constant 0 : index
    %c34 = arith.constant 34 : index
    %36 = vector.load %arg1[%c0_31, %c0_32, %c34] : memref<1x8x290xbf16, #tpu.memory_space<vmem>>, vector<1x8x256xbf16>
    %37 = vector.shape_cast %36 : vector<1x8x256xbf16> to vector<8x256xbf16>
    %38 = vector.broadcast %1 : vector<1x256xbf16> to vector<8x256xbf16>
    %39 = arith.mulf %37, %38 : vector<8x256xbf16>
    %c64 = arith.constant 64 : index
    %c0_33 = arith.constant 0 : index
    %40 = vector.load %arg7[%c64, %c0_33] : memref<72x256xbf16, #tpu.memory_space<vmem>>, vector<8x256xbf16>
    tpu.vector_store %arg7[%c64, %c0_33], %39 {strides = array<i32>} : memref<72x256xbf16, #tpu.memory_space<vmem>>, vector<8x256xbf16>,
    %c0_34 = arith.constant 0 : index
    %c0_35 = arith.constant 0 : index
    %41 = vector.load %arg2[%c0_34, %c0_35] : memref<8x72xbf16, #tpu.memory_space<vmem>>, vector<8x72xbf16>
    %c0_36 = arith.constant 0 : index
    %c0_37 = arith.constant 0 : index
    %42 = vector.load %arg7[%c0_36, %c0_37] : memref<72x256xbf16, #tpu.memory_space<vmem>>, vector<72x256xbf16>
    %cst = arith.constant dense<0.000000e+00> : vector<8x256xf32>
    %43 = tpu.matmul %41, %42, %cst {dimension_numbers = #tpu.dot_dimension_numbers<[1], [0], [0], [1], [0, 0, 1, 1], [], []>} : vector<8x72xbf16>, vector<72x256xbf16>, vector<8x256xf32> -> vector<8x256xf32>
    %44 = vector.shape_cast %43 : vector<8x256xf32> to vector<1x8x256xf32>
    %cst_38 = arith.constant dense<0.000000e+00> : vector<1xf32>
    %45 = vector.multi_reduction <add>, %44, %cst_38 [1, 2] : vector<1x8x256xf32> to vector<1xf32>
    %46 = vector.shape_cast %45 : vector<1xf32> to vector<1x1x1xf32>
    %47 = vector.extract %46[0, 0, 0] : f32 from vector<1x1x1xf32>
    %48 = arith.mulf %43, %43 : vector<8x256xf32>
    %49 = vector.shape_cast %48 : vector<8x256xf32> to vector<1x8x256xf32>
    %cst_39 = arith.constant dense<0.000000e+00> : vector<1xf32>
    %50 = vector.multi_reduction <add>, %49, %cst_39 [1, 2] : vector<1x8x256xf32> to vector<1xf32>
    %51 = vector.shape_cast %50 : vector<1xf32> to vector<1x1x1xf32>
    %52 = vector.extract %51[0, 0, 0] : f32 from vector<1x1x1xf32>
    %cst_40 = arith.constant 4.8828125E-4 : f32
    %53 = arith.mulf %47, %cst_40 : f32
    %cst_41 = arith.constant 4.8828125E-4 : f32
    %54 = arith.mulf %52, %cst_41 : f32
    %55 = arith.mulf %53, %53 : f32
    %56 = arith.subf %54, %55 : f32
    %cst_42 = arith.constant 0.000000e+00 : f32
    %57 = arith.maximumf %56, %cst_42 : f32
    %c0_43 = arith.constant 0 : index
    %c0_44 = arith.constant 0 : index
    %c0_45 = arith.constant 0 : index
    %58 = vector.load %arg4[%c0_43, %c0_44, %c0_45] : memref<1x8x1xf32, #tpu.memory_space<vmem>>, vector<1x8x1xf32>
    %59 = vector.shape_cast %58 : vector<1x8x1xf32> to vector<8x1xf32>
    %cst_46 = arith.constant 9.99999974E-6 : f32
    %60 = arith.addf %57, %cst_46 : f32
    %61 = math.rsqrt %60 : f32
    %62 = vector.broadcast %61 : f32 to vector<8x1xf32>
    %63 = arith.mulf %59, %62 : vector<8x1xf32>
    %c0_47 = arith.constant 0 : index
    %c0_48 = arith.constant 0 : index
    %c0_49 = arith.constant 0 : index
    %64 = vector.load %arg5[%c0_47, %c0_48, %c0_49] : memref<1x8x1xf32, #tpu.memory_space<vmem>>, vector<1x8x1xf32>
    %65 = vector.shape_cast %64 : vector<1x8x1xf32> to vector<8x1xf32>
    %66 = vector.broadcast %53 : f32 to vector<8x1xf32>
    %67 = arith.mulf %66, %63 : vector<8x1xf32>
    %68 = arith.subf %65, %67 : vector<8x1xf32>
    %69 = vector.broadcast %63 : vector<8x1xf32> to vector<8x256xf32>
    %70 = arith.mulf %43, %69 : vector<8x256xf32>
    %71 = vector.broadcast %68 : vector<8x1xf32> to vector<8x256xf32>
    %72 = arith.addf %70, %71 : vector<8x256xf32>
    %cst_50 = arith.constant 5.000000e-01 : f32
    %73 = vector.broadcast %cst_50 : f32 to vector<8x256xf32>
    %74 = arith.mulf %73, %72 : vector<8x256xf32>
    %cst_51 = arith.constant 0.707106769 : f32
    %75 = vector.broadcast %cst_51 : f32 to vector<8x256xf32>
    %76 = arith.mulf %72, %75 : vector<8x256xf32>
    %cst_52 = arith.constant 0.000000e+00 : f32
    %77 = vector.broadcast %cst_52 : f32 to vector<8x256xf32>
    %78 = arith.cmpf oge, %76, %77 : vector<8x256xf32>
    %cst_53 = arith.constant 1.000000e+00 : f32
    %cst_54 = arith.constant -1.000000e+00 : f32
    %79 = vector.broadcast %cst_53 : f32 to vector<8x256xf32>
    %80 = vector.broadcast %cst_54 : f32 to vector<8x256xf32>
    %81 = arith.select %78, %79, %80 : vector<8x256xi1>, vector<8x256xf32>
    %82 = math.absf %76 : vector<8x256xf32>
    %cst_55 = arith.constant 0.327591091 : f32
    %83 = vector.broadcast %cst_55 : f32 to vector<8x256xf32>
    %84 = arith.mulf %83, %82 : vector<8x256xf32>
    %cst_56 = arith.constant 1.000000e+00 : f32
    %85 = vector.broadcast %cst_56 : f32 to vector<8x256xf32>
    %86 = arith.addf %85, %84 : vector<8x256xf32>
    %cst_57 = arith.constant 1.000000e+00 : f32
    %87 = vector.broadcast %cst_57 : f32 to vector<8x256xf32>
    %88 = arith.divf %87, %86 : vector<8x256xf32>
    %cst_58 = arith.constant 1.06140542 : f32
    %89 = vector.broadcast %cst_58 : f32 to vector<8x256xf32>
    %90 = arith.mulf %89, %88 : vector<8x256xf32>
    %cst_59 = arith.constant -1.45315206 : f32
    %91 = vector.broadcast %cst_59 : f32 to vector<8x256xf32>
    %92 = arith.addf %90, %91 : vector<8x256xf32>
    %93 = arith.mulf %92, %88 : vector<8x256xf32>
    %cst_60 = arith.constant 1.42141378 : f32
    %94 = vector.broadcast %cst_60 : f32 to vector<8x256xf32>
    %95 = arith.addf %93, %94 : vector<8x256xf32>
    %96 = arith.mulf %95, %88 : vector<8x256xf32>
    %cst_61 = arith.constant -0.284496725 : f32
    %97 = vector.broadcast %cst_61 : f32 to vector<8x256xf32>
    %98 = arith.addf %96, %97 : vector<8x256xf32>
    %99 = arith.mulf %98, %88 : vector<8x256xf32>
    %cst_62 = arith.constant 0.254829586 : f32
    %100 = vector.broadcast %cst_62 : f32 to vector<8x256xf32>
    %101 = arith.addf %99, %100 : vector<8x256xf32>
    %102 = arith.mulf %101, %88 : vector<8x256xf32>
    %cst_63 = arith.constant 0.000000e+00 : f32
    %103 = vector.broadcast %cst_63 : f32 to vector<8x256xf32>
    %104 = arith.subf %103, %82 : vector<8x256xf32>
    %105 = arith.mulf %104, %82 : vector<8x256xf32>
    %106 = math.exp %105 : vector<8x256xf32>
    %107 = arith.mulf %102, %106 : vector<8x256xf32>
    %cst_64 = arith.constant 1.000000e+00 : f32
    %108 = vector.broadcast %cst_64 : f32 to vector<8x256xf32>
    %109 = arith.subf %108, %107 : vector<8x256xf32>
    %110 = arith.mulf %81, %109 : vector<8x256xf32>
    %cst_65 = arith.constant 1.000000e+00 : f32
    %111 = vector.broadcast %cst_65 : f32 to vector<8x256xf32>
    %112 = arith.addf %111, %110 : vector<8x256xf32>
    %113 = arith.mulf %74, %112 : vector<8x256xf32>
    %114 = arith.truncf %113 : vector<8x256xf32> to vector<8x256xbf16>
    %c0_66 = arith.constant 0 : index
    %c0_67 = arith.constant 0 : index
    %c0_68 = arith.constant 0 : index
    %115 = vector.load %arg6[%c0_66, %c0_67, %c0_68] : memref<1x8x256xbf16, #tpu.memory_space<vmem>>, vector<1x8x256xbf16>
    %116 = vector.shape_cast %115 : vector<1x8x256xbf16> to vector<8x256xbf16>
    %117 = vector.shape_cast %114 : vector<8x256xbf16> to vector<1x8x256xbf16>
    tpu.vector_store %arg6[%c0_66, %c0_67, %c0_68], %117 {strides = array<i32>} : memref<1x8x256xbf16, #tpu.memory_space<vmem>>, vector<1x8x256xbf16>,
    return
  }
  func.func @transform_0(%arg0: i32) -> (i32, i32, i32) {
    %c0_i32 = arith.constant 0 : i32
    %c0_i32_0 = arith.constant 0 : i32
    %c0_i32_1 = arith.constant 0 : i32
    return %arg0, %c0_i32, %c0_i32_0 : i32, i32, i32
  }
  func.func @transform_1(%arg0: i32) -> (i32, i32) {
    %c0_i32 = arith.constant 0 : i32
    %c0_i32_0 = arith.constant 0 : i32
    %c0_i32_1 = arith.constant 0 : i32
    return %c0_i32, %c0_i32_0 : i32, i32
  }
  func.func @transform_2(%arg0: i32) -> (i32, i32) {
    %c0_i32 = arith.constant 0 : i32
    %c0_i32_0 = arith.constant 0 : i32
    %c0_i32_1 = arith.constant 0 : i32
    return %c0_i32, %c0_i32_0 : i32, i32
  }
  func.func @transform_3(%arg0: i32) -> (i32, i32, i32) {
    %c0_i32 = arith.constant 0 : i32
    %c0_i32_0 = arith.constant 0 : i32
    %c0_i32_1 = arith.constant 0 : i32
    %c0_i32_2 = arith.constant 0 : i32
    return %c0_i32, %c0_i32_0, %c0_i32_1 : i32, i32, i32
  }
  func.func @transform_4(%arg0: i32) -> (i32, i32, i32) {
    %c0_i32 = arith.constant 0 : i32
    %c0_i32_0 = arith.constant 0 : i32
    %c0_i32_1 = arith.constant 0 : i32
    %c0_i32_2 = arith.constant 0 : i32
    return %c0_i32, %c0_i32_0, %c0_i32_1 : i32, i32, i32
  }
  func.func @transform_5(%arg0: i32) -> (i32, i32, i32) {
    %c0_i32 = arith.constant 0 : i32
    %c0_i32_0 = arith.constant 0 : i32
    %c0_i32_1 = arith.constant 0 : i32
    return %arg0, %c0_i32, %c0_i32_0 : i32, i32, i32
  }
}

module attributes {stable_mosaic.version = 11 : i64} {
  func.func @kernel(%arg0: i32, %arg1: memref<1x8x290xbf16, #tpu.memory_space<vmem>>, %arg2: memref<8x72xbf16, #tpu.memory_space<vmem>>, %arg3: memref<2x256xbf16, #tpu.memory_space<vmem>>, %arg4: memref<1x8x1xf32, #tpu.memory_space<vmem>>, %arg5: memref<1x8x1xf32, #tpu.memory_space<vmem>>, %arg6: memref<1x8x256xbf16, #tpu.memory_space<vmem>>, %arg7: memref<1x8x256xbf16, #tpu.memory_space<vmem>>, %arg8: memref<72x256xbf16, #tpu.memory_space<vmem>>) attributes {dimension_semantics = [#tpu.dimension_semantics<parallel>], iteration_bounds = array<i64: 2>, scalar_prefetch = 0 : i64, scratch_operands = 1 : i64, tpu.core_type = #tpu.core_type<tc>, window_params = [{transform_indices = @transform_0, window_bounds = array<i64: 1, 8, 290>}, {pipeline_mode = #tpu.pipeline_mode<synchronous>, transform_indices = @transform_1, window_bounds = array<i64: 8, 72>}, {pipeline_mode = #tpu.pipeline_mode<synchronous>, transform_indices = @transform_2, window_bounds = array<i64: 2, 256>}, {pipeline_mode = #tpu.pipeline_mode<synchronous>, transform_indices = @transform_3, window_bounds = array<i64: 1, 8, 1>}, {pipeline_mode = #tpu.pipeline_mode<synchronous>, transform_indices = @transform_4, window_bounds = array<i64: 1, 8, 1>}, {transform_indices = @transform_5, window_bounds = array<i64: 1, 8, 256>}, {transform_indices = @transform_6, window_bounds = array<i64: 1, 8, 256>}]} {
    %c0 = arith.constant 0 : index
    %c0_0 = arith.constant 0 : index
    %0 = vector.load %arg3[%c0, %c0_0] : memref<2x256xbf16, #tpu.memory_space<vmem>>, vector<1x256xbf16>
    %c1 = arith.constant 1 : index
    %c0_1 = arith.constant 0 : index
    %1 = vector.load %arg3[%c1, %c0_1] : memref<2x256xbf16, #tpu.memory_space<vmem>>, vector<1x256xbf16>
    %c0_2 = arith.constant 0 : index
    %c0_3 = arith.constant 0 : index
    %c0_4 = arith.constant 0 : index
    %2 = vector.load %arg1[%c0_2, %c0_3, %c0_4] : memref<1x8x290xbf16, #tpu.memory_space<vmem>>, vector<1x8x256xbf16>
    %3 = vector.shape_cast %2 : vector<1x8x256xbf16> to vector<8x256xbf16>
    %4 = vector.broadcast %0 : vector<1x256xbf16> to vector<8x256xbf16>
    %5 = arith.mulf %3, %4 : vector<8x256xbf16>
    %c0_5 = arith.constant 0 : index
    %c0_6 = arith.constant 0 : index
    %6 = vector.load %arg8[%c0_5, %c0_6] : memref<72x256xbf16, #tpu.memory_space<vmem>>, vector<8x256xbf16>
    tpu.vector_store %arg8[%c0_5, %c0_6], %5 {strides = array<i32>} : memref<72x256xbf16, #tpu.memory_space<vmem>>, vector<8x256xbf16>,
    %c0_7 = arith.constant 0 : index
    %c0_8 = arith.constant 0 : index
    %c1_9 = arith.constant 1 : index
    %7 = vector.load %arg1[%c0_7, %c0_8, %c1_9] : memref<1x8x290xbf16, #tpu.memory_space<vmem>>, vector<1x8x256xbf16>
    %8 = vector.shape_cast %7 : vector<1x8x256xbf16> to vector<8x256xbf16>
    %c8 = arith.constant 8 : index
    %c0_10 = arith.constant 0 : index
    %9 = vector.load %arg8[%c8, %c0_10] : memref<72x256xbf16, #tpu.memory_space<vmem>>, vector<8x256xbf16>
    tpu.vector_store %arg8[%c8, %c0_10], %8 {strides = array<i32>} : memref<72x256xbf16, #tpu.memory_space<vmem>>, vector<8x256xbf16>,
    %c0_11 = arith.constant 0 : index
    %c0_12 = arith.constant 0 : index
    %c2 = arith.constant 2 : index
    %10 = vector.load %arg1[%c0_11, %c0_12, %c2] : memref<1x8x290xbf16, #tpu.memory_space<vmem>>, vector<1x8x256xbf16>
    %11 = vector.shape_cast %10 : vector<1x8x256xbf16> to vector<8x256xbf16>
    %12 = vector.broadcast %1 : vector<1x256xbf16> to vector<8x256xbf16>
    %13 = arith.mulf %11, %12 : vector<8x256xbf16>
    %c16 = arith.constant 16 : index
    %c0_13 = arith.constant 0 : index
    %14 = vector.load %arg8[%c16, %c0_13] : memref<72x256xbf16, #tpu.memory_space<vmem>>, vector<8x256xbf16>
    tpu.vector_store %arg8[%c16, %c0_13], %13 {strides = array<i32>} : memref<72x256xbf16, #tpu.memory_space<vmem>>, vector<8x256xbf16>,
    %c0_14 = arith.constant 0 : index
    %c0_15 = arith.constant 0 : index
    %c16_16 = arith.constant 16 : index
    %15 = vector.load %arg1[%c0_14, %c0_15, %c16_16] : memref<1x8x290xbf16, #tpu.memory_space<vmem>>, vector<1x8x256xbf16>
    %16 = vector.shape_cast %15 : vector<1x8x256xbf16> to vector<8x256xbf16>
    %17 = vector.broadcast %0 : vector<1x256xbf16> to vector<8x256xbf16>
    %18 = arith.mulf %16, %17 : vector<8x256xbf16>
    %c24 = arith.constant 24 : index
    %c0_17 = arith.constant 0 : index
    %19 = vector.load %arg8[%c24, %c0_17] : memref<72x256xbf16, #tpu.memory_space<vmem>>, vector<8x256xbf16>
    tpu.vector_store %arg8[%c24, %c0_17], %18 {strides = array<i32>} : memref<72x256xbf16, #tpu.memory_space<vmem>>, vector<8x256xbf16>,
    %c0_18 = arith.constant 0 : index
    %c0_19 = arith.constant 0 : index
    %c17 = arith.constant 17 : index
    %20 = vector.load %arg1[%c0_18, %c0_19, %c17] : memref<1x8x290xbf16, #tpu.memory_space<vmem>>, vector<1x8x256xbf16>
    %21 = vector.shape_cast %20 : vector<1x8x256xbf16> to vector<8x256xbf16>
    %c32 = arith.constant 32 : index
    %c0_20 = arith.constant 0 : index
    %22 = vector.load %arg8[%c32, %c0_20] : memref<72x256xbf16, #tpu.memory_space<vmem>>, vector<8x256xbf16>
    tpu.vector_store %arg8[%c32, %c0_20], %21 {strides = array<i32>} : memref<72x256xbf16, #tpu.memory_space<vmem>>, vector<8x256xbf16>,
    %c0_21 = arith.constant 0 : index
    %c0_22 = arith.constant 0 : index
    %c18 = arith.constant 18 : index
    %23 = vector.load %arg1[%c0_21, %c0_22, %c18] : memref<1x8x290xbf16, #tpu.memory_space<vmem>>, vector<1x8x256xbf16>
    %24 = vector.shape_cast %23 : vector<1x8x256xbf16> to vector<8x256xbf16>
    %25 = vector.broadcast %1 : vector<1x256xbf16> to vector<8x256xbf16>
    %26 = arith.mulf %24, %25 : vector<8x256xbf16>
    %c40 = arith.constant 40 : index
    %c0_23 = arith.constant 0 : index
    %27 = vector.load %arg8[%c40, %c0_23] : memref<72x256xbf16, #tpu.memory_space<vmem>>, vector<8x256xbf16>
    tpu.vector_store %arg8[%c40, %c0_23], %26 {strides = array<i32>} : memref<72x256xbf16, #tpu.memory_space<vmem>>, vector<8x256xbf16>,
    %c0_24 = arith.constant 0 : index
    %c0_25 = arith.constant 0 : index
    %c32_26 = arith.constant 32 : index
    %28 = vector.load %arg1[%c0_24, %c0_25, %c32_26] : memref<1x8x290xbf16, #tpu.memory_space<vmem>>, vector<1x8x256xbf16>
    %29 = vector.shape_cast %28 : vector<1x8x256xbf16> to vector<8x256xbf16>
    %30 = vector.broadcast %0 : vector<1x256xbf16> to vector<8x256xbf16>
    %31 = arith.mulf %29, %30 : vector<8x256xbf16>
    %c48 = arith.constant 48 : index
    %c0_27 = arith.constant 0 : index
    %32 = vector.load %arg8[%c48, %c0_27] : memref<72x256xbf16, #tpu.memory_space<vmem>>, vector<8x256xbf16>
    tpu.vector_store %arg8[%c48, %c0_27], %31 {strides = array<i32>} : memref<72x256xbf16, #tpu.memory_space<vmem>>, vector<8x256xbf16>,
    %c0_28 = arith.constant 0 : index
    %c0_29 = arith.constant 0 : index
    %c33 = arith.constant 33 : index
    %33 = vector.load %arg1[%c0_28, %c0_29, %c33] : memref<1x8x290xbf16, #tpu.memory_space<vmem>>, vector<1x8x256xbf16>
    %34 = vector.shape_cast %33 : vector<1x8x256xbf16> to vector<8x256xbf16>
    %c56 = arith.constant 56 : index
    %c0_30 = arith.constant 0 : index
    %35 = vector.load %arg8[%c56, %c0_30] : memref<72x256xbf16, #tpu.memory_space<vmem>>, vector<8x256xbf16>
    tpu.vector_store %arg8[%c56, %c0_30], %34 {strides = array<i32>} : memref<72x256xbf16, #tpu.memory_space<vmem>>, vector<8x256xbf16>,
    %c0_31 = arith.constant 0 : index
    %c0_32 = arith.constant 0 : index
    %c34 = arith.constant 34 : index
    %36 = vector.load %arg1[%c0_31, %c0_32, %c34] : memref<1x8x290xbf16, #tpu.memory_space<vmem>>, vector<1x8x256xbf16>
    %37 = vector.shape_cast %36 : vector<1x8x256xbf16> to vector<8x256xbf16>
    %38 = vector.broadcast %1 : vector<1x256xbf16> to vector<8x256xbf16>
    %39 = arith.mulf %37, %38 : vector<8x256xbf16>
    %c64 = arith.constant 64 : index
    %c0_33 = arith.constant 0 : index
    %40 = vector.load %arg8[%c64, %c0_33] : memref<72x256xbf16, #tpu.memory_space<vmem>>, vector<8x256xbf16>
    tpu.vector_store %arg8[%c64, %c0_33], %39 {strides = array<i32>} : memref<72x256xbf16, #tpu.memory_space<vmem>>, vector<8x256xbf16>,
    %c0_34 = arith.constant 0 : index
    %c0_35 = arith.constant 0 : index
    %41 = vector.load %arg2[%c0_34, %c0_35] : memref<8x72xbf16, #tpu.memory_space<vmem>>, vector<8x72xbf16>
    %c0_36 = arith.constant 0 : index
    %c0_37 = arith.constant 0 : index
    %42 = vector.load %arg8[%c0_36, %c0_37] : memref<72x256xbf16, #tpu.memory_space<vmem>>, vector<72x256xbf16>
    %cst = arith.constant dense<0.000000e+00> : vector<8x256xf32>
    %43 = tpu.matmul %41, %42, %cst {dimension_numbers = #tpu.dot_dimension_numbers<[1], [0], [0], [1], [0, 0, 1, 1], [], []>} : vector<8x72xbf16>, vector<72x256xbf16>, vector<8x256xf32> -> vector<8x256xf32>
    %44 = vector.shape_cast %43 : vector<8x256xf32> to vector<1x8x256xf32>
    %cst_38 = arith.constant dense<0.000000e+00> : vector<1xf32>
    %45 = vector.multi_reduction <add>, %44, %cst_38 [1, 2] : vector<1x8x256xf32> to vector<1xf32>
    %46 = vector.shape_cast %45 : vector<1xf32> to vector<1x1x1xf32>
    %47 = vector.extract %46[0, 0, 0] : f32 from vector<1x1x1xf32>
    %48 = arith.mulf %43, %43 : vector<8x256xf32>
    %49 = vector.shape_cast %48 : vector<8x256xf32> to vector<1x8x256xf32>
    %cst_39 = arith.constant dense<0.000000e+00> : vector<1xf32>
    %50 = vector.multi_reduction <add>, %49, %cst_39 [1, 2] : vector<1x8x256xf32> to vector<1xf32>
    %51 = vector.shape_cast %50 : vector<1xf32> to vector<1x1x1xf32>
    %52 = vector.extract %51[0, 0, 0] : f32 from vector<1x1x1xf32>
    %cst_40 = arith.constant 4.8828125E-4 : f32
    %53 = arith.mulf %47, %cst_40 : f32
    %cst_41 = arith.constant 4.8828125E-4 : f32
    %54 = arith.mulf %52, %cst_41 : f32
    %55 = arith.mulf %53, %53 : f32
    %56 = arith.subf %54, %55 : f32
    %cst_42 = arith.constant 0.000000e+00 : f32
    %57 = arith.maximumf %56, %cst_42 : f32
    %c0_43 = arith.constant 0 : index
    %c0_44 = arith.constant 0 : index
    %c0_45 = arith.constant 0 : index
    %58 = vector.load %arg4[%c0_43, %c0_44, %c0_45] : memref<1x8x1xf32, #tpu.memory_space<vmem>>, vector<1x8x1xf32>
    %59 = vector.shape_cast %58 : vector<1x8x1xf32> to vector<8x1xf32>
    %cst_46 = arith.constant 9.99999974E-6 : f32
    %60 = arith.addf %57, %cst_46 : f32
    %61 = math.rsqrt %60 : f32
    %62 = vector.broadcast %61 : f32 to vector<8x1xf32>
    %63 = arith.mulf %59, %62 : vector<8x1xf32>
    %c0_47 = arith.constant 0 : index
    %c0_48 = arith.constant 0 : index
    %c0_49 = arith.constant 0 : index
    %64 = vector.load %arg5[%c0_47, %c0_48, %c0_49] : memref<1x8x1xf32, #tpu.memory_space<vmem>>, vector<1x8x1xf32>
    %65 = vector.shape_cast %64 : vector<1x8x1xf32> to vector<8x1xf32>
    %66 = vector.broadcast %53 : f32 to vector<8x1xf32>
    %67 = arith.mulf %66, %63 : vector<8x1xf32>
    %68 = arith.subf %65, %67 : vector<8x1xf32>
    %69 = vector.broadcast %63 : vector<8x1xf32> to vector<8x256xf32>
    %70 = arith.mulf %43, %69 : vector<8x256xf32>
    %71 = vector.broadcast %68 : vector<8x1xf32> to vector<8x256xf32>
    %72 = arith.addf %70, %71 : vector<8x256xf32>
    %c0_50 = arith.constant 0 : index
    %c0_51 = arith.constant 0 : index
    %c0_52 = arith.constant 0 : index
    %73 = vector.load %arg6[%c0_50, %c0_51, %c0_52] : memref<1x8x256xbf16, #tpu.memory_space<vmem>>, vector<1x8x256xbf16>
    %74 = vector.shape_cast %73 : vector<1x8x256xbf16> to vector<8x256xbf16>
    %75 = arith.extf %74 : vector<8x256xbf16> to vector<8x256xf32>
    %76 = arith.addf %72, %75 : vector<8x256xf32>
    %cst_53 = arith.constant 5.000000e-01 : f32
    %77 = vector.broadcast %cst_53 : f32 to vector<8x256xf32>
    %78 = arith.mulf %77, %76 : vector<8x256xf32>
    %cst_54 = arith.constant 0.707106769 : f32
    %79 = vector.broadcast %cst_54 : f32 to vector<8x256xf32>
    %80 = arith.mulf %76, %79 : vector<8x256xf32>
    %cst_55 = arith.constant 0.000000e+00 : f32
    %81 = vector.broadcast %cst_55 : f32 to vector<8x256xf32>
    %82 = arith.cmpf oge, %80, %81 : vector<8x256xf32>
    %cst_56 = arith.constant 1.000000e+00 : f32
    %cst_57 = arith.constant -1.000000e+00 : f32
    %83 = vector.broadcast %cst_56 : f32 to vector<8x256xf32>
    %84 = vector.broadcast %cst_57 : f32 to vector<8x256xf32>
    %85 = arith.select %82, %83, %84 : vector<8x256xi1>, vector<8x256xf32>
    %86 = math.absf %80 : vector<8x256xf32>
    %cst_58 = arith.constant 0.327591091 : f32
    %87 = vector.broadcast %cst_58 : f32 to vector<8x256xf32>
    %88 = arith.mulf %87, %86 : vector<8x256xf32>
    %cst_59 = arith.constant 1.000000e+00 : f32
    %89 = vector.broadcast %cst_59 : f32 to vector<8x256xf32>
    %90 = arith.addf %89, %88 : vector<8x256xf32>
    %cst_60 = arith.constant 1.000000e+00 : f32
    %91 = vector.broadcast %cst_60 : f32 to vector<8x256xf32>
    %92 = arith.divf %91, %90 : vector<8x256xf32>
    %cst_61 = arith.constant 1.06140542 : f32
    %93 = vector.broadcast %cst_61 : f32 to vector<8x256xf32>
    %94 = arith.mulf %93, %92 : vector<8x256xf32>
    %cst_62 = arith.constant -1.45315206 : f32
    %95 = vector.broadcast %cst_62 : f32 to vector<8x256xf32>
    %96 = arith.addf %94, %95 : vector<8x256xf32>
    %97 = arith.mulf %96, %92 : vector<8x256xf32>
    %cst_63 = arith.constant 1.42141378 : f32
    %98 = vector.broadcast %cst_63 : f32 to vector<8x256xf32>
    %99 = arith.addf %97, %98 : vector<8x256xf32>
    %100 = arith.mulf %99, %92 : vector<8x256xf32>
    %cst_64 = arith.constant -0.284496725 : f32
    %101 = vector.broadcast %cst_64 : f32 to vector<8x256xf32>
    %102 = arith.addf %100, %101 : vector<8x256xf32>
    %103 = arith.mulf %102, %92 : vector<8x256xf32>
    %cst_65 = arith.constant 0.254829586 : f32
    %104 = vector.broadcast %cst_65 : f32 to vector<8x256xf32>
    %105 = arith.addf %103, %104 : vector<8x256xf32>
    %106 = arith.mulf %105, %92 : vector<8x256xf32>
    %cst_66 = arith.constant 0.000000e+00 : f32
    %107 = vector.broadcast %cst_66 : f32 to vector<8x256xf32>
    %108 = arith.subf %107, %86 : vector<8x256xf32>
    %109 = arith.mulf %108, %86 : vector<8x256xf32>
    %110 = math.exp %109 : vector<8x256xf32>
    %111 = arith.mulf %106, %110 : vector<8x256xf32>
    %cst_67 = arith.constant 1.000000e+00 : f32
    %112 = vector.broadcast %cst_67 : f32 to vector<8x256xf32>
    %113 = arith.subf %112, %111 : vector<8x256xf32>
    %114 = arith.mulf %85, %113 : vector<8x256xf32>
    %cst_68 = arith.constant 1.000000e+00 : f32
    %115 = vector.broadcast %cst_68 : f32 to vector<8x256xf32>
    %116 = arith.addf %115, %114 : vector<8x256xf32>
    %117 = arith.mulf %78, %116 : vector<8x256xf32>
    %118 = arith.truncf %117 : vector<8x256xf32> to vector<8x256xbf16>
    %c0_69 = arith.constant 0 : index
    %c0_70 = arith.constant 0 : index
    %c0_71 = arith.constant 0 : index
    %119 = vector.load %arg7[%c0_69, %c0_70, %c0_71] : memref<1x8x256xbf16, #tpu.memory_space<vmem>>, vector<1x8x256xbf16>
    %120 = vector.shape_cast %119 : vector<1x8x256xbf16> to vector<8x256xbf16>
    %121 = vector.shape_cast %118 : vector<8x256xbf16> to vector<1x8x256xbf16>
    tpu.vector_store %arg7[%c0_69, %c0_70, %c0_71], %121 {strides = array<i32>} : memref<1x8x256xbf16, #tpu.memory_space<vmem>>, vector<1x8x256xbf16>,
    return
  }
  func.func @transform_0(%arg0: i32) -> (i32, i32, i32) {
    %c0_i32 = arith.constant 0 : i32
    %c0_i32_0 = arith.constant 0 : i32
    %c0_i32_1 = arith.constant 0 : i32
    return %arg0, %c0_i32, %c0_i32_0 : i32, i32, i32
  }
  func.func @transform_1(%arg0: i32) -> (i32, i32) {
    %c0_i32 = arith.constant 0 : i32
    %c0_i32_0 = arith.constant 0 : i32
    %c0_i32_1 = arith.constant 0 : i32
    return %c0_i32, %c0_i32_0 : i32, i32
  }
  func.func @transform_2(%arg0: i32) -> (i32, i32) {
    %c0_i32 = arith.constant 0 : i32
    %c0_i32_0 = arith.constant 0 : i32
    %c0_i32_1 = arith.constant 0 : i32
    return %c0_i32, %c0_i32_0 : i32, i32
  }
  func.func @transform_3(%arg0: i32) -> (i32, i32, i32) {
    %c0_i32 = arith.constant 0 : i32
    %c0_i32_0 = arith.constant 0 : i32
    %c0_i32_1 = arith.constant 0 : i32
    %c0_i32_2 = arith.constant 0 : i32
    return %c0_i32, %c0_i32_0, %c0_i32_1 : i32, i32, i32
  }
  func.func @transform_4(%arg0: i32) -> (i32, i32, i32) {
    %c0_i32 = arith.constant 0 : i32
    %c0_i32_0 = arith.constant 0 : i32
    %c0_i32_1 = arith.constant 0 : i32
    %c0_i32_2 = arith.constant 0 : i32
    return %c0_i32, %c0_i32_0, %c0_i32_1 : i32, i32, i32
  }
  func.func @transform_5(%arg0: i32) -> (i32, i32, i32) {
    %c0_i32 = arith.constant 0 : i32
    %c0_i32_0 = arith.constant 0 : i32
    %c0_i32_1 = arith.constant 0 : i32
    return %arg0, %c0_i32, %c0_i32_0 : i32, i32, i32
  }
  func.func @transform_6(%arg0: i32) -> (i32, i32, i32) {
    %c0_i32 = arith.constant 0 : i32
    %c0_i32_0 = arith.constant 0 : i32
    %c0_i32_1 = arith.constant 0 : i32
    return %arg0, %c0_i32, %c0_i32_0 : i32, i32, i32
  }
}

module attributes {stable_mosaic.version = 11 : i64} {
  func.func @kernel(%arg0: i32, %arg1: memref<1x8x290xbf16, #tpu.memory_space<vmem>>, %arg2: memref<4x72xbf16, #tpu.memory_space<vmem>>, %arg3: memref<2x256xbf16, #tpu.memory_space<vmem>>, %arg4: memref<1x4x1xf32, #tpu.memory_space<vmem>>, %arg5: memref<1x4x1xf32, #tpu.memory_space<vmem>>, %arg6: memref<1x4x256xbf16, #tpu.memory_space<vmem>>, %arg7: memref<72x256xbf16, #tpu.memory_space<vmem>>) attributes {dimension_semantics = [#tpu.dimension_semantics<parallel>], iteration_bounds = array<i64: 2>, scalar_prefetch = 0 : i64, scratch_operands = 1 : i64, tpu.core_type = #tpu.core_type<tc>, window_params = [{transform_indices = @transform_0, window_bounds = array<i64: 1, 8, 290>}, {pipeline_mode = #tpu.pipeline_mode<synchronous>, transform_indices = @transform_1, window_bounds = array<i64: 4, 72>}, {pipeline_mode = #tpu.pipeline_mode<synchronous>, transform_indices = @transform_2, window_bounds = array<i64: 2, 256>}, {pipeline_mode = #tpu.pipeline_mode<synchronous>, transform_indices = @transform_3, window_bounds = array<i64: 1, 4, 1>}, {pipeline_mode = #tpu.pipeline_mode<synchronous>, transform_indices = @transform_4, window_bounds = array<i64: 1, 4, 1>}, {transform_indices = @transform_5, window_bounds = array<i64: 1, 4, 256>}]} {
    %c0 = arith.constant 0 : index
    %c0_0 = arith.constant 0 : index
    %0 = vector.load %arg3[%c0, %c0_0] : memref<2x256xbf16, #tpu.memory_space<vmem>>, vector<1x256xbf16>
    %c1 = arith.constant 1 : index
    %c0_1 = arith.constant 0 : index
    %1 = vector.load %arg3[%c1, %c0_1] : memref<2x256xbf16, #tpu.memory_space<vmem>>, vector<1x256xbf16>
    %c0_2 = arith.constant 0 : index
    %c0_3 = arith.constant 0 : index
    %c0_4 = arith.constant 0 : index
    %2 = vector.load %arg1[%c0_2, %c0_3, %c0_4] : memref<1x8x290xbf16, #tpu.memory_space<vmem>>, vector<1x8x256xbf16>
    %3 = vector.shape_cast %2 : vector<1x8x256xbf16> to vector<8x256xbf16>
    %4 = vector.broadcast %0 : vector<1x256xbf16> to vector<8x256xbf16>
    %5 = arith.mulf %3, %4 : vector<8x256xbf16>
    %c0_5 = arith.constant 0 : index
    %c0_6 = arith.constant 0 : index
    %6 = vector.load %arg7[%c0_5, %c0_6] : memref<72x256xbf16, #tpu.memory_space<vmem>>, vector<8x256xbf16>
    tpu.vector_store %arg7[%c0_5, %c0_6], %5 {strides = array<i32>} : memref<72x256xbf16, #tpu.memory_space<vmem>>, vector<8x256xbf16>,
    %c0_7 = arith.constant 0 : index
    %c0_8 = arith.constant 0 : index
    %c1_9 = arith.constant 1 : index
    %7 = vector.load %arg1[%c0_7, %c0_8, %c1_9] : memref<1x8x290xbf16, #tpu.memory_space<vmem>>, vector<1x8x256xbf16>
    %8 = vector.shape_cast %7 : vector<1x8x256xbf16> to vector<8x256xbf16>
    %c8 = arith.constant 8 : index
    %c0_10 = arith.constant 0 : index
    %9 = vector.load %arg7[%c8, %c0_10] : memref<72x256xbf16, #tpu.memory_space<vmem>>, vector<8x256xbf16>
    tpu.vector_store %arg7[%c8, %c0_10], %8 {strides = array<i32>} : memref<72x256xbf16, #tpu.memory_space<vmem>>, vector<8x256xbf16>,
    %c0_11 = arith.constant 0 : index
    %c0_12 = arith.constant 0 : index
    %c2 = arith.constant 2 : index
    %10 = vector.load %arg1[%c0_11, %c0_12, %c2] : memref<1x8x290xbf16, #tpu.memory_space<vmem>>, vector<1x8x256xbf16>
    %11 = vector.shape_cast %10 : vector<1x8x256xbf16> to vector<8x256xbf16>
    %12 = vector.broadcast %1 : vector<1x256xbf16> to vector<8x256xbf16>
    %13 = arith.mulf %11, %12 : vector<8x256xbf16>
    %c16 = arith.constant 16 : index
    %c0_13 = arith.constant 0 : index
    %14 = vector.load %arg7[%c16, %c0_13] : memref<72x256xbf16, #tpu.memory_space<vmem>>, vector<8x256xbf16>
    tpu.vector_store %arg7[%c16, %c0_13], %13 {strides = array<i32>} : memref<72x256xbf16, #tpu.memory_space<vmem>>, vector<8x256xbf16>,
    %c0_14 = arith.constant 0 : index
    %c0_15 = arith.constant 0 : index
    %c16_16 = arith.constant 16 : index
    %15 = vector.load %arg1[%c0_14, %c0_15, %c16_16] : memref<1x8x290xbf16, #tpu.memory_space<vmem>>, vector<1x8x256xbf16>
    %16 = vector.shape_cast %15 : vector<1x8x256xbf16> to vector<8x256xbf16>
    %17 = vector.broadcast %0 : vector<1x256xbf16> to vector<8x256xbf16>
    %18 = arith.mulf %16, %17 : vector<8x256xbf16>
    %c24 = arith.constant 24 : index
    %c0_17 = arith.constant 0 : index
    %19 = vector.load %arg7[%c24, %c0_17] : memref<72x256xbf16, #tpu.memory_space<vmem>>, vector<8x256xbf16>
    tpu.vector_store %arg7[%c24, %c0_17], %18 {strides = array<i32>} : memref<72x256xbf16, #tpu.memory_space<vmem>>, vector<8x256xbf16>,
    %c0_18 = arith.constant 0 : index
    %c0_19 = arith.constant 0 : index
    %c17 = arith.constant 17 : index
    %20 = vector.load %arg1[%c0_18, %c0_19, %c17] : memref<1x8x290xbf16, #tpu.memory_space<vmem>>, vector<1x8x256xbf16>
    %21 = vector.shape_cast %20 : vector<1x8x256xbf16> to vector<8x256xbf16>
    %c32 = arith.constant 32 : index
    %c0_20 = arith.constant 0 : index
    %22 = vector.load %arg7[%c32, %c0_20] : memref<72x256xbf16, #tpu.memory_space<vmem>>, vector<8x256xbf16>
    tpu.vector_store %arg7[%c32, %c0_20], %21 {strides = array<i32>} : memref<72x256xbf16, #tpu.memory_space<vmem>>, vector<8x256xbf16>,
    %c0_21 = arith.constant 0 : index
    %c0_22 = arith.constant 0 : index
    %c18 = arith.constant 18 : index
    %23 = vector.load %arg1[%c0_21, %c0_22, %c18] : memref<1x8x290xbf16, #tpu.memory_space<vmem>>, vector<1x8x256xbf16>
    %24 = vector.shape_cast %23 : vector<1x8x256xbf16> to vector<8x256xbf16>
    %25 = vector.broadcast %1 : vector<1x256xbf16> to vector<8x256xbf16>
    %26 = arith.mulf %24, %25 : vector<8x256xbf16>
    %c40 = arith.constant 40 : index
    %c0_23 = arith.constant 0 : index
    %27 = vector.load %arg7[%c40, %c0_23] : memref<72x256xbf16, #tpu.memory_space<vmem>>, vector<8x256xbf16>
    tpu.vector_store %arg7[%c40, %c0_23], %26 {strides = array<i32>} : memref<72x256xbf16, #tpu.memory_space<vmem>>, vector<8x256xbf16>,
    %c0_24 = arith.constant 0 : index
    %c0_25 = arith.constant 0 : index
    %c32_26 = arith.constant 32 : index
    %28 = vector.load %arg1[%c0_24, %c0_25, %c32_26] : memref<1x8x290xbf16, #tpu.memory_space<vmem>>, vector<1x8x256xbf16>
    %29 = vector.shape_cast %28 : vector<1x8x256xbf16> to vector<8x256xbf16>
    %30 = vector.broadcast %0 : vector<1x256xbf16> to vector<8x256xbf16>
    %31 = arith.mulf %29, %30 : vector<8x256xbf16>
    %c48 = arith.constant 48 : index
    %c0_27 = arith.constant 0 : index
    %32 = vector.load %arg7[%c48, %c0_27] : memref<72x256xbf16, #tpu.memory_space<vmem>>, vector<8x256xbf16>
    tpu.vector_store %arg7[%c48, %c0_27], %31 {strides = array<i32>} : memref<72x256xbf16, #tpu.memory_space<vmem>>, vector<8x256xbf16>,
    %c0_28 = arith.constant 0 : index
    %c0_29 = arith.constant 0 : index
    %c33 = arith.constant 33 : index
    %33 = vector.load %arg1[%c0_28, %c0_29, %c33] : memref<1x8x290xbf16, #tpu.memory_space<vmem>>, vector<1x8x256xbf16>
    %34 = vector.shape_cast %33 : vector<1x8x256xbf16> to vector<8x256xbf16>
    %c56 = arith.constant 56 : index
    %c0_30 = arith.constant 0 : index
    %35 = vector.load %arg7[%c56, %c0_30] : memref<72x256xbf16, #tpu.memory_space<vmem>>, vector<8x256xbf16>
    tpu.vector_store %arg7[%c56, %c0_30], %34 {strides = array<i32>} : memref<72x256xbf16, #tpu.memory_space<vmem>>, vector<8x256xbf16>,
    %c0_31 = arith.constant 0 : index
    %c0_32 = arith.constant 0 : index
    %c34 = arith.constant 34 : index
    %36 = vector.load %arg1[%c0_31, %c0_32, %c34] : memref<1x8x290xbf16, #tpu.memory_space<vmem>>, vector<1x8x256xbf16>
    %37 = vector.shape_cast %36 : vector<1x8x256xbf16> to vector<8x256xbf16>
    %38 = vector.broadcast %1 : vector<1x256xbf16> to vector<8x256xbf16>
    %39 = arith.mulf %37, %38 : vector<8x256xbf16>
    %c64 = arith.constant 64 : index
    %c0_33 = arith.constant 0 : index
    %40 = vector.load %arg7[%c64, %c0_33] : memref<72x256xbf16, #tpu.memory_space<vmem>>, vector<8x256xbf16>
    tpu.vector_store %arg7[%c64, %c0_33], %39 {strides = array<i32>} : memref<72x256xbf16, #tpu.memory_space<vmem>>, vector<8x256xbf16>,
    %c0_34 = arith.constant 0 : index
    %c0_35 = arith.constant 0 : index
    %41 = vector.load %arg2[%c0_34, %c0_35] : memref<4x72xbf16, #tpu.memory_space<vmem>>, vector<4x72xbf16>
    %c0_36 = arith.constant 0 : index
    %c0_37 = arith.constant 0 : index
    %42 = vector.load %arg7[%c0_36, %c0_37] : memref<72x256xbf16, #tpu.memory_space<vmem>>, vector<72x256xbf16>
    %cst = arith.constant dense<0.000000e+00> : vector<4x256xf32>
    %43 = tpu.matmul %41, %42, %cst {dimension_numbers = #tpu.dot_dimension_numbers<[1], [0], [0], [1], [0, 0, 1, 1], [], []>} : vector<4x72xbf16>, vector<72x256xbf16>, vector<4x256xf32> -> vector<4x256xf32>
    %44 = vector.shape_cast %43 : vector<4x256xf32> to vector<1x4x256xf32>
    %cst_38 = arith.constant dense<0.000000e+00> : vector<1xf32>
    %45 = vector.multi_reduction <add>, %44, %cst_38 [1, 2] : vector<1x4x256xf32> to vector<1xf32>
    %46 = vector.shape_cast %45 : vector<1xf32> to vector<1x1x1xf32>
    %47 = vector.extract %46[0, 0, 0] : f32 from vector<1x1x1xf32>
    %48 = arith.mulf %43, %43 : vector<4x256xf32>
    %49 = vector.shape_cast %48 : vector<4x256xf32> to vector<1x4x256xf32>
    %cst_39 = arith.constant dense<0.000000e+00> : vector<1xf32>
    %50 = vector.multi_reduction <add>, %49, %cst_39 [1, 2] : vector<1x4x256xf32> to vector<1xf32>
    %51 = vector.shape_cast %50 : vector<1xf32> to vector<1x1x1xf32>
    %52 = vector.extract %51[0, 0, 0] : f32 from vector<1x1x1xf32>
    %cst_40 = arith.constant 9.765625E-4 : f32
    %53 = arith.mulf %47, %cst_40 : f32
    %cst_41 = arith.constant 9.765625E-4 : f32
    %54 = arith.mulf %52, %cst_41 : f32
    %55 = arith.mulf %53, %53 : f32
    %56 = arith.subf %54, %55 : f32
    %cst_42 = arith.constant 0.000000e+00 : f32
    %57 = arith.maximumf %56, %cst_42 : f32
    %c0_43 = arith.constant 0 : index
    %c0_44 = arith.constant 0 : index
    %c0_45 = arith.constant 0 : index
    %58 = vector.load %arg4[%c0_43, %c0_44, %c0_45] : memref<1x4x1xf32, #tpu.memory_space<vmem>>, vector<1x4x1xf32>
    %59 = vector.shape_cast %58 : vector<1x4x1xf32> to vector<4x1xf32>
    %cst_46 = arith.constant 9.99999974E-6 : f32
    %60 = arith.addf %57, %cst_46 : f32
    %61 = math.rsqrt %60 : f32
    %62 = vector.broadcast %61 : f32 to vector<4x1xf32>
    %63 = arith.mulf %59, %62 : vector<4x1xf32>
    %c0_47 = arith.constant 0 : index
    %c0_48 = arith.constant 0 : index
    %c0_49 = arith.constant 0 : index
    %64 = vector.load %arg5[%c0_47, %c0_48, %c0_49] : memref<1x4x1xf32, #tpu.memory_space<vmem>>, vector<1x4x1xf32>
    %65 = vector.shape_cast %64 : vector<1x4x1xf32> to vector<4x1xf32>
    %66 = vector.broadcast %53 : f32 to vector<4x1xf32>
    %67 = arith.mulf %66, %63 : vector<4x1xf32>
    %68 = arith.subf %65, %67 : vector<4x1xf32>
    %69 = vector.broadcast %63 : vector<4x1xf32> to vector<4x256xf32>
    %70 = arith.mulf %43, %69 : vector<4x256xf32>
    %71 = vector.broadcast %68 : vector<4x1xf32> to vector<4x256xf32>
    %72 = arith.addf %70, %71 : vector<4x256xf32>
    %cst_50 = arith.constant 5.000000e-01 : f32
    %73 = vector.broadcast %cst_50 : f32 to vector<4x256xf32>
    %74 = arith.mulf %73, %72 : vector<4x256xf32>
    %cst_51 = arith.constant 0.707106769 : f32
    %75 = vector.broadcast %cst_51 : f32 to vector<4x256xf32>
    %76 = arith.mulf %72, %75 : vector<4x256xf32>
    %cst_52 = arith.constant 0.000000e+00 : f32
    %77 = vector.broadcast %cst_52 : f32 to vector<4x256xf32>
    %78 = arith.cmpf oge, %76, %77 : vector<4x256xf32>
    %cst_53 = arith.constant 1.000000e+00 : f32
    %cst_54 = arith.constant -1.000000e+00 : f32
    %79 = vector.broadcast %cst_53 : f32 to vector<4x256xf32>
    %80 = vector.broadcast %cst_54 : f32 to vector<4x256xf32>
    %81 = arith.select %78, %79, %80 : vector<4x256xi1>, vector<4x256xf32>
    %82 = math.absf %76 : vector<4x256xf32>
    %cst_55 = arith.constant 0.327591091 : f32
    %83 = vector.broadcast %cst_55 : f32 to vector<4x256xf32>
    %84 = arith.mulf %83, %82 : vector<4x256xf32>
    %cst_56 = arith.constant 1.000000e+00 : f32
    %85 = vector.broadcast %cst_56 : f32 to vector<4x256xf32>
    %86 = arith.addf %85, %84 : vector<4x256xf32>
    %cst_57 = arith.constant 1.000000e+00 : f32
    %87 = vector.broadcast %cst_57 : f32 to vector<4x256xf32>
    %88 = arith.divf %87, %86 : vector<4x256xf32>
    %cst_58 = arith.constant 1.06140542 : f32
    %89 = vector.broadcast %cst_58 : f32 to vector<4x256xf32>
    %90 = arith.mulf %89, %88 : vector<4x256xf32>
    %cst_59 = arith.constant -1.45315206 : f32
    %91 = vector.broadcast %cst_59 : f32 to vector<4x256xf32>
    %92 = arith.addf %90, %91 : vector<4x256xf32>
    %93 = arith.mulf %92, %88 : vector<4x256xf32>
    %cst_60 = arith.constant 1.42141378 : f32
    %94 = vector.broadcast %cst_60 : f32 to vector<4x256xf32>
    %95 = arith.addf %93, %94 : vector<4x256xf32>
    %96 = arith.mulf %95, %88 : vector<4x256xf32>
    %cst_61 = arith.constant -0.284496725 : f32
    %97 = vector.broadcast %cst_61 : f32 to vector<4x256xf32>
    %98 = arith.addf %96, %97 : vector<4x256xf32>
    %99 = arith.mulf %98, %88 : vector<4x256xf32>
    %cst_62 = arith.constant 0.254829586 : f32
    %100 = vector.broadcast %cst_62 : f32 to vector<4x256xf32>
    %101 = arith.addf %99, %100 : vector<4x256xf32>
    %102 = arith.mulf %101, %88 : vector<4x256xf32>
    %cst_63 = arith.constant 0.000000e+00 : f32
    %103 = vector.broadcast %cst_63 : f32 to vector<4x256xf32>
    %104 = arith.subf %103, %82 : vector<4x256xf32>
    %105 = arith.mulf %104, %82 : vector<4x256xf32>
    %106 = math.exp %105 : vector<4x256xf32>
    %107 = arith.mulf %102, %106 : vector<4x256xf32>
    %cst_64 = arith.constant 1.000000e+00 : f32
    %108 = vector.broadcast %cst_64 : f32 to vector<4x256xf32>
    %109 = arith.subf %108, %107 : vector<4x256xf32>
    %110 = arith.mulf %81, %109 : vector<4x256xf32>
    %cst_65 = arith.constant 1.000000e+00 : f32
    %111 = vector.broadcast %cst_65 : f32 to vector<4x256xf32>
    %112 = arith.addf %111, %110 : vector<4x256xf32>
    %113 = arith.mulf %74, %112 : vector<4x256xf32>
    %114 = arith.truncf %113 : vector<4x256xf32> to vector<4x256xbf16>
    %c0_66 = arith.constant 0 : index
    %c0_67 = arith.constant 0 : index
    %c0_68 = arith.constant 0 : index
    %115 = vector.load %arg6[%c0_66, %c0_67, %c0_68] : memref<1x4x256xbf16, #tpu.memory_space<vmem>>, vector<1x4x256xbf16>
    %116 = vector.shape_cast %115 : vector<1x4x256xbf16> to vector<4x256xbf16>
    %117 = vector.shape_cast %114 : vector<4x256xbf16> to vector<1x4x256xbf16>
    tpu.vector_store %arg6[%c0_66, %c0_67, %c0_68], %117 {strides = array<i32>} : memref<1x4x256xbf16, #tpu.memory_space<vmem>>, vector<1x4x256xbf16>,
    return
  }
  func.func @transform_0(%arg0: i32) -> (i32, i32, i32) {
    %c0_i32 = arith.constant 0 : i32
    %c0_i32_0 = arith.constant 0 : i32
    %c0_i32_1 = arith.constant 0 : i32
    return %arg0, %c0_i32, %c0_i32_0 : i32, i32, i32
  }
  func.func @transform_1(%arg0: i32) -> (i32, i32) {
    %c0_i32 = arith.constant 0 : i32
    %c0_i32_0 = arith.constant 0 : i32
    %c0_i32_1 = arith.constant 0 : i32
    return %c0_i32, %c0_i32_0 : i32, i32
  }
  func.func @transform_2(%arg0: i32) -> (i32, i32) {
    %c0_i32 = arith.constant 0 : i32
    %c0_i32_0 = arith.constant 0 : i32
    %c0_i32_1 = arith.constant 0 : i32
    return %c0_i32, %c0_i32_0 : i32, i32
  }
  func.func @transform_3(%arg0: i32) -> (i32, i32, i32) {
    %c0_i32 = arith.constant 0 : i32
    %c0_i32_0 = arith.constant 0 : i32
    %c0_i32_1 = arith.constant 0 : i32
    %c0_i32_2 = arith.constant 0 : i32
    return %c0_i32, %c0_i32_0, %c0_i32_1 : i32, i32, i32
  }
  func.func @transform_4(%arg0: i32) -> (i32, i32, i32) {
    %c0_i32 = arith.constant 0 : i32
    %c0_i32_0 = arith.constant 0 : i32
    %c0_i32_1 = arith.constant 0 : i32
    %c0_i32_2 = arith.constant 0 : i32
    return %c0_i32, %c0_i32_0, %c0_i32_1 : i32, i32, i32
  }
  func.func @transform_5(%arg0: i32) -> (i32, i32, i32) {
    %c0_i32 = arith.constant 0 : i32
    %c0_i32_0 = arith.constant 0 : i32
    %c0_i32_1 = arith.constant 0 : i32
    return %arg0, %c0_i32, %c0_i32_0 : i32, i32, i32
  }
}

module attributes {stable_mosaic.version = 11 : i64} {
  func.func @kernel(%arg0: i32, %arg1: memref<1x8x290xbf16, #tpu.memory_space<vmem>>, %arg2: memref<4x72xbf16, #tpu.memory_space<vmem>>, %arg3: memref<2x256xbf16, #tpu.memory_space<vmem>>, %arg4: memref<1x4x1xf32, #tpu.memory_space<vmem>>, %arg5: memref<1x4x1xf32, #tpu.memory_space<vmem>>, %arg6: memref<1x4x256xf32, #tpu.memory_space<vmem>>, %arg7: memref<72x256xbf16, #tpu.memory_space<vmem>>) attributes {dimension_semantics = [#tpu.dimension_semantics<parallel>], iteration_bounds = array<i64: 2>, scalar_prefetch = 0 : i64, scratch_operands = 1 : i64, tpu.core_type = #tpu.core_type<tc>, window_params = [{transform_indices = @transform_0, window_bounds = array<i64: 1, 8, 290>}, {pipeline_mode = #tpu.pipeline_mode<synchronous>, transform_indices = @transform_1, window_bounds = array<i64: 4, 72>}, {pipeline_mode = #tpu.pipeline_mode<synchronous>, transform_indices = @transform_2, window_bounds = array<i64: 2, 256>}, {pipeline_mode = #tpu.pipeline_mode<synchronous>, transform_indices = @transform_3, window_bounds = array<i64: 1, 4, 1>}, {transform_indices = @transform_4, window_bounds = array<i64: 1, 4, 1>}, {transform_indices = @transform_5, window_bounds = array<i64: 1, 4, 256>}]} {
    %c0 = arith.constant 0 : index
    %c0_0 = arith.constant 0 : index
    %0 = vector.load %arg3[%c0, %c0_0] : memref<2x256xbf16, #tpu.memory_space<vmem>>, vector<1x256xbf16>
    %c1 = arith.constant 1 : index
    %c0_1 = arith.constant 0 : index
    %1 = vector.load %arg3[%c1, %c0_1] : memref<2x256xbf16, #tpu.memory_space<vmem>>, vector<1x256xbf16>
    %c0_2 = arith.constant 0 : index
    %c0_3 = arith.constant 0 : index
    %c0_4 = arith.constant 0 : index
    %2 = vector.load %arg1[%c0_2, %c0_3, %c0_4] : memref<1x8x290xbf16, #tpu.memory_space<vmem>>, vector<1x8x256xbf16>
    %3 = vector.shape_cast %2 : vector<1x8x256xbf16> to vector<8x256xbf16>
    %4 = vector.broadcast %0 : vector<1x256xbf16> to vector<8x256xbf16>
    %5 = arith.mulf %3, %4 : vector<8x256xbf16>
    %c0_5 = arith.constant 0 : index
    %c0_6 = arith.constant 0 : index
    %6 = vector.load %arg7[%c0_5, %c0_6] : memref<72x256xbf16, #tpu.memory_space<vmem>>, vector<8x256xbf16>
    tpu.vector_store %arg7[%c0_5, %c0_6], %5 {strides = array<i32>} : memref<72x256xbf16, #tpu.memory_space<vmem>>, vector<8x256xbf16>,
    %c0_7 = arith.constant 0 : index
    %c0_8 = arith.constant 0 : index
    %c1_9 = arith.constant 1 : index
    %7 = vector.load %arg1[%c0_7, %c0_8, %c1_9] : memref<1x8x290xbf16, #tpu.memory_space<vmem>>, vector<1x8x256xbf16>
    %8 = vector.shape_cast %7 : vector<1x8x256xbf16> to vector<8x256xbf16>
    %c8 = arith.constant 8 : index
    %c0_10 = arith.constant 0 : index
    %9 = vector.load %arg7[%c8, %c0_10] : memref<72x256xbf16, #tpu.memory_space<vmem>>, vector<8x256xbf16>
    tpu.vector_store %arg7[%c8, %c0_10], %8 {strides = array<i32>} : memref<72x256xbf16, #tpu.memory_space<vmem>>, vector<8x256xbf16>,
    %c0_11 = arith.constant 0 : index
    %c0_12 = arith.constant 0 : index
    %c2 = arith.constant 2 : index
    %10 = vector.load %arg1[%c0_11, %c0_12, %c2] : memref<1x8x290xbf16, #tpu.memory_space<vmem>>, vector<1x8x256xbf16>
    %11 = vector.shape_cast %10 : vector<1x8x256xbf16> to vector<8x256xbf16>
    %12 = vector.broadcast %1 : vector<1x256xbf16> to vector<8x256xbf16>
    %13 = arith.mulf %11, %12 : vector<8x256xbf16>
    %c16 = arith.constant 16 : index
    %c0_13 = arith.constant 0 : index
    %14 = vector.load %arg7[%c16, %c0_13] : memref<72x256xbf16, #tpu.memory_space<vmem>>, vector<8x256xbf16>
    tpu.vector_store %arg7[%c16, %c0_13], %13 {strides = array<i32>} : memref<72x256xbf16, #tpu.memory_space<vmem>>, vector<8x256xbf16>,
    %c0_14 = arith.constant 0 : index
    %c0_15 = arith.constant 0 : index
    %c16_16 = arith.constant 16 : index
    %15 = vector.load %arg1[%c0_14, %c0_15, %c16_16] : memref<1x8x290xbf16, #tpu.memory_space<vmem>>, vector<1x8x256xbf16>
    %16 = vector.shape_cast %15 : vector<1x8x256xbf16> to vector<8x256xbf16>
    %17 = vector.broadcast %0 : vector<1x256xbf16> to vector<8x256xbf16>
    %18 = arith.mulf %16, %17 : vector<8x256xbf16>
    %c24 = arith.constant 24 : index
    %c0_17 = arith.constant 0 : index
    %19 = vector.load %arg7[%c24, %c0_17] : memref<72x256xbf16, #tpu.memory_space<vmem>>, vector<8x256xbf16>
    tpu.vector_store %arg7[%c24, %c0_17], %18 {strides = array<i32>} : memref<72x256xbf16, #tpu.memory_space<vmem>>, vector<8x256xbf16>,
    %c0_18 = arith.constant 0 : index
    %c0_19 = arith.constant 0 : index
    %c17 = arith.constant 17 : index
    %20 = vector.load %arg1[%c0_18, %c0_19, %c17] : memref<1x8x290xbf16, #tpu.memory_space<vmem>>, vector<1x8x256xbf16>
    %21 = vector.shape_cast %20 : vector<1x8x256xbf16> to vector<8x256xbf16>
    %c32 = arith.constant 32 : index
    %c0_20 = arith.constant 0 : index
    %22 = vector.load %arg7[%c32, %c0_20] : memref<72x256xbf16, #tpu.memory_space<vmem>>, vector<8x256xbf16>
    tpu.vector_store %arg7[%c32, %c0_20], %21 {strides = array<i32>} : memref<72x256xbf16, #tpu.memory_space<vmem>>, vector<8x256xbf16>,
    %c0_21 = arith.constant 0 : index
    %c0_22 = arith.constant 0 : index
    %c18 = arith.constant 18 : index
    %23 = vector.load %arg1[%c0_21, %c0_22, %c18] : memref<1x8x290xbf16, #tpu.memory_space<vmem>>, vector<1x8x256xbf16>
    %24 = vector.shape_cast %23 : vector<1x8x256xbf16> to vector<8x256xbf16>
    %25 = vector.broadcast %1 : vector<1x256xbf16> to vector<8x256xbf16>
    %26 = arith.mulf %24, %25 : vector<8x256xbf16>
    %c40 = arith.constant 40 : index
    %c0_23 = arith.constant 0 : index
    %27 = vector.load %arg7[%c40, %c0_23] : memref<72x256xbf16, #tpu.memory_space<vmem>>, vector<8x256xbf16>
    tpu.vector_store %arg7[%c40, %c0_23], %26 {strides = array<i32>} : memref<72x256xbf16, #tpu.memory_space<vmem>>, vector<8x256xbf16>,
    %c0_24 = arith.constant 0 : index
    %c0_25 = arith.constant 0 : index
    %c32_26 = arith.constant 32 : index
    %28 = vector.load %arg1[%c0_24, %c0_25, %c32_26] : memref<1x8x290xbf16, #tpu.memory_space<vmem>>, vector<1x8x256xbf16>
    %29 = vector.shape_cast %28 : vector<1x8x256xbf16> to vector<8x256xbf16>
    %30 = vector.broadcast %0 : vector<1x256xbf16> to vector<8x256xbf16>
    %31 = arith.mulf %29, %30 : vector<8x256xbf16>
    %c48 = arith.constant 48 : index
    %c0_27 = arith.constant 0 : index
    %32 = vector.load %arg7[%c48, %c0_27] : memref<72x256xbf16, #tpu.memory_space<vmem>>, vector<8x256xbf16>
    tpu.vector_store %arg7[%c48, %c0_27], %31 {strides = array<i32>} : memref<72x256xbf16, #tpu.memory_space<vmem>>, vector<8x256xbf16>,
    %c0_28 = arith.constant 0 : index
    %c0_29 = arith.constant 0 : index
    %c33 = arith.constant 33 : index
    %33 = vector.load %arg1[%c0_28, %c0_29, %c33] : memref<1x8x290xbf16, #tpu.memory_space<vmem>>, vector<1x8x256xbf16>
    %34 = vector.shape_cast %33 : vector<1x8x256xbf16> to vector<8x256xbf16>
    %c56 = arith.constant 56 : index
    %c0_30 = arith.constant 0 : index
    %35 = vector.load %arg7[%c56, %c0_30] : memref<72x256xbf16, #tpu.memory_space<vmem>>, vector<8x256xbf16>
    tpu.vector_store %arg7[%c56, %c0_30], %34 {strides = array<i32>} : memref<72x256xbf16, #tpu.memory_space<vmem>>, vector<8x256xbf16>,
    %c0_31 = arith.constant 0 : index
    %c0_32 = arith.constant 0 : index
    %c34 = arith.constant 34 : index
    %36 = vector.load %arg1[%c0_31, %c0_32, %c34] : memref<1x8x290xbf16, #tpu.memory_space<vmem>>, vector<1x8x256xbf16>
    %37 = vector.shape_cast %36 : vector<1x8x256xbf16> to vector<8x256xbf16>
    %38 = vector.broadcast %1 : vector<1x256xbf16> to vector<8x256xbf16>
    %39 = arith.mulf %37, %38 : vector<8x256xbf16>
    %c64 = arith.constant 64 : index
    %c0_33 = arith.constant 0 : index
    %40 = vector.load %arg7[%c64, %c0_33] : memref<72x256xbf16, #tpu.memory_space<vmem>>, vector<8x256xbf16>
    tpu.vector_store %arg7[%c64, %c0_33], %39 {strides = array<i32>} : memref<72x256xbf16, #tpu.memory_space<vmem>>, vector<8x256xbf16>,
    %c0_34 = arith.constant 0 : index
    %c0_35 = arith.constant 0 : index
    %41 = vector.load %arg2[%c0_34, %c0_35] : memref<4x72xbf16, #tpu.memory_space<vmem>>, vector<4x72xbf16>
    %c0_36 = arith.constant 0 : index
    %c0_37 = arith.constant 0 : index
    %42 = vector.load %arg7[%c0_36, %c0_37] : memref<72x256xbf16, #tpu.memory_space<vmem>>, vector<72x256xbf16>
    %cst = arith.constant dense<0.000000e+00> : vector<4x256xf32>
    %43 = tpu.matmul %41, %42, %cst {dimension_numbers = #tpu.dot_dimension_numbers<[1], [0], [0], [1], [0, 0, 1, 1], [], []>} : vector<4x72xbf16>, vector<72x256xbf16>, vector<4x256xf32> -> vector<4x256xf32>
    %44 = vector.shape_cast %43 : vector<4x256xf32> to vector<1x4x256xf32>
    %cst_38 = arith.constant dense<0.000000e+00> : vector<1xf32>
    %45 = vector.multi_reduction <add>, %44, %cst_38 [1, 2] : vector<1x4x256xf32> to vector<1xf32>
    %46 = vector.shape_cast %45 : vector<1xf32> to vector<1x1x1xf32>
    %47 = vector.extract %46[0, 0, 0] : f32 from vector<1x1x1xf32>
    %48 = arith.mulf %43, %43 : vector<4x256xf32>
    %49 = vector.shape_cast %48 : vector<4x256xf32> to vector<1x4x256xf32>
    %cst_39 = arith.constant dense<0.000000e+00> : vector<1xf32>
    %50 = vector.multi_reduction <add>, %49, %cst_39 [1, 2] : vector<1x4x256xf32> to vector<1xf32>
    %51 = vector.shape_cast %50 : vector<1xf32> to vector<1x1x1xf32>
    %52 = vector.extract %51[0, 0, 0] : f32 from vector<1x1x1xf32>
    %cst_40 = arith.constant 9.765625E-4 : f32
    %53 = arith.mulf %47, %cst_40 : f32
    %cst_41 = arith.constant 9.765625E-4 : f32
    %54 = arith.mulf %52, %cst_41 : f32
    %55 = arith.mulf %53, %53 : f32
    %56 = arith.subf %54, %55 : f32
    %cst_42 = arith.constant 0.000000e+00 : f32
    %57 = arith.maximumf %56, %cst_42 : f32
    %c0_43 = arith.constant 0 : index
    %c0_44 = arith.constant 0 : index
    %c0_45 = arith.constant 0 : index
    %58 = vector.load %arg4[%c0_43, %c0_44, %c0_45] : memref<1x4x1xf32, #tpu.memory_space<vmem>>, vector<1x4x1xf32>
    %59 = vector.shape_cast %58 : vector<1x4x1xf32> to vector<4x1xf32>
    %cst_46 = arith.constant 9.99999974E-6 : f32
    %60 = arith.addf %57, %cst_46 : f32
    %61 = math.rsqrt %60 : f32
    %62 = vector.broadcast %61 : f32 to vector<4x1xf32>
    %63 = arith.mulf %59, %62 : vector<4x1xf32>
    %c0_47 = arith.constant 0 : index
    %c0_48 = arith.constant 0 : index
    %c0_49 = arith.constant 0 : index
    %64 = vector.load %arg5[%c0_47, %c0_48, %c0_49] : memref<1x4x1xf32, #tpu.memory_space<vmem>>, vector<1x4x1xf32>
    %65 = vector.shape_cast %64 : vector<1x4x1xf32> to vector<4x1xf32>
    %66 = vector.broadcast %53 : f32 to vector<4x1xf32>
    %67 = arith.mulf %66, %63 : vector<4x1xf32>
    %68 = arith.subf %65, %67 : vector<4x1xf32>
    %69 = vector.broadcast %63 : vector<4x1xf32> to vector<4x256xf32>
    %70 = arith.mulf %43, %69 : vector<4x256xf32>
    %71 = vector.broadcast %68 : vector<4x1xf32> to vector<4x256xf32>
    %72 = arith.addf %70, %71 : vector<4x256xf32>
    %c0_50 = arith.constant 0 : index
    %c0_51 = arith.constant 0 : index
    %c0_52 = arith.constant 0 : index
    %73 = vector.load %arg6[%c0_50, %c0_51, %c0_52] : memref<1x4x256xf32, #tpu.memory_space<vmem>>, vector<1x4x256xf32>
    %74 = vector.shape_cast %73 : vector<1x4x256xf32> to vector<4x256xf32>
    %75 = vector.shape_cast %72 : vector<4x256xf32> to vector<1x4x256xf32>
    tpu.vector_store %arg6[%c0_50, %c0_51, %c0_52], %75 {strides = array<i32>} : memref<1x4x256xf32, #tpu.memory_space<vmem>>, vector<1x4x256xf32>,
    return
  }
  func.func @transform_0(%arg0: i32) -> (i32, i32, i32) {
    %c0_i32 = arith.constant 0 : i32
    %c0_i32_0 = arith.constant 0 : i32
    %c0_i32_1 = arith.constant 0 : i32
    return %arg0, %c0_i32, %c0_i32_0 : i32, i32, i32
  }
  func.func @transform_1(%arg0: i32) -> (i32, i32) {
    %c0_i32 = arith.constant 0 : i32
    %c0_i32_0 = arith.constant 0 : i32
    %c0_i32_1 = arith.constant 0 : i32
    return %c0_i32, %c0_i32_0 : i32, i32
  }
  func.func @transform_2(%arg0: i32) -> (i32, i32) {
    %c0_i32 = arith.constant 0 : i32
    %c0_i32_0 = arith.constant 0 : i32
    %c0_i32_1 = arith.constant 0 : i32
    return %c0_i32, %c0_i32_0 : i32, i32
  }
  func.func @transform_3(%arg0: i32) -> (i32, i32, i32) {
    %c0_i32 = arith.constant 0 : i32
    %c0_i32_0 = arith.constant 0 : i32
    %c0_i32_1 = arith.constant 0 : i32
    %c0_i32_2 = arith.constant 0 : i32
    return %c0_i32, %c0_i32_0, %c0_i32_1 : i32, i32, i32
  }
  func.func @transform_4(%arg0: i32) -> (i32, i32, i32) {
    %c0_i32 = arith.constant 0 : i32
    %c0_i32_0 = arith.constant 0 : i32
    %c0_i32_1 = arith.constant 0 : i32
    return %arg0, %c0_i32, %c0_i32_0 : i32, i32, i32
  }
  func.func @transform_5(%arg0: i32) -> (i32, i32, i32) {
    %c0_i32 = arith.constant 0 : i32
    %c0_i32_0 = arith.constant 0 : i32
    %c0_i32_1 = arith.constant 0 : i32
    return %arg0, %c0_i32, %c0_i32_0 : i32, i32, i32
  }
}

</mosaic_0001>

<bundles_post_ra>
// kernel: up_mass_forward.4
= control target key start
LH: loop header
LB: loop body
LE: loop exit
PB: predicated region body
PF: predicated region fallthrough
CT: control target
= control target key end

     0   :  { %s934_s18 = smov 0   ;;  %s1030_s0 = inlined_call_operand.vmem [shape: bf16[2,8,290], index: 0, kind: input, shape index: {}]   ;;  %s1031_s1 = inlined_call_operand.vmem [shape: bf16[8,72], index: 1, kind: input, shape index: {}]   ;;  %s1032_s2 = inlined_call_operand.vmem [shape: bf16[2,256], index: 2, kind: input, shape index: {}]   ;;  %s1033_s3 = inlined_call_operand.vmem [shape: f32[1,8,1], index: 3, kind: input, shape index: {}]   ;;  %s1034_s4 = inlined_call_operand.vmem [shape: f32[1,8,1], index: 4, kind: input, shape index: {}]   ;;  %s1035_s5 = inlined_call_operand.vmem [shape: bf16[2,8,256], index: 5, kind: output, shape index: {}]  }
   0x1 LB: > { %s759_s19 = sadd.s32 4294967295, %s886_s18   ;;  %p763_p0 = scmp.ge.s32.totalorder %s886_s18, 1  ;;  %s886_s18 = sphi %s934_s18, %s15_s18  }
   0x2   : > { %p187_p1 = scmp.lt.s32.totalorder %s886_s18, 3 }
   0x4   : > { %p188_p2 = pnand %p763_p0, %p187_p1 }
   0x5   : > { %p215_p3 = scmp.lt.s32.totalorder (!%p188_p2), %s759_s19, 1  ;;  %s888_s26 = smov (!%p188_p2), 16  }
   0x6   : > { %191 = sbr.rel (%p188_p2) target bundleno = 870 (0x366), region = 40  ;;  %s889_s27 = smov (!%p188_p2), 111  }
   0x7   : > { %s890_s28 = smov (!%p188_p2), 18   ;;  %s891_s29 = smov (!%p188_p2), 34  }
   0x8   : > { %s892_s30 = smov (!%p188_p2), 2   ;;  %s893_s6 = smov (!%p188_p2), 32  }
   0x9   : > { %s894_s7 = smov (!%p188_p2), 95   ;;  %s895_s8 = smov (!%p188_p2), 94  }
   0xa   : > { %s896_s9 = smov (!%p188_p2), 96   ;;  %s897_s10 = smov (!%p188_p2), 126  }
   0xb   : > { %v226_v0 = vld [vmem:[%s1032_s2] sm:$0x3]  ;;  %s1037_s19 = smov (!%p215_p3, %s759_s19), 1  ;;  %vm286_vm0 = vcmask 15360   ;;  %vm399_vm1 = vcmask 261120   ;;  %vm446_vm2 = vcmask 277504  }
   0xc   : > { %229 = vst [vmem:[#allocation1] ss:$9 sm:$0xff] %v226_v0  ;;  %s812_s22 = smul.u32 12, %s1037_s19  ;;  %vm367_vm3 = vcmask 146432   ;;  %s898_s11 = smov 112   ;;  %vm320_vm4 = vcmask 130048  }
   0xd   : > { %s899_s12 = smov 110   ;;  %s900_s13 = smov 127   ;;  %vm256_vm5 = vcmask 1043456   ;;  %vm354_vm6 = vcmask 908288   ;;  %vm433_vm7 = vcmask 777216   ;;  %vm465_vm8 = vcmask 769024  }
   0xe   : > { %s951_s25 = scalar_lea.vmem %s1030_s0, %s812_s22  ;;  %vm418_vm9 = vcmask 785408   ;;  %vm305_vm10 = vcmask 1031168   ;;  %vm339_vm11 = vcmask 916480   ;;  %vm386_vm12 = vcmask 900096   ;;  %s901_s24 = smov 0.0  }
   0xf   : > { %v954_v7 = vld [vmem:[%s951_s25] sm:$0xff]  ;;  %v344_v27 = vld [vmem:[%s951_s25 + $0x8] sm:$0xf]  ;;  %vm258_vm13 = vcmask 1039360   ;;  %vm524_vm14 = vcmask 588800  }
  0x10   : > { %v957_v10 = vunpack.c.l.bf16 %v954_v7  ;;  %v960_v11 = vunpack.c.h.bf16 %v954_v7  ;;  %v423_v28 = vld [vmem:[%s951_s25 + $0x8] sm:$0xf] }
  0x11   : > { %v438_v29 = vld [vmem:[%s951_s25 + $0x8] sm:$0xf] }
  0x12   : > { %v441_v32 = vunpack.c.l.bf16 %v438_v29  ;;  %v391_v35 = vld [vmem:[%s951_s25 + $0x8] sm:$0xf] }
  0x13   : > { %v230_v1 = vld [vmem:[#allocation1] sm:$0xff]  ;;  %v231_v2 = vld [vmem:[#allocation1 + $0x9] sm:$0xff]  ;;  %v394_v40 = vunpack.c.l.bf16 %v391_v35 }
  0x14   : > { %264 = vst [vmem:[#allocation1] ss:$9 sm:$0xff] %v226_v0  ;;  %v232_v3 = vpack.i.b16 %v230_v1, %v230_v1  ;;  %v235_v4 = vpack.i.b16 %v231_v2, %v231_v2  ;;  %v263_v37 = vld [vmem:[%s951_s25 + $0x8] sm:$0xf] }
  0x15   : > { %v277_v45 = vunpack.c.l.bf16 %v263_v37  ;;  %v310_v47 = vld [vmem:[%s951_s25 + $0x8] sm:$0xf] }
  0x16   : > { %v234_v5 = vperm.slane %v232_v3, 0  ;;  %v237_v6 = vperm.slane %v235_v4, 0  ;;  %v313_v57 = vunpack.c.l.bf16 %v310_v47  ;;  %v359_v4 = vld [vmem:[%s951_s25 + $0x8] sm:$0xf] }
  0x18   : > { %v240_v8 = vunpack.c.l.bf16 %v234_v5  ;;  %v241_v9 = vunpack.c.l.bf16 %v237_v6 }
  0x1a   : > { %v242_v12 = vmul.f32 %v240_v8, %v957_v10  ;;  %v243_v13 = vmul.f32 %v241_v9, %v960_v11  ;;  %v863_v14 = vpack.i.bf16 %v241_v9, %v240_v8  ;;  %v362_v8 = vunpack.c.l.bf16 %v359_v4 }
  0x1b   : > { %v265_v15 = vld [vmem:[#allocation1] sm:$0xff]  ;;  %v266_v16 = vld [vmem:[#allocation1 + $0x9] sm:$0xff] }
  0x1c   : > { %v267_v17 = vshrl.u32 %v265_v15, 16  ;;  %v271_v18 = vshrl.u32 %v266_v16, 16  ;;  %v244_v19 = vpack.c.bf16 %v243_v13, %v242_v12  ;;  %864 = vrot.lane.b32.xlu2 %v863_v14, %s888_s26 }
  0x1e   : > { %v268_v20 = vpack.i.b16 %v267_v17, %v267_v17  ;;  %v272_v21 = vpack.i.b16 %v271_v18, %v271_v18  ;;  %245 = vst [vmem:[#allocation2] sm:$0xff] %v244_v19 }
  0x20   : > { %v270_v22 = vperm.slane %v268_v20, 0  ;;  %v274_v23 = vperm.slane %v272_v21, 0 }
  0x22   : > { %v278_v24 = vunpack.c.l.bf16 %v270_v22  ;;  %v279_v25 = vunpack.c.l.bf16 %v274_v23  ;;  %v247_v23 = vld [vmem:[%s951_s25 + $0x8] sm:$0xf] }
  0x24   : > { %v853_v26 = vpack.i.bf16 %v279_v25, %v278_v24  ;;  %347 = vrot.lane.b32.xlu2 %v954_v7, %s889_s27 }
  0x26   : > { %854 = vrot.lane.b32.xlu1 %v853_v26, %s890_s28  ;;  %844 = vrot.lane.b32.xlu0 %v853_v26, %s891_s29 }
  0x2e   : > { %859 = vrot.lane.b32.xlu1 %v853_v26, %s892_s30  ;;  %849 = vrot.lane.b32.xlu0 %v863_v14, %s893_s6 }
  0x36   : > { %426 = vrot.lane.b32.xlu0 %v954_v7, %s894_s7  ;;  %428 = vrot.lane.b32.xlu1 %v423_v28, %s894_s7  ;;  %s803_s7 = sshll.u32 %s1037_s19, 3 }
  0x3e   : > { %349 = vrot.lane.b32.xlu0 %v344_v27, %s889_s27 }
  0x76   : > { %v865_v46 = vpop.permute.xlu2 %864 }
  0x77   : > { %v867_v56 = vunpack.i.h.bf16 %v865_v46  ;;  %v866_v16 = vunpack.i.l.bf16 %v865_v46 }
  0x79   : > { %v327_v63 = vmul.f32 %v867_v56, %v313_v57  ;;  %v321_v19 = vsel %vm320_vm4, %v866_v16, %v867_v56  ;;  %v325_v20 = vmul.f32 %v866_v16, %v957_v10 }
  0x7a   : > { %v326_v21 = vmul.f32 %v321_v19, %v960_v11 }
  0x7b   : > { %v329_v6 = vpack.c.bf16 %v327_v63, %v327_v63 }
  0x7c   : > { %v328_v22 = vpack.c.bf16 %v326_v21, %v325_v20 }
  0x7e   : > { %v348_v25 = vpop.permute.xlu2 %347 }
  0x7f   : > { %v351_v26 = vrot.slane %v348_v25, 4 }
  0x98   : > { %v855_v30 = vpop.permute.xlu1 %854  ;;  %v845_v31 = vpop.permute.xlu0 %844 }
  0x99   : > { %v847_v33 = vunpack.i.h.bf16 %v845_v31  ;;  %v846_v48 = vunpack.i.l.bf16 %v845_v31  ;;  %v857_v2 = vunpack.i.h.bf16 %v855_v30  ;;  %v856_v3 = vunpack.i.l.bf16 %v855_v30 }
  0x9b   : > { %v453_v34 = vmul.f32 %v847_v33, %v441_v32  ;;  %v447_v61 = vsel %vm446_vm2, %v846_v48, %v847_v33  ;;  %v451_v0 = vmul.f32 %v846_v48, %v957_v10  ;;  %v368_v12 = vsel %vm367_vm3, %v856_v3, %v857_v2 }
  0x9c   : > { %v452_v1 = vmul.f32 %v447_v61, %v960_v11  ;;  %v372_v13 = vmul.f32 %v856_v3, %v957_v10  ;;  %v374_v14 = vmul.f32 %v857_v2, %v362_v8  ;;  %v373_v15 = vmul.f32 %v368_v12, %v960_v11 }
  0x9d   : > { %v455_v36 = vpack.c.bf16 %v453_v34, %v453_v34 }
  0x9e   : > { %v454_v9 = vpack.c.bf16 %v452_v1, %v451_v0  ;;  %v376_v17 = vpack.c.bf16 %v374_v14, %v374_v14  ;;  %v375_v18 = vpack.c.bf16 %v373_v15, %v372_v13 }
  0x9f   : > { %460 = vrot.lane.b32.xlu0 %v455_v36, %s895_s8 }
  0xa0   : > { %v860_v38 = vpop.permute.xlu1 %859  ;;  %v850_v39 = vpop.permute.xlu0 %849 }
  0xa1   : > { %v862_v41 = vunpack.i.h.bf16 %v860_v38  ;;  %v861_v42 = vunpack.i.l.bf16 %v860_v38  ;;  %v852_v43 = vunpack.i.h.bf16 %v850_v39  ;;  %v851_v44 = vunpack.i.l.bf16 %v850_v39 }
  0xa3   : > { %v287_v49 = vsel %vm286_vm0, %v861_v42, %v862_v41  ;;  %v291_v50 = vmul.f32 %v861_v42, %v957_v10  ;;  %v400_v51 = vsel %vm399_vm1, %v851_v44, %v852_v43  ;;  %v404_v52 = vmul.f32 %v851_v44, %v957_v10 }
  0xa4   : > { %v406_v53 = vmul.f32 %v852_v43, %v394_v40  ;;  %v405_v54 = vmul.f32 %v400_v51, %v960_v11  ;;  %v292_v55 = vmul.f32 %v287_v49, %v960_v11  ;;  %v293_v62 = vmul.f32 %v862_v41, %v277_v45 }
  0xa6   : > { %v408_v58 = vpack.c.bf16 %v406_v53, %v406_v53  ;;  %v407_v59 = vpack.c.bf16 %v405_v54, %v404_v52  ;;  %v294_v60 = vpack.c.bf16 %v292_v55, %v291_v50  ;;  %v295_v5 = vpack.c.bf16 %v293_v62, %v293_v62 }
  0xa8   : > { %413 = vrot.lane.b32.xlu2 %v408_v58, %s896_s9  ;;  %411 = vrot.lane.b32.xlu1 %v407_v59, %s896_s9  ;;  %v427_v24 = vpop.permute.xlu0 %426  ;;  %v429_v11 = vpop.permute.xlu1 %428 }
  0xa9   : > { %298 = vrot.lane.b32.xlu0 %v294_v60, %s897_s10  ;;  %v430_v10 = vrot.slane %v427_v24, 4  ;;  %v431_v31 = vrot.slane %v429_v11, 4  ;;  %v769_v11 = vld [vmem:[#allocation2] sm:$0xf] }
  0xab   : > { %v432_v32 = vsel %vm256_vm5, %v430_v10, %v431_v31  ;;  %v804_v31 = vld [vmem:[#allocation2 + $0x4] sm:$0xf] }
  0xb0   : > { %458 = vrot.lane.b32.xlu2 %v454_v9, %s895_s8  ;;  %300 = vrot.lane.b32.xlu1 %v295_v5, %s897_s10  ;;  %v350_v27 = vpop.permute.xlu0 %349  ;;  %s224_s10 = scalar_lea.vmem %s1035_s5, %s803_s7 }
  0xb1   : > { %334 = vrot.lane.b32.xlu0 %v329_v6, %s898_s11  ;;  %v352_v28 = vrot.slane %v350_v27, 4 }
  0xb3   : > { %v353_v29 = vsel %vm256_vm5, %v351_v26, %v352_v28 }
  0xb4   : > { %v355_v30 = vsel %vm354_vm6, %v348_v25, %v353_v29 }
  0xb5   : > { %357 = vst [vmem:[#allocation2 + $0x20] sm:$0xff] %v355_v30 }
  0xb8   : > { %381 = vrot.lane.b32.xlu2 %v376_v17, %s899_s12  ;;  %379 = vrot.lane.b32.xlu1 %v375_v18, %s899_s12 }
  0xbc   : > { %v785_v19 = vld [vmem:[#allocation2 + $0x20] sm:$0xf] }
  0xc0   : > { %332 = vrot.lane.b32.xlu2 %v328_v22, %s898_s11  ;;  %250 = vrot.lane.b32.xlu1 %v954_v7, %s900_s13  ;;  %v434_v7 = vsel %vm433_vm7, %v427_v24, %v432_v32  ;;  %v808_v22 = vld [vmem:[#allocation2 + $0x24] sm:$0xf] }
  0xc1   : > { %436 = vst [vmem:[#allocation2 + $0x38] sm:$0xff] %v434_v7 }
  0xc8   : > { %252 = vrot.lane.b32.xlu2 %v247_v23, %s900_s13  ;;  %v811_v61 = vld [vmem:[#allocation2 + $0x34] sm:$0xf0]  ;;  %v795_v2 = vld [vmem:[#allocation2 + $0x38] sm:$0xf0] }
 0x102   : > { %v414_v33 = vpop.permute.xlu2 %413 }
 0x103   : > { %v416_v46 = vrot.slane %v414_v33, 4 }
 0x10a   : > { %v459_v34 = vpop.permute.xlu2 %458 }
 0x10b   : > { %v462_v36 = vrot.slane %v459_v34, 4 }
 0x111   : > { %v461_v35 = vpop.permute.xlu0 %460 }
 0x112   : > { %v463_v37 = vrot.slane %v461_v35, 4  ;;  %v382_v40 = vpop.permute.xlu2 %381  ;;  %v469_v35 = vld [vmem:[%s1031_s1] sm:$0xf] }
 0x113   : > { %v384_v8 = vrot.slane %v382_v40, 4 }
 0x114   : > { %v464_v38 = vsel %vm256_vm5, %v462_v36, %v463_v37 }
 0x115   : > { %v466_v39 = vsel %vm465_vm8, %v459_v34, %v464_v38 }
 0x116   : > { %v504_v41 = vunpack.c.l.b16 %v466_v39  ;;  %v505_v42 = vunpack.c.h.b16 %v466_v39 }
 0x118   : > { %v514_v43 = vpack.c.b16 %v504_v41, %v504_v41  ;;  %v515_v44 = vpack.c.b16 %v505_v42, %v505_v42 }
 0x11a   : > { %v412_v45 = vpop.permute.xlu1 %411  ;;  %v530_v49 = vsel %vm256_vm5, %v514_v43, 0  ;;  %v533_v50 = vsel %vm256_vm5, %v515_v44, 0  ;;  %v333_v53 = vpop.permute.xlu2 %332 }
 0x11b   : > { %v415_v47 = vrot.slane %v412_v45, 4  ;;  %v299_v48 = vpop.permute.xlu0 %298  ;;  %538 = vmatpush.bf16.msra.mxu0 %v530_v49  ;;  %551 = vmatpush.bf16.msra.mxu1 %v533_v50  ;;  %v336_v58 = vrot.slane %v333_v53, 4 }
 0x11c   : > { %v302_v54 = vrot.slane %v299_v48, 4 }
 0x11d   : > { %v417_v51 = vsel %vm256_vm5, %v415_v47, %v416_v46 }
 0x11e   : > { %v419_v52 = vsel %vm418_vm9, %v412_v45, %v417_v51 }
 0x11f   : > { %421 = vst [vmem:[#allocation2 + $0x30] sm:$0xff] %v419_v52 }
 0x122   : > { %v301_v55 = vpop.permute.xlu1 %300  ;;  %v253_v14 = vpop.permute.xlu2 %252 }
 0x123   : > { %v303_v56 = vrot.slane %v301_v55, 4  ;;  %v335_v57 = vpop.permute.xlu0 %334  ;;  %v255_v15 = vrot.slane %v253_v14, 4 }
 0x124   : > { %v337_v59 = vrot.slane %v335_v57, 4 }
 0x125   : > { %v304_v60 = vsel %vm256_vm5, %v302_v54, %v303_v56 }
 0x126   : > { %v306_v62 = vsel %vm305_vm10, %v299_v48, %v304_v60  ;;  %v338_v63 = vsel %vm256_vm5, %v336_v58, %v337_v59  ;;  %v793_v0 = vld [vmem:[#allocation2 + $0x30] sm:$0xf]  ;;  %v810_v1 = vld [vmem:[#allocation2 + $0x34] sm:$0xf] }
 0x127   : > { %308 = vst [vmem:[#allocation2 + $0x10] sm:$0xff] %v306_v62  ;;  %v340_v3 = vsel %vm339_vm11, %v333_v53, %v338_v63  ;;  %v794_v4 = vor.u32 %v811_v61, %v793_v0  ;;  %v798_v5 = vor.u32 %v810_v1, %v795_v2  ;;  %v902_v2 = vmov 0  }
 0x128   : > { %342 = vst [vmem:[#allocation2 + $0x18] sm:$0xff] %v340_v3  ;;  %868 = vset.pattern.permute.xlu2 %v902_v2  ;;  %869 = vset.pattern.permute.xlu0 %v902_v2  ;;  %v588_v3 = vld [vmem:[%s1033_s3] sm:$0xff] }
 0x129   : > { %539 = vmatpush.bf16.msra.mxu0 %v794_v4  ;;  %552 = vmatpush.bf16.msra.mxu1 %v798_v5 }
 0x12a   : > { %v380_v6 = vpop.permute.xlu1 %379 }
 0x12b   : > { %v383_v9 = vrot.slane %v380_v6, 4 }
 0x12d   : > { %v385_v12 = vsel %vm256_vm5, %v383_v9, %v384_v8  ;;  %v604_v9 = vld [vmem:[%s1034_s4] sm:$0xff] }
 0x12e   : > { %v387_v13 = vsel %vm386_vm12, %v380_v6, %v385_v12  ;;  %v777_v26 = vld [vmem:[#allocation2 + $0x10] sm:$0xf]  ;;  %v806_v28 = vld [vmem:[#allocation2 + $0x14] sm:$0xf] }
 0x12f   : > { %389 = vst [vmem:[#allocation2 + $0x28] sm:$0xff] %v387_v13  ;;  %v807_v27 = vld [vmem:[#allocation2 + $0x14] sm:$0xf0]  ;;  %v779_v29 = vld [vmem:[#allocation2 + $0x18] sm:$0xf0] }
 0x130   : > { %v778_v30 = vor.u32 %v807_v27, %v777_v26  ;;  %v782_v10 = vor.u32 %v806_v28, %v779_v29 }
 0x132   : > { %v251_v16 = vpop.permute.xlu1 %250 }
 0x133   : > { %v254_v17 = vrot.slane %v251_v16, 4 }
 0x135   : > { %v257_v18 = vsel %vm256_vm5, %v254_v17, %v255_v15 }
 0x136   : > { %v259_v20 = vsel %vm258_vm13, %v251_v16, %v257_v18  ;;  %v809_v21 = vld [vmem:[#allocation2 + $0x24] sm:$0xf0]  ;;  %v787_v23 = vld [vmem:[#allocation2 + $0x28] sm:$0xf0] }
 0x137   : > { %261 = vst [vmem:[#allocation2 + $0x8] sm:$0xff] %v259_v20  ;;  %v786_v24 = vor.u32 %v809_v21, %v785_v19  ;;  %v790_v25 = vor.u32 %v808_v22, %v787_v23 }
 0x139   : > { %540 = vmatpush.bf16.msra.mxu0 %v786_v24  ;;  %553 = vmatpush.bf16.msra.mxu1 %v790_v25 }
 0x13d   : > { %541 = vmatpush.bf16.msra.mxu0 %v778_v30  ;;  %554 = vmatpush.bf16.msra.mxu1 %v782_v10 }
 0x13e   : > { %v805_v32 = vld [vmem:[#allocation2 + $0x4] sm:$0xf0]  ;;  %v771_v7 = vld [vmem:[#allocation2 + $0x8] sm:$0xf0] }
 0x13f   : > { %v770_v33 = vor.u32 %v805_v32, %v769_v11  ;;  %v774_v34 = vor.u32 %v804_v31, %v771_v7 }
 0x141   : > { %542 = vmatpush.bf16.msra.mxu0 %v770_v33  ;;  %555 = vmatpush.bf16.msra.mxu1 %v774_v34 }
 0x144   : > { %799 = vmatmul.msk.bf16.vlgmr.msra.gmra.mxu0 %vm524_vm14, %v469_v35  ;;  %800 = vmatmul.msk.bf16.vlgmr.msra.gmra.mxu1 %vm524_vm14, %v469_v35 }
 0x1c1   : > { %v544_v36 = vpop.f32.mrf.mxu0  ;;  %v557_v37 = vpop.f32.mrf.mxu1 }
 0x1c2   : > { %v561_v38 = vadd.f32 %v557_v37, %v544_v36  ;;  %v571_v39 = vmul.f32 %v544_v36, %v544_v36  ;;  %v572_v40 = vmul.f32 %v557_v37, %v557_v37 }
 0x1c4   : > { %562 = vadd.xlane.f32.xlu0 %v561_v38  ;;  %v573_v41 = vadd.f32 %v572_v40, %v571_v39 }
 0x1c6   : > { %574 = vadd.xlane.f32.xlu1 %v573_v41 }
 0x1c9   : > { %v546_v42 = vpop.f32.mrf.mxu0  ;;  %v559_v43 = vpop.f32.mrf.mxu1 }
 0x237   : > { %v563_v44 = vpop.xlane.xlu0 %562 }
 0x238   : > { %v564_v45 = vrot.slane %v563_v44, 4 }
 0x239   : > { %v575_v46 = vpop.xlane.xlu1 %574 }
 0x23a   : > { %v565_v47 = vadd.f32 %v564_v45, %v563_v44  ;;  %v576_v48 = vrot.slane %v575_v46, 4 }
 0x23c   : > { %v566_v49 = vrot.slane %v565_v47, 2  ;;  %v577_v50 = vadd.f32 %v576_v48, %v575_v46 }
 0x23e   : > { %v578_v51 = vrot.slane %v577_v50, 2  ;;  %v567_v52 = vadd.f32 %v566_v49, %v565_v47 }
 0x240   : > { %v579_v53 = vadd.f32 %v578_v51, %v577_v50  ;;  %v568_v54 = vrot.slane %v567_v52, 1 }
 0x242   : > { %v569_v55 = vadd.f32 %v568_v54, %v567_v52  ;;  %v580_v56 = vrot.slane %v579_v53, 1 }
 0x244   : > { %813 = vpush %v569_v55  ;;  %v581_v57 = vadd.f32 %v580_v56, %v579_v53 }
 0x246   : > { %815 = vpush %v581_v57 }
 0x275   : > { %s814_s16 = spop %813 }
 0x276   : > { %s583_s17 = smul.f32 0.00048828125, %s814_s16 }
 0x277   : > { %s816_s20 = spop %815 }
 0x278   : > { %s585_s21 = smul.f32 %s583_s17, %s583_s17  ;;  %v605_v6 = vstv %s583_s17 }
 0x279   : > { %s584_s22 = smul.f32 0.00048828125, %s816_s20 }
 0x27b   : > { %s586_s23 = ssub.f32 %s584_s22, %s585_s21 }
 0x27d   : > { %s587_s25 = smax.f32 %s901_s24, %s586_s23 }
 0x27e   : > { %s589_s26 = sadd.f32 1e-05, %s587_s25 }
 0x280   : > { %v590_v58 = vstv %s589_s26 }
 0x281   : > { %870 = vrsqrt.f32 %v590_v58  ;;  %vm597_vm0 = vweird.f32 %v590_v58 }
 0x287   : > { %v871_v59 = vpop.eup %870 }
 0x288   : > { %v592_v60 = vmul.f32 %v871_v59, %v590_v58  ;;  %vm598_vm15 = vweird.f32 %v871_v59 }
 0x289   : > { %vm599_vm1 = vmor %vm597_vm0, %vm598_vm15 }
 0x28a   : > { %v593_v61 = vmul.f32 %v871_v59, %v592_v60 }
 0x28c   : > { %v594_v62 = vmul.f32 0.5, %v593_v61 }
 0x28e   : > { %v595_v63 = vsub.f32 1.5, %v594_v62 }
 0x290   : > { %v596_v0 = vmul.f32 %v871_v59, %v595_v63 }
 0x292   : > { %v600_v1 = vsel %vm599_vm1, %v871_v59, %v596_v0 }
 0x293   : > { %817 = vpush %v600_v1 }
 0x2c4   : > { %s818_s29 = spop %817 }
 0x2c5   : > { %v602_v4 = vstv %s818_s29 }
 0x2c6   : > { %v603_v5 = vmul.f32 %v602_v4, %v588_v3 }
 0x2c8   : > { %610 = vperm.xlu2 %868, %v603_v5   ;;  %v606_v8 = vmul.f32 %v605_v6, %v603_v5 }
 0x2ca   : > { %v607_v12 = vsub.f32 %v604_v9, %v606_v8 }
 0x2d0   : > { %617 = vperm.xlu2 %868, %v607_v12   ;;  %v903_v12 = vmov -1.0  }
 0x322   : > { %v611_v13 = vpop.permute.xlu2 %610 }
 0x323   : > { %v613_v14 = vmul.f32 %v611_v13, %v544_v36  ;;  %v614_v15 = vmul.f32 %v611_v13, %v557_v37 }
 0x32a   : > { %v618_v16 = vpop.permute.xlu2 %617 }
 0x32b   : > { %v1007_v17 = vadd.f32 %v618_v16, %v613_v14  ;;  %v1009_v18 = vadd.f32 %v618_v16, %v614_v15 }
 0x32d   : > { %v1012_v19 = vmul.f32 0.70710677, %v1007_v17  ;;  %v1015_v20 = vmul.f32 0.70710677, %v1009_v18 }
 0x32f   : > { %v630_v21 = vand.u32 2147483647, %v1012_v19  ;;  %v631_v22 = vand.u32 2147483647, %v1015_v20  ;;  %vm626_vm10 = vcmp.ge.f32.partialorder %v1012_v19, 0.0  ;;  %vm627_vm11 = vcmp.ge.f32.partialorder %v1015_v20, 0.0 }
 0x330   : > { %v628_v13 = vsel %vm626_vm10, 1.0, %v903_v12  ;;  %v629_v15 = vsel %vm627_vm11, 1.0, %v903_v12 }
 0x331   : > { %v632_v23 = vmul.f32 0.3275911, %v630_v21  ;;  %v633_v24 = vmul.f32 0.3275911, %v631_v22  ;;  %v684_v43 = vsub.f32 0.0, %v630_v21  ;;  %v685_v46 = vsub.f32 0.0, %v631_v22 }
 0x333   : > { %v634_v25 = vadd.f32 1.0, %v632_v23  ;;  %v635_v26 = vadd.f32 1.0, %v633_v24  ;;  %v686_v50 = vmul.f32 %v684_v43, %v630_v21  ;;  %v687_v52 = vmul.f32 %v685_v46, %v631_v22 }
 0x334   : > { %v622_v22 = vmul.f32 0.5, %v1007_v17  ;;  %v623_v24 = vmul.f32 0.5, %v1009_v18 }
 0x335   : > { %872 = vrcp.f32 %v634_v25  ;;  %v647_v11 = vand.u32 2147483648, %v634_v25  ;;  %v645_v7 = vand.u32 2147483647, %v634_v25  ;;  %v662_v33 = vand.u32 2147483648, %v635_v26 }
 0x336   : > { %874 = vrcp.f32 %v635_v26  ;;  %v660_v35 = vand.u32 2147483647, %v635_v26  ;;  %vm641_vm4 = vweird.f32 %v634_v25  ;;  %vm656_vm6 = vweird.f32 %v635_v26 }
 0x337   : > { %v648_v37 = vor.u32 1.1754944e-38, %v647_v11  ;;  %vm646_vm7 = vcmp.eq.f32.partialorder %v645_v7, 8.507059e+37  ;;  %v663_v40 = vor.u32 1.1754944e-38, %v662_v33  ;;  %v688_v56 = vmul.f32 1.442695, %v686_v50 }
 0x338   : > { %vm661_vm9 = vcmp.eq.f32.partialorder %v660_v35, 8.507059e+37  ;;  %v690_v58 = vmul.f32 1.442695, %v687_v52 }
 0x339   : > { %876 = vpow2.f32 %v688_v56 }
 0x33a   : > { %878 = vpow2.f32 %v690_v58 }
 0x33b   : > { %v873_v27 = vpop.eup %872 }
 0x33c   : > { %v875_v28 = vpop.eup %874  ;;  %v637_v29 = vmul.f32 %v873_v27, %v634_v25  ;;  %vm642_vm2 = vweird.f32 %v873_v27 }
 0x33d   : > { %v652_v30 = vmul.f32 %v875_v28, %v635_v26  ;;  %vm657_vm3 = vweird.f32 %v875_v28  ;;  %vm643_vm5 = vmor %vm641_vm4, %vm642_vm2 }
 0x33e   : > { %v638_v10 = vsub.f32 1.0, %v637_v29  ;;  %vm658_vm8 = vmor %vm656_vm6, %vm657_vm3 }
 0x33f   : > { %v653_v31 = vsub.f32 1.0, %v652_v30  ;;  %v877_v3 = vpop.eup %876 }
 0x340   : > { %v639_v32 = vmul.f32 %v873_v27, %v638_v10  ;;  %v879_v5 = vpop.eup %878 }
 0x341   : > { %v654_v34 = vmul.f32 %v875_v28, %v653_v31 }
 0x342   : > { %v640_v36 = vadd.f32 %v873_v27, %v639_v32 }
 0x343   : > { %v655_v38 = vadd.f32 %v875_v28, %v654_v34 }
 0x344   : > { %v644_v39 = vsel %vm643_vm5, %v873_v27, %v640_v36 }
 0x345   : > { %v649_v41 = vsel %vm646_vm7, %v648_v37, %v644_v39  ;;  %v659_v42 = vsel %vm658_vm8, %v875_v28, %v655_v38 }
 0x346   : > { %v664_v44 = vsel %vm661_vm9, %v663_v40, %v659_v42  ;;  %v666_v45 = vmul.f32 1.0614054, %v649_v41 }
 0x347   : > { %v667_v47 = vmul.f32 1.0614054, %v664_v44 }
 0x348   : > { %v668_v48 = vadd.f32 -1.4531521, %v666_v45 }
 0x349   : > { %v669_v49 = vadd.f32 -1.4531521, %v667_v47 }
 0x34a   : > { %v670_v51 = vmul.f32 %v668_v48, %v649_v41 }
 0x34b   : > { %v671_v53 = vmul.f32 %v669_v49, %v664_v44 }
 0x34c   : > { %v672_v54 = vadd.f32 1.4214138, %v670_v51 }
 0x34d   : > { %v673_v55 = vadd.f32 1.4214138, %v671_v53 }
 0x34e   : > { %v674_v57 = vmul.f32 %v672_v54, %v649_v41 }
 0x34f   : > { %v675_v59 = vmul.f32 %v673_v55, %v664_v44 }
 0x350   : > { %v676_v60 = vadd.f32 -0.28449672, %v674_v57 }
 0x351   : > { %v677_v61 = vadd.f32 -0.28449672, %v675_v59 }
 0x352   : > { %v678_v62 = vmul.f32 %v676_v60, %v649_v41 }
 0x353   : > { %v679_v63 = vmul.f32 %v677_v61, %v664_v44 }
 0x354   : > { %v680_v0 = vadd.f32 0.2548296, %v678_v62 }
 0x355   : > { %v681_v1 = vadd.f32 0.2548296, %v679_v63 }
 0x356   : > { %v682_v2 = vmul.f32 %v680_v0, %v649_v41 }
 0x357   : > { %v683_v4 = vmul.f32 %v681_v1, %v664_v44 }
 0x358   : > { %v692_v6 = vmul.f32 %v877_v3, %v682_v2 }
 0x359   : > { %v693_v8 = vmul.f32 %v879_v5, %v683_v4 }
 0x35a   : > { %v694_v9 = vsub.f32 1.0, %v692_v6 }
 0x35b   : > { %v695_v14 = vsub.f32 1.0, %v693_v8 }
 0x35c   : > { %v696_v16 = vmul.f32 %v694_v9, %v628_v13 }
 0x35d   : > { %v697_v21 = vmul.f32 %v695_v14, %v629_v15 }
 0x35e   : > { %v698_v23 = vadd.f32 1.0, %v696_v16 }
 0x35f   : > { %v699_v25 = vadd.f32 1.0, %v697_v21 }
 0x360   : > { %v700_v26 = vmul.f32 %v698_v23, %v622_v22 }
 0x361   : > { %v701_v19 = vmul.f32 %v699_v25, %v623_v24 }
 0x363   : > { %v702_v20 = vpack.c.bf16 %v701_v19, %v700_v26 }
 0x365   : > { %703 = vst [vmem:[%s224_s10] sm:$0xff] %v702_v20 }
 0x366 PF: > { %s15_s18 = sadd.s32 1, %s886_s18  }
 0x367   : > { %p12_p4 = scmp.ge.s32.totalorder %s15_s18, 4  }
 0x369   :  { %14 = sbr.rel (!%p12_p4) target bundleno = 1 (0x1), region = 70 }

// kernel: up_mass_forward.5
= control target key start
LH: loop header
LB: loop body
LE: loop exit
PB: predicated region body
PF: predicated region fallthrough
CT: control target
= control target key end

     0   :  { %s1006_s21 = smov 0   ;;  %s1121_s0 = inlined_call_operand.vmem [shape: bf16[2,8,290], index: 0, kind: input, shape index: {}]   ;;  %s1122_s1 = inlined_call_operand.vmem [shape: bf16[8,72], index: 1, kind: input, shape index: {}]   ;;  %s1123_s2 = inlined_call_operand.vmem [shape: bf16[2,256], index: 2, kind: input, shape index: {}]   ;;  %s1124_s3 = inlined_call_operand.vmem [shape: f32[1,8,1], index: 3, kind: input, shape index: {}]   ;;  %s1125_s4 = inlined_call_operand.vmem [shape: f32[1,8,1], index: 4, kind: input, shape index: {}]   ;;  %s1126_s5 = inlined_call_operand.vmem [shape: bf16[2,8,256], index: 5, kind: input, shape index: {}]   ;;  %s1127_s6 = inlined_call_operand.vmem [shape: bf16[2,8,256], index: 6, kind: output, shape index: {}]  }
   0x1 LB: > { %s823_s22 = sadd.s32 4294967295, %s953_s21   ;;  %p827_p0 = scmp.ge.s32.totalorder %s953_s21, 1  ;;  %s953_s21 = sphi %s1006_s21, %s16_s21  }
   0x2   : > { %p222_p1 = scmp.lt.s32.totalorder %s953_s21, 3 }
   0x4   : > { %p223_p2 = pnand %p827_p0, %p222_p1 }
   0x5   : > { %p257_p3 = scmp.lt.s32.totalorder (!%p223_p2), %s823_s22, 1  ;;  %s955_s29 = smov (!%p223_p2), 16  }
   0x6   : > { %226 = sbr.rel (%p223_p2) target bundleno = 872 (0x368), region = 44  ;;  %s956_s30 = smov (!%p223_p2), 111  }
   0x7   : > { %s957_s7 = smov (!%p223_p2), 18   ;;  %s958_s8 = smov (!%p223_p2), 34  }
   0x8   : > { %s959_s9 = smov (!%p223_p2), 2   ;;  %s960_s10 = smov (!%p223_p2), 32  }
   0x9   : > { %s961_s11 = smov (!%p223_p2), 95   ;;  %s962_s12 = smov (!%p223_p2), 94  }
   0xa   : > { %s963_s13 = smov (!%p223_p2), 96   ;;  %s964_s14 = smov (!%p223_p2), 126  }
   0xb   : > { %v273_v0 = vld [vmem:[%s1123_s2] sm:$0x3]  ;;  %s1129_s22 = smov (!%p257_p3, %s823_s22), 1  ;;  %vm333_vm0 = vcmask 15360   ;;  %vm446_vm1 = vcmask 261120   ;;  %vm493_vm2 = vcmask 277504  }
   0xc   : > { %276 = vst [vmem:[#allocation1] ss:$9 sm:$0xff] %v273_v0  ;;  %s879_s25 = smul.u32 12, %s1129_s22  ;;  %vm414_vm3 = vcmask 146432   ;;  %s965_s15 = smov 112   ;;  %vm367_vm4 = vcmask 130048  }
   0xd   : > { %s966_s16 = smov 110   ;;  %s967_s17 = smov 127   ;;  %vm303_vm5 = vcmask 1043456   ;;  %vm401_vm6 = vcmask 908288   ;;  %vm480_vm7 = vcmask 777216   ;;  %vm512_vm8 = vcmask 769024  }
   0xe   : > { %s1023_s28 = scalar_lea.vmem %s1121_s0, %s879_s25  ;;  %vm465_vm9 = vcmask 785408   ;;  %vm352_vm10 = vcmask 1031168   ;;  %vm386_vm11 = vcmask 916480   ;;  %vm433_vm12 = vcmask 900096  }
   0xf   : > { %v1026_v7 = vld [vmem:[%s1023_s28] sm:$0xff]  ;;  %v391_v27 = vld [vmem:[%s1023_s28 + $0x8] sm:$0xf]  ;;  %vm305_vm13 = vcmask 1039360   ;;  %vm571_vm14 = vcmask 588800  }
  0x10   : > { %v1029_v10 = vunpack.c.l.bf16 %v1026_v7  ;;  %v1032_v11 = vunpack.c.h.bf16 %v1026_v7  ;;  %v470_v28 = vld [vmem:[%s1023_s28 + $0x8] sm:$0xf] }
  0x11   : > { %v485_v29 = vld [vmem:[%s1023_s28 + $0x8] sm:$0xf] }
  0x12   : > { %v488_v32 = vunpack.c.l.bf16 %v485_v29  ;;  %v438_v35 = vld [vmem:[%s1023_s28 + $0x8] sm:$0xf] }
  0x13   : > { %v277_v1 = vld [vmem:[#allocation1] sm:$0xff]  ;;  %v278_v2 = vld [vmem:[#allocation1 + $0x9] sm:$0xff]  ;;  %v441_v40 = vunpack.c.l.bf16 %v438_v35 }
  0x14   : > { %311 = vst [vmem:[#allocation1] ss:$9 sm:$0xff] %v273_v0  ;;  %v279_v3 = vpack.i.b16 %v277_v1, %v277_v1  ;;  %v282_v4 = vpack.i.b16 %v278_v2, %v278_v2  ;;  %v310_v37 = vld [vmem:[%s1023_s28 + $0x8] sm:$0xf] }
  0x15   : > { %v324_v45 = vunpack.c.l.bf16 %v310_v37  ;;  %v357_v47 = vld [vmem:[%s1023_s28 + $0x8] sm:$0xf] }
  0x16   : > { %v281_v5 = vperm.slane %v279_v3, 0  ;;  %v284_v6 = vperm.slane %v282_v4, 0  ;;  %v360_v57 = vunpack.c.l.bf16 %v357_v47  ;;  %v406_v4 = vld [vmem:[%s1023_s28 + $0x8] sm:$0xf] }
  0x18   : > { %v287_v8 = vunpack.c.l.bf16 %v281_v5  ;;  %v288_v9 = vunpack.c.l.bf16 %v284_v6 }
  0x1a   : > { %v289_v12 = vmul.f32 %v287_v8, %v1029_v10  ;;  %v290_v13 = vmul.f32 %v288_v9, %v1032_v11  ;;  %v930_v14 = vpack.i.bf16 %v288_v9, %v287_v8  ;;  %v409_v8 = vunpack.c.l.bf16 %v406_v4 }
  0x1b   : > { %v312_v15 = vld [vmem:[#allocation1] sm:$0xff]  ;;  %v313_v16 = vld [vmem:[#allocation1 + $0x9] sm:$0xff] }
  0x1c   : > { %v314_v17 = vshrl.u32 %v312_v15, 16  ;;  %v318_v18 = vshrl.u32 %v313_v16, 16  ;;  %v291_v19 = vpack.c.bf16 %v290_v13, %v289_v12  ;;  %931 = vrot.lane.b32.xlu2 %v930_v14, %s955_s29 }
  0x1e   : > { %v315_v20 = vpack.i.b16 %v314_v17, %v314_v17  ;;  %v319_v21 = vpack.i.b16 %v318_v18, %v318_v18  ;;  %292 = vst [vmem:[#allocation2] sm:$0xff] %v291_v19 }
  0x20   : > { %v317_v22 = vperm.slane %v315_v20, 0  ;;  %v321_v23 = vperm.slane %v319_v21, 0 }
  0x22   : > { %v325_v24 = vunpack.c.l.bf16 %v317_v22  ;;  %v326_v25 = vunpack.c.l.bf16 %v321_v23  ;;  %v294_v23 = vld [vmem:[%s1023_s28 + $0x8] sm:$0xf]  ;;  %s968_s28 = smov 0.0  }
  0x24   : > { %v920_v26 = vpack.i.bf16 %v326_v25, %v325_v24  ;;  %394 = vrot.lane.b32.xlu2 %v1026_v7, %s956_s30 }
  0x26   : > { %921 = vrot.lane.b32.xlu1 %v920_v26, %s957_s7  ;;  %911 = vrot.lane.b32.xlu0 %v920_v26, %s958_s8 }
  0x2e   : > { %926 = vrot.lane.b32.xlu1 %v920_v26, %s959_s9  ;;  %916 = vrot.lane.b32.xlu0 %v930_v14, %s960_s10 }
  0x36   : > { %473 = vrot.lane.b32.xlu0 %v1026_v7, %s961_s11  ;;  %475 = vrot.lane.b32.xlu1 %v470_v28, %s961_s11 }
  0x3e   : > { %396 = vrot.lane.b32.xlu0 %v391_v27, %s956_s30 }
  0x76   : > { %v932_v46 = vpop.permute.xlu2 %931 }
  0x77   : > { %v934_v56 = vunpack.i.h.bf16 %v932_v46  ;;  %v933_v16 = vunpack.i.l.bf16 %v932_v46 }
  0x79   : > { %v374_v63 = vmul.f32 %v934_v56, %v360_v57  ;;  %v368_v19 = vsel %vm367_vm4, %v933_v16, %v934_v56  ;;  %v372_v20 = vmul.f32 %v933_v16, %v1029_v10 }
  0x7a   : > { %v373_v21 = vmul.f32 %v368_v19, %v1032_v11 }
  0x7b   : > { %v376_v6 = vpack.c.bf16 %v374_v63, %v374_v63 }
  0x7c   : > { %v375_v22 = vpack.c.bf16 %v373_v21, %v372_v20 }
  0x7e   : > { %v395_v25 = vpop.permute.xlu2 %394 }
  0x7f   : > { %v398_v26 = vrot.slane %v395_v25, 4 }
  0x98   : > { %v922_v30 = vpop.permute.xlu1 %921  ;;  %v912_v31 = vpop.permute.xlu0 %911 }
  0x99   : > { %v914_v33 = vunpack.i.h.bf16 %v912_v31  ;;  %v913_v48 = vunpack.i.l.bf16 %v912_v31  ;;  %v924_v2 = vunpack.i.h.bf16 %v922_v30  ;;  %v923_v3 = vunpack.i.l.bf16 %v922_v30 }
  0x9b   : > { %v500_v34 = vmul.f32 %v914_v33, %v488_v32  ;;  %v494_v61 = vsel %vm493_vm2, %v913_v48, %v914_v33  ;;  %v498_v0 = vmul.f32 %v913_v48, %v1029_v10  ;;  %v415_v12 = vsel %vm414_vm3, %v923_v3, %v924_v2 }
  0x9c   : > { %v499_v1 = vmul.f32 %v494_v61, %v1032_v11  ;;  %v419_v13 = vmul.f32 %v923_v3, %v1029_v10  ;;  %v421_v14 = vmul.f32 %v924_v2, %v409_v8  ;;  %v420_v15 = vmul.f32 %v415_v12, %v1032_v11 }
  0x9d   : > { %v502_v36 = vpack.c.bf16 %v500_v34, %v500_v34 }
  0x9e   : > { %v501_v9 = vpack.c.bf16 %v499_v1, %v498_v0  ;;  %v423_v17 = vpack.c.bf16 %v421_v14, %v421_v14  ;;  %v422_v18 = vpack.c.bf16 %v420_v15, %v419_v13 }
  0x9f   : > { %507 = vrot.lane.b32.xlu0 %v502_v36, %s962_s12 }
  0xa0   : > { %v927_v38 = vpop.permute.xlu1 %926  ;;  %v917_v39 = vpop.permute.xlu0 %916 }
  0xa1   : > { %v929_v41 = vunpack.i.h.bf16 %v927_v38  ;;  %v928_v42 = vunpack.i.l.bf16 %v927_v38  ;;  %v919_v43 = vunpack.i.h.bf16 %v917_v39  ;;  %v918_v44 = vunpack.i.l.bf16 %v917_v39 }
  0xa3   : > { %v334_v49 = vsel %vm333_vm0, %v928_v42, %v929_v41  ;;  %v338_v50 = vmul.f32 %v928_v42, %v1029_v10  ;;  %v447_v51 = vsel %vm446_vm1, %v918_v44, %v919_v43  ;;  %v451_v52 = vmul.f32 %v918_v44, %v1029_v10 }
  0xa4   : > { %v453_v53 = vmul.f32 %v919_v43, %v441_v40  ;;  %v452_v54 = vmul.f32 %v447_v51, %v1032_v11  ;;  %v339_v55 = vmul.f32 %v334_v49, %v1032_v11  ;;  %v340_v62 = vmul.f32 %v929_v41, %v324_v45 }
  0xa6   : > { %v455_v58 = vpack.c.bf16 %v453_v53, %v453_v53  ;;  %v454_v59 = vpack.c.bf16 %v452_v54, %v451_v52  ;;  %v341_v60 = vpack.c.bf16 %v339_v55, %v338_v50  ;;  %v342_v5 = vpack.c.bf16 %v340_v62, %v340_v62 }
  0xa8   : > { %460 = vrot.lane.b32.xlu2 %v455_v58, %s963_s13  ;;  %458 = vrot.lane.b32.xlu1 %v454_v59, %s963_s13  ;;  %v474_v24 = vpop.permute.xlu0 %473  ;;  %v476_v11 = vpop.permute.xlu1 %475 }
  0xa9   : > { %345 = vrot.lane.b32.xlu0 %v341_v60, %s964_s14  ;;  %v477_v10 = vrot.slane %v474_v24, 4  ;;  %v478_v31 = vrot.slane %v476_v11, 4  ;;  %v835_v11 = vld [vmem:[#allocation2] sm:$0xf] }
  0xab   : > { %v479_v32 = vsel %vm303_vm5, %v477_v10, %v478_v31  ;;  %v871_v31 = vld [vmem:[#allocation2 + $0x4] sm:$0xf] }
  0xb0   : > { %505 = vrot.lane.b32.xlu2 %v501_v9, %s962_s12  ;;  %347 = vrot.lane.b32.xlu1 %v342_v5, %s964_s14  ;;  %v397_v27 = vpop.permute.xlu0 %396  ;;  %s869_s12 = sshll.u32 %s1129_s22, 3 }
  0xb1   : > { %381 = vrot.lane.b32.xlu0 %v376_v6, %s965_s15  ;;  %v399_v28 = vrot.slane %v397_v27, 4  ;;  %s271_s18 = scalar_lea.vmem %s1127_s6, %s869_s12 }
  0xb3   : > { %v400_v29 = vsel %vm303_vm5, %v398_v26, %v399_v28 }
  0xb4   : > { %v402_v30 = vsel %vm401_vm6, %v395_v25, %v400_v29 }
  0xb5   : > { %404 = vst [vmem:[#allocation2 + $0x20] sm:$0xff] %v402_v30 }
  0xb8   : > { %428 = vrot.lane.b32.xlu2 %v423_v17, %s966_s16  ;;  %426 = vrot.lane.b32.xlu1 %v422_v18, %s966_s16 }
  0xbc   : > { %v851_v19 = vld [vmem:[#allocation2 + $0x20] sm:$0xf] }
  0xc0   : > { %379 = vrot.lane.b32.xlu2 %v375_v22, %s965_s15  ;;  %297 = vrot.lane.b32.xlu1 %v1026_v7, %s967_s17  ;;  %v481_v7 = vsel %vm480_vm7, %v474_v24, %v479_v32  ;;  %v875_v22 = vld [vmem:[#allocation2 + $0x24] sm:$0xf]  ;;  %s266_s15 = scalar_lea.vmem %s1126_s5, %s869_s12 }
  0xc1   : > { %483 = vst [vmem:[#allocation2 + $0x38] sm:$0xff] %v481_v7 }
  0xc8   : > { %299 = vrot.lane.b32.xlu2 %v294_v23, %s967_s17  ;;  %v878_v61 = vld [vmem:[#allocation2 + $0x34] sm:$0xf0]  ;;  %v861_v2 = vld [vmem:[#allocation2 + $0x38] sm:$0xf0] }
 0x102   : > { %v461_v33 = vpop.permute.xlu2 %460 }
 0x103   : > { %v463_v46 = vrot.slane %v461_v33, 4 }
 0x10a   : > { %v506_v34 = vpop.permute.xlu2 %505 }
 0x10b   : > { %v509_v36 = vrot.slane %v506_v34, 4 }
 0x111   : > { %v508_v35 = vpop.permute.xlu0 %507 }
 0x112   : > { %v510_v37 = vrot.slane %v508_v35, 4  ;;  %v429_v40 = vpop.permute.xlu2 %428  ;;  %v516_v35 = vld [vmem:[%s1122_s1] sm:$0xf] }
 0x113   : > { %v431_v8 = vrot.slane %v429_v40, 4 }
 0x114   : > { %v511_v38 = vsel %vm303_vm5, %v509_v36, %v510_v37 }
 0x115   : > { %v513_v39 = vsel %vm512_vm8, %v506_v34, %v511_v38 }
 0x116   : > { %v551_v41 = vunpack.c.l.b16 %v513_v39  ;;  %v552_v42 = vunpack.c.h.b16 %v513_v39 }
 0x118   : > { %v561_v43 = vpack.c.b16 %v551_v41, %v551_v41  ;;  %v562_v44 = vpack.c.b16 %v552_v42, %v552_v42 }
 0x11a   : > { %v459_v45 = vpop.permute.xlu1 %458  ;;  %v577_v49 = vsel %vm303_vm5, %v561_v43, 0  ;;  %v580_v50 = vsel %vm303_vm5, %v562_v44, 0  ;;  %v380_v53 = vpop.permute.xlu2 %379 }
 0x11b   : > { %v462_v47 = vrot.slane %v459_v45, 4  ;;  %v346_v48 = vpop.permute.xlu0 %345  ;;  %585 = vmatpush.bf16.msra.mxu0 %v577_v49  ;;  %598 = vmatpush.bf16.msra.mxu1 %v580_v50  ;;  %v383_v58 = vrot.slane %v380_v53, 4 }
 0x11c   : > { %v349_v54 = vrot.slane %v346_v48, 4 }
 0x11d   : > { %v464_v51 = vsel %vm303_vm5, %v462_v47, %v463_v46 }
 0x11e   : > { %v466_v52 = vsel %vm465_vm9, %v459_v45, %v464_v51 }
 0x11f   : > { %468 = vst [vmem:[#allocation2 + $0x30] sm:$0xff] %v466_v52 }
 0x122   : > { %v348_v55 = vpop.permute.xlu1 %347  ;;  %v300_v14 = vpop.permute.xlu2 %299 }
 0x123   : > { %v350_v56 = vrot.slane %v348_v55, 4  ;;  %v382_v57 = vpop.permute.xlu0 %381  ;;  %v302_v15 = vrot.slane %v300_v14, 4  ;;  %v669_v14 = vld [vmem:[%s266_s15] sm:$0xff] }
 0x124   : > { %v384_v59 = vrot.slane %v382_v57, 4 }
 0x125   : > { %v351_v60 = vsel %vm303_vm5, %v349_v54, %v350_v56 }
 0x126   : > { %v353_v62 = vsel %vm352_vm10, %v346_v48, %v351_v60  ;;  %v385_v63 = vsel %vm303_vm5, %v383_v58, %v384_v59  ;;  %v859_v0 = vld [vmem:[#allocation2 + $0x30] sm:$0xf]  ;;  %v877_v1 = vld [vmem:[#allocation2 + $0x34] sm:$0xf] }
 0x127   : > { %355 = vst [vmem:[#allocation2 + $0x10] sm:$0xff] %v353_v62  ;;  %v387_v3 = vsel %vm386_vm11, %v380_v53, %v385_v63  ;;  %v860_v4 = vor.u32 %v878_v61, %v859_v0  ;;  %v864_v5 = vor.u32 %v877_v1, %v861_v2  ;;  %v969_v2 = vmov 0  }
 0x128   : > { %389 = vst [vmem:[#allocation2 + $0x18] sm:$0xff] %v387_v3  ;;  %935 = vset.pattern.permute.xlu2 %v969_v2  ;;  %936 = vset.pattern.permute.xlu0 %v969_v2  ;;  %v635_v3 = vld [vmem:[%s1124_s3] sm:$0xff] }
 0x129   : > { %586 = vmatpush.bf16.msra.mxu0 %v860_v4  ;;  %599 = vmatpush.bf16.msra.mxu1 %v864_v5 }
 0x12a   : > { %v427_v6 = vpop.permute.xlu1 %426 }
 0x12b   : > { %v430_v9 = vrot.slane %v427_v6, 4 }
 0x12d   : > { %v432_v12 = vsel %vm303_vm5, %v430_v9, %v431_v8  ;;  %v651_v9 = vld [vmem:[%s1125_s4] sm:$0xff] }
 0x12e   : > { %v434_v13 = vsel %vm433_vm12, %v427_v6, %v432_v12  ;;  %v843_v26 = vld [vmem:[#allocation2 + $0x10] sm:$0xf]  ;;  %v873_v28 = vld [vmem:[#allocation2 + $0x14] sm:$0xf] }
 0x12f   : > { %436 = vst [vmem:[#allocation2 + $0x28] sm:$0xff] %v434_v13  ;;  %v874_v27 = vld [vmem:[#allocation2 + $0x14] sm:$0xf0]  ;;  %v845_v29 = vld [vmem:[#allocation2 + $0x18] sm:$0xf0] }
 0x130   : > { %v844_v30 = vor.u32 %v874_v27, %v843_v26  ;;  %v848_v10 = vor.u32 %v873_v28, %v845_v29 }
 0x132   : > { %v298_v16 = vpop.permute.xlu1 %297 }
 0x133   : > { %v301_v17 = vrot.slane %v298_v16, 4 }
 0x135   : > { %v304_v18 = vsel %vm303_vm5, %v301_v17, %v302_v15  ;;  %v670_v17 = vunpack.c.l.bf16 %v669_v14 }
 0x136   : > { %v306_v20 = vsel %vm305_vm13, %v298_v16, %v304_v18  ;;  %v876_v21 = vld [vmem:[#allocation2 + $0x24] sm:$0xf0]  ;;  %v853_v23 = vld [vmem:[#allocation2 + $0x28] sm:$0xf0]  ;;  %v671_v18 = vunpack.c.h.bf16 %v669_v14 }
 0x137   : > { %308 = vst [vmem:[#allocation2 + $0x8] sm:$0xff] %v306_v20  ;;  %v852_v24 = vor.u32 %v876_v21, %v851_v19  ;;  %v856_v25 = vor.u32 %v875_v22, %v853_v23 }
 0x139   : > { %587 = vmatpush.bf16.msra.mxu0 %v852_v24  ;;  %600 = vmatpush.bf16.msra.mxu1 %v856_v25 }
 0x13d   : > { %588 = vmatpush.bf16.msra.mxu0 %v844_v30  ;;  %601 = vmatpush.bf16.msra.mxu1 %v848_v10 }
 0x13e   : > { %v872_v32 = vld [vmem:[#allocation2 + $0x4] sm:$0xf0]  ;;  %v837_v7 = vld [vmem:[#allocation2 + $0x8] sm:$0xf0] }
 0x13f   : > { %v836_v33 = vor.u32 %v872_v32, %v835_v11  ;;  %v840_v34 = vor.u32 %v871_v31, %v837_v7 }
 0x141   : > { %589 = vmatpush.bf16.msra.mxu0 %v836_v33  ;;  %602 = vmatpush.bf16.msra.mxu1 %v840_v34 }
 0x144   : > { %865 = vmatmul.msk.bf16.vlgmr.msra.gmra.mxu0 %vm571_vm14, %v516_v35  ;;  %866 = vmatmul.msk.bf16.vlgmr.msra.gmra.mxu1 %vm571_vm14, %v516_v35 }
 0x1c1   : > { %v1073_v36 = vpop.f32.mrf.mxu0  ;;  %v1075_v37 = vpop.f32.mrf.mxu1 }
 0x1c2   : > { %v608_v38 = vadd.f32 %v1075_v37, %v1073_v36  ;;  %v618_v39 = vmul.f32 %v1073_v36, %v1073_v36  ;;  %v619_v40 = vmul.f32 %v1075_v37, %v1075_v37 }
 0x1c4   : > { %609 = vadd.xlane.f32.xlu0 %v608_v38  ;;  %v620_v41 = vadd.f32 %v619_v40, %v618_v39 }
 0x1c6   : > { %621 = vadd.xlane.f32.xlu1 %v620_v41 }
 0x1c9   : > { %v593_v42 = vpop.f32.mrf.mxu0  ;;  %v606_v43 = vpop.f32.mrf.mxu1 }
 0x237   : > { %v610_v44 = vpop.xlane.xlu0 %609 }
 0x238   : > { %v611_v45 = vrot.slane %v610_v44, 4 }
 0x239   : > { %v622_v46 = vpop.xlane.xlu1 %621 }
 0x23a   : > { %v612_v47 = vadd.f32 %v611_v45, %v610_v44  ;;  %v623_v48 = vrot.slane %v622_v46, 4 }
 0x23c   : > { %v613_v49 = vrot.slane %v612_v47, 2  ;;  %v624_v50 = vadd.f32 %v623_v48, %v622_v46 }
 0x23e   : > { %v625_v51 = vrot.slane %v624_v50, 2  ;;  %v614_v52 = vadd.f32 %v613_v49, %v612_v47 }
 0x240   : > { %v626_v53 = vadd.f32 %v625_v51, %v624_v50  ;;  %v615_v54 = vrot.slane %v614_v52, 1 }
 0x242   : > { %v616_v55 = vadd.f32 %v615_v54, %v614_v52  ;;  %v627_v56 = vrot.slane %v626_v53, 1 }
 0x244   : > { %880 = vpush %v616_v55  ;;  %v628_v57 = vadd.f32 %v627_v56, %v626_v53 }
 0x246   : > { %882 = vpush %v628_v57 }
 0x275   : > { %s881_s20 = spop %880 }
 0x276   : > { %s630_s23 = smul.f32 0.00048828125, %s881_s20 }
 0x277   : > { %s883_s24 = spop %882 }
 0x278   : > { %s632_s25 = smul.f32 %s630_s23, %s630_s23  ;;  %v652_v6 = vstv %s630_s23 }
 0x279   : > { %s631_s26 = smul.f32 0.00048828125, %s883_s24 }
 0x27b   : > { %s633_s27 = ssub.f32 %s631_s26, %s632_s25 }
 0x27d   : > { %s634_s29 = smax.f32 %s968_s28, %s633_s27 }
 0x27e   : > { %s636_s30 = sadd.f32 1e-05, %s634_s29 }
 0x280   : > { %v637_v58 = vstv %s636_s30 }
 0x281   : > { %937 = vrsqrt.f32 %v637_v58  ;;  %vm644_vm0 = vweird.f32 %v637_v58 }
 0x287   : > { %v938_v59 = vpop.eup %937 }
 0x288   : > { %v639_v60 = vmul.f32 %v938_v59, %v637_v58  ;;  %vm645_vm15 = vweird.f32 %v938_v59 }
 0x289   : > { %vm646_vm1 = vmor %vm644_vm0, %vm645_vm15 }
 0x28a   : > { %v640_v61 = vmul.f32 %v938_v59, %v639_v60 }
 0x28c   : > { %v641_v62 = vmul.f32 0.5, %v640_v61 }
 0x28e   : > { %v642_v63 = vsub.f32 1.5, %v641_v62 }
 0x290   : > { %v643_v0 = vmul.f32 %v938_v59, %v642_v63 }
 0x292   : > { %v647_v1 = vsel %vm646_vm1, %v938_v59, %v643_v0 }
 0x293   : > { %884 = vpush %v647_v1 }
 0x2c4   : > { %s885_s9 = spop %884 }
 0x2c5   : > { %v649_v4 = vstv %s885_s9 }
 0x2c6   : > { %v650_v5 = vmul.f32 %v649_v4, %v635_v3 }
 0x2c8   : > { %657 = vperm.xlu2 %935, %v650_v5   ;;  %v653_v8 = vmul.f32 %v652_v6, %v650_v5 }
 0x2ca   : > { %v654_v12 = vsub.f32 %v651_v9, %v653_v8 }
 0x2d0   : > { %664 = vperm.xlu2 %935, %v654_v12  }
 0x322   : > { %v658_v13 = vpop.permute.xlu2 %657 }
 0x323   : > { %v660_v15 = vmul.f32 %v658_v13, %v1073_v36  ;;  %v661_v16 = vmul.f32 %v658_v13, %v1075_v37 }
 0x32a   : > { %v665_v19 = vpop.permute.xlu2 %664 }
 0x32b   : > { %v667_v20 = vadd.f32 %v665_v19, %v660_v15  ;;  %v668_v21 = vadd.f32 %v665_v19, %v661_v16 }
 0x32d   : > { %v1097_v22 = vadd.f32 %v670_v17, %v667_v20  ;;  %v1099_v23 = vadd.f32 %v671_v18, %v668_v21  ;;  %v970_v17 = vmov -1.0  }
 0x32f   : > { %v1102_v24 = vmul.f32 0.70710677, %v1097_v22  ;;  %v1105_v25 = vmul.f32 0.70710677, %v1099_v23 }
 0x331   : > { %v682_v26 = vand.u32 2147483647, %v1102_v24  ;;  %v683_v27 = vand.u32 2147483647, %v1105_v25  ;;  %vm678_vm10 = vcmp.ge.f32.partialorder %v1102_v24, 0.0  ;;  %vm679_vm11 = vcmp.ge.f32.partialorder %v1105_v25, 0.0 }
 0x332   : > { %v680_v18 = vsel %vm678_vm10, 1.0, %v970_v17  ;;  %v681_v20 = vsel %vm679_vm11, 1.0, %v970_v17 }
 0x333   : > { %v684_v28 = vmul.f32 0.3275911, %v682_v26  ;;  %v685_v29 = vmul.f32 0.3275911, %v683_v27  ;;  %v736_v48 = vsub.f32 0.0, %v682_v26  ;;  %v737_v51 = vsub.f32 0.0, %v683_v27 }
 0x335   : > { %v686_v30 = vadd.f32 1.0, %v684_v28  ;;  %v687_v10 = vadd.f32 1.0, %v685_v29  ;;  %v738_v55 = vmul.f32 %v736_v48, %v682_v26  ;;  %v739_v57 = vmul.f32 %v737_v51, %v683_v27 }
 0x336   : > { %v674_v27 = vmul.f32 0.5, %v1097_v22  ;;  %v675_v29 = vmul.f32 0.5, %v1099_v23 }
 0x337   : > { %939 = vrcp.f32 %v686_v30  ;;  %v699_v34 = vand.u32 2147483648, %v686_v30  ;;  %v697_v37 = vand.u32 2147483647, %v686_v30  ;;  %v714_v38 = vand.u32 2147483648, %v687_v10 }
 0x338   : > { %941 = vrcp.f32 %v687_v10  ;;  %v712_v40 = vand.u32 2147483647, %v687_v10  ;;  %vm693_vm4 = vweird.f32 %v686_v30  ;;  %vm708_vm6 = vweird.f32 %v687_v10 }
 0x339   : > { %v700_v42 = vor.u32 1.1754944e-38, %v699_v34  ;;  %vm698_vm7 = vcmp.eq.f32.partialorder %v697_v37, 8.507059e+37  ;;  %v715_v45 = vor.u32 1.1754944e-38, %v714_v38  ;;  %v740_v61 = vmul.f32 1.442695, %v738_v55 }
 0x33a   : > { %vm713_vm9 = vcmp.eq.f32.partialorder %v712_v40, 8.507059e+37  ;;  %v742_v63 = vmul.f32 1.442695, %v739_v57 }
 0x33b   : > { %943 = vpow2.f32 %v740_v61 }
 0x33c   : > { %945 = vpow2.f32 %v742_v63 }
 0x33d   : > { %v940_v11 = vpop.eup %939 }
 0x33e   : > { %v942_v31 = vpop.eup %941  ;;  %v689_v32 = vmul.f32 %v940_v11, %v686_v30  ;;  %vm694_vm2 = vweird.f32 %v940_v11 }
 0x33f   : > { %v704_v7 = vmul.f32 %v942_v31, %v687_v10  ;;  %vm709_vm3 = vweird.f32 %v942_v31  ;;  %vm695_vm5 = vmor %vm693_vm4, %vm694_vm2 }
 0x340   : > { %v690_v33 = vsub.f32 1.0, %v689_v32  ;;  %vm710_vm8 = vmor %vm708_vm6, %vm709_vm3 }
 0x341   : > { %v705_v35 = vsub.f32 1.0, %v704_v7  ;;  %v944_v9 = vpop.eup %943 }
 0x342   : > { %v691_v36 = vmul.f32 %v940_v11, %v690_v33  ;;  %v946_v13 = vpop.eup %945 }
 0x343   : > { %v706_v39 = vmul.f32 %v942_v31, %v705_v35 }
 0x344   : > { %v692_v41 = vadd.f32 %v940_v11, %v691_v36 }
 0x345   : > { %v707_v43 = vadd.f32 %v942_v31, %v706_v39 }
 0x346   : > { %v696_v44 = vsel %vm695_vm5, %v940_v11, %v692_v41 }
 0x347   : > { %v701_v46 = vsel %vm698_vm7, %v700_v42, %v696_v44  ;;  %v711_v47 = vsel %vm710_vm8, %v942_v31, %v707_v43 }
 0x348   : > { %v716_v49 = vsel %vm713_vm9, %v715_v45, %v711_v47  ;;  %v718_v50 = vmul.f32 1.0614054, %v701_v46 }
 0x349   : > { %v719_v52 = vmul.f32 1.0614054, %v716_v49 }
 0x34a   : > { %v720_v53 = vadd.f32 -1.4531521, %v718_v50 }
 0x34b   : > { %v721_v54 = vadd.f32 -1.4531521, %v719_v52 }
 0x34c   : > { %v722_v56 = vmul.f32 %v720_v53, %v701_v46 }
 0x34d   : > { %v723_v58 = vmul.f32 %v721_v54, %v716_v49 }
 0x34e   : > { %v724_v59 = vadd.f32 1.4214138, %v722_v56 }
 0x34f   : > { %v725_v60 = vadd.f32 1.4214138, %v723_v58 }
 0x350   : > { %v726_v62 = vmul.f32 %v724_v59, %v701_v46 }
 0x351   : > { %v727_v0 = vmul.f32 %v725_v60, %v716_v49 }
 0x352   : > { %v728_v1 = vadd.f32 -0.28449672, %v726_v62 }
 0x353   : > { %v729_v2 = vadd.f32 -0.28449672, %v727_v0 }
 0x354   : > { %v730_v3 = vmul.f32 %v728_v1, %v701_v46 }
 0x355   : > { %v731_v4 = vmul.f32 %v729_v2, %v716_v49 }
 0x356   : > { %v732_v5 = vadd.f32 0.2548296, %v730_v3 }
 0x357   : > { %v733_v6 = vadd.f32 0.2548296, %v731_v4 }
 0x358   : > { %v734_v8 = vmul.f32 %v732_v5, %v701_v46 }
 0x359   : > { %v735_v12 = vmul.f32 %v733_v6, %v716_v49 }
 0x35a   : > { %v744_v14 = vmul.f32 %v944_v9, %v734_v8 }
 0x35b   : > { %v745_v15 = vmul.f32 %v946_v13, %v735_v12 }
 0x35c   : > { %v746_v16 = vsub.f32 1.0, %v744_v14 }
 0x35d   : > { %v747_v19 = vsub.f32 1.0, %v745_v15 }
 0x35e   : > { %v748_v21 = vmul.f32 %v746_v16, %v680_v18 }
 0x35f   : > { %v749_v26 = vmul.f32 %v747_v19, %v681_v20 }
 0x360   : > { %v750_v28 = vadd.f32 1.0, %v748_v21 }
 0x361   : > { %v751_v30 = vadd.f32 1.0, %v749_v26 }
 0x362   : > { %v752_v10 = vmul.f32 %v750_v28, %v674_v27 }
 0x363   : > { %v753_v24 = vmul.f32 %v751_v30, %v675_v29 }
 0x365   : > { %v754_v25 = vpack.c.bf16 %v753_v24, %v752_v10 }
 0x367   : > { %755 = vst [vmem:[%s271_s18] sm:$0xff] %v754_v25 }
 0x368 PF: > { %s16_s21 = sadd.s32 1, %s953_s21  }
 0x369   : > { %p13_p4 = scmp.ge.s32.totalorder %s16_s21, 4  }
 0x36b   :  { %15 = sbr.rel (!%p13_p4) target bundleno = 1 (0x1), region = 77 }

// kernel: up_mass_forward.6
= control target key start
LH: loop header
LB: loop body
LE: loop exit
PB: predicated region body
PF: predicated region fallthrough
CT: control target
= control target key end

     0   :  { %s945_s18 = smov 0   ;;  %s1057_s0 = inlined_call_operand.vmem [shape: bf16[2,8,290], index: 0, kind: input, shape index: {}]   ;;  %s1058_s1 = inlined_call_operand.vmem [shape: bf16[4,72], index: 1, kind: input, shape index: {}]   ;;  %s1059_s2 = inlined_call_operand.vmem [shape: bf16[2,256], index: 2, kind: input, shape index: {}]   ;;  %s1060_s3 = inlined_call_operand.vmem [shape: f32[1,4,1], index: 3, kind: input, shape index: {}]   ;;  %s1061_s4 = inlined_call_operand.vmem [shape: f32[1,4,1], index: 4, kind: input, shape index: {}]   ;;  %s1062_s5 = inlined_call_operand.vmem [shape: bf16[2,4,256], index: 5, kind: output, shape index: {}]  }
   0x1 LB: > { %s770_s19 = sadd.s32 4294967295, %s897_s18   ;;  %p774_p0 = scmp.ge.s32.totalorder %s897_s18, 1  ;;  %s897_s18 = sphi %s945_s18, %s15_s18  }
   0x2   : > { %p187_p1 = scmp.lt.s32.totalorder %s897_s18, 3 }
   0x4   : > { %p188_p2 = pnand %p774_p0, %p187_p1 }
   0x5   : > { %p215_p3 = scmp.lt.s32.totalorder (!%p188_p2), %s770_s19, 1  ;;  %s899_s26 = smov (!%p188_p2), 16  }
   0x6   : > { %191 = sbr.rel (%p188_p2) target bundleno = 874 (0x36a), region = 40  ;;  %s900_s27 = smov (!%p188_p2), 111  }
   0x7   : > { %s901_s28 = smov (!%p188_p2), 18   ;;  %s902_s29 = smov (!%p188_p2), 34  }
   0x8   : > { %s903_s30 = smov (!%p188_p2), 2   ;;  %s904_s6 = smov (!%p188_p2), 32  }
   0x9   : > { %s905_s7 = smov (!%p188_p2), 95   ;;  %s906_s8 = smov (!%p188_p2), 94  }
   0xa   : > { %s907_s9 = smov (!%p188_p2), 96   ;;  %s908_s10 = smov (!%p188_p2), 126  }
   0xb   : > { %v226_v0 = vld [vmem:[%s1059_s2] sm:$0x3]  ;;  %s1064_s19 = smov (!%p215_p3, %s770_s19), 1  ;;  %vm286_vm0 = vcmask 15360   ;;  %vm399_vm1 = vcmask 261120   ;;  %vm446_vm2 = vcmask 277504  }
   0xc   : > { %229 = vst [vmem:[#allocation1] ss:$9 sm:$0xff] %v226_v0  ;;  %s823_s22 = smul.u32 12, %s1064_s19  ;;  %vm367_vm3 = vcmask 146432   ;;  %s909_s11 = smov 112   ;;  %vm320_vm4 = vcmask 130048  }
   0xd   : > { %s910_s12 = smov 110   ;;  %s911_s13 = smov 127   ;;  %vm256_vm5 = vcmask 1043456   ;;  %vm354_vm6 = vcmask 908288   ;;  %vm433_vm7 = vcmask 777216   ;;  %vm465_vm8 = vcmask 769024  }
   0xe   : > { %s962_s25 = scalar_lea.vmem %s1057_s0, %s823_s22  ;;  %vm418_vm9 = vcmask 785408   ;;  %vm305_vm10 = vcmask 1031168   ;;  %vm339_vm11 = vcmask 916480   ;;  %vm386_vm12 = vcmask 900096   ;;  %s912_s24 = smov 0.0  }
   0xf   : > { %v965_v7 = vld [vmem:[%s962_s25] sm:$0xff]  ;;  %v344_v27 = vld [vmem:[%s962_s25 + $0x8] sm:$0xf]  ;;  %vm258_vm13 = vcmask 1039360   ;;  %vm524_vm14 = vcmask 588800  }
  0x10   : > { %v968_v10 = vunpack.c.l.bf16 %v965_v7  ;;  %v971_v11 = vunpack.c.h.bf16 %v965_v7  ;;  %v423_v28 = vld [vmem:[%s962_s25 + $0x8] sm:$0xf] }
  0x11   : > { %v438_v29 = vld [vmem:[%s962_s25 + $0x8] sm:$0xf] }
  0x12   : > { %v441_v32 = vunpack.c.l.bf16 %v438_v29  ;;  %v391_v35 = vld [vmem:[%s962_s25 + $0x8] sm:$0xf] }
  0x13   : > { %v230_v1 = vld [vmem:[#allocation1] sm:$0xff]  ;;  %v231_v2 = vld [vmem:[#allocation1 + $0x9] sm:$0xff]  ;;  %v394_v40 = vunpack.c.l.bf16 %v391_v35 }
  0x14   : > { %264 = vst [vmem:[#allocation1] ss:$9 sm:$0xff] %v226_v0  ;;  %v232_v3 = vpack.i.b16 %v230_v1, %v230_v1  ;;  %v235_v4 = vpack.i.b16 %v231_v2, %v231_v2  ;;  %v263_v37 = vld [vmem:[%s962_s25 + $0x8] sm:$0xf] }
  0x15   : > { %v277_v45 = vunpack.c.l.bf16 %v263_v37  ;;  %v310_v47 = vld [vmem:[%s962_s25 + $0x8] sm:$0xf] }
  0x16   : > { %v234_v5 = vperm.slane %v232_v3, 0  ;;  %v237_v6 = vperm.slane %v235_v4, 0  ;;  %v313_v57 = vunpack.c.l.bf16 %v310_v47  ;;  %v359_v4 = vld [vmem:[%s962_s25 + $0x8] sm:$0xf] }
  0x18   : > { %v240_v8 = vunpack.c.l.bf16 %v234_v5  ;;  %v241_v9 = vunpack.c.l.bf16 %v237_v6 }
  0x1a   : > { %v242_v12 = vmul.f32 %v240_v8, %v968_v10  ;;  %v243_v13 = vmul.f32 %v241_v9, %v971_v11  ;;  %v874_v14 = vpack.i.bf16 %v241_v9, %v240_v8  ;;  %v362_v8 = vunpack.c.l.bf16 %v359_v4 }
  0x1b   : > { %v265_v15 = vld [vmem:[#allocation1] sm:$0xff]  ;;  %v266_v16 = vld [vmem:[#allocation1 + $0x9] sm:$0xff] }
  0x1c   : > { %v267_v17 = vshrl.u32 %v265_v15, 16  ;;  %v271_v18 = vshrl.u32 %v266_v16, 16  ;;  %v244_v19 = vpack.c.bf16 %v243_v13, %v242_v12  ;;  %875 = vrot.lane.b32.xlu2 %v874_v14, %s899_s26 }
  0x1e   : > { %v268_v20 = vpack.i.b16 %v267_v17, %v267_v17  ;;  %v272_v21 = vpack.i.b16 %v271_v18, %v271_v18  ;;  %245 = vst [vmem:[#allocation2] sm:$0xff] %v244_v19 }
  0x20   : > { %v270_v22 = vperm.slane %v268_v20, 0  ;;  %v274_v23 = vperm.slane %v272_v21, 0 }
  0x22   : > { %v278_v24 = vunpack.c.l.bf16 %v270_v22  ;;  %v279_v25 = vunpack.c.l.bf16 %v274_v23  ;;  %v247_v23 = vld [vmem:[%s962_s25 + $0x8] sm:$0xf] }
  0x24   : > { %v864_v26 = vpack.i.bf16 %v279_v25, %v278_v24  ;;  %347 = vrot.lane.b32.xlu2 %v965_v7, %s900_s27 }
  0x26   : > { %865 = vrot.lane.b32.xlu1 %v864_v26, %s901_s28  ;;  %855 = vrot.lane.b32.xlu0 %v864_v26, %s902_s29 }
  0x2e   : > { %870 = vrot.lane.b32.xlu1 %v864_v26, %s903_s30  ;;  %860 = vrot.lane.b32.xlu0 %v874_v14, %s904_s6 }
  0x36   : > { %426 = vrot.lane.b32.xlu0 %v965_v7, %s905_s7  ;;  %428 = vrot.lane.b32.xlu1 %v423_v28, %s905_s7  ;;  %s814_s7 = sshll.u32 %s1064_s19, 2 }
  0x3e   : > { %349 = vrot.lane.b32.xlu0 %v344_v27, %s900_s27 }
  0x76   : > { %v876_v46 = vpop.permute.xlu2 %875 }
  0x77   : > { %v878_v56 = vunpack.i.h.bf16 %v876_v46  ;;  %v877_v16 = vunpack.i.l.bf16 %v876_v46 }
  0x79   : > { %v327_v63 = vmul.f32 %v878_v56, %v313_v57  ;;  %v321_v19 = vsel %vm320_vm4, %v877_v16, %v878_v56  ;;  %v325_v20 = vmul.f32 %v877_v16, %v968_v10 }
  0x7a   : > { %v326_v21 = vmul.f32 %v321_v19, %v971_v11 }
  0x7b   : > { %v329_v6 = vpack.c.bf16 %v327_v63, %v327_v63 }
  0x7c   : > { %v328_v22 = vpack.c.bf16 %v326_v21, %v325_v20 }
  0x7e   : > { %v348_v25 = vpop.permute.xlu2 %347 }
  0x7f   : > { %v351_v26 = vrot.slane %v348_v25, 4 }
  0x98   : > { %v866_v30 = vpop.permute.xlu1 %865  ;;  %v856_v31 = vpop.permute.xlu0 %855 }
  0x99   : > { %v858_v33 = vunpack.i.h.bf16 %v856_v31  ;;  %v857_v48 = vunpack.i.l.bf16 %v856_v31  ;;  %v868_v2 = vunpack.i.h.bf16 %v866_v30  ;;  %v867_v3 = vunpack.i.l.bf16 %v866_v30 }
  0x9b   : > { %v453_v34 = vmul.f32 %v858_v33, %v441_v32  ;;  %v447_v61 = vsel %vm446_vm2, %v857_v48, %v858_v33  ;;  %v451_v0 = vmul.f32 %v857_v48, %v968_v10  ;;  %v368_v12 = vsel %vm367_vm3, %v867_v3, %v868_v2 }
  0x9c   : > { %v452_v1 = vmul.f32 %v447_v61, %v971_v11  ;;  %v372_v13 = vmul.f32 %v867_v3, %v968_v10  ;;  %v374_v14 = vmul.f32 %v868_v2, %v362_v8  ;;  %v373_v15 = vmul.f32 %v368_v12, %v971_v11 }
  0x9d   : > { %v455_v36 = vpack.c.bf16 %v453_v34, %v453_v34 }
  0x9e   : > { %v454_v9 = vpack.c.bf16 %v452_v1, %v451_v0  ;;  %v376_v17 = vpack.c.bf16 %v374_v14, %v374_v14  ;;  %v375_v18 = vpack.c.bf16 %v373_v15, %v372_v13 }
  0x9f   : > { %460 = vrot.lane.b32.xlu0 %v455_v36, %s906_s8 }
  0xa0   : > { %v871_v38 = vpop.permute.xlu1 %870  ;;  %v861_v39 = vpop.permute.xlu0 %860 }
  0xa1   : > { %v873_v41 = vunpack.i.h.bf16 %v871_v38  ;;  %v872_v42 = vunpack.i.l.bf16 %v871_v38  ;;  %v863_v43 = vunpack.i.h.bf16 %v861_v39  ;;  %v862_v44 = vunpack.i.l.bf16 %v861_v39 }
  0xa3   : > { %v287_v49 = vsel %vm286_vm0, %v872_v42, %v873_v41  ;;  %v291_v50 = vmul.f32 %v872_v42, %v968_v10  ;;  %v400_v51 = vsel %vm399_vm1, %v862_v44, %v863_v43  ;;  %v404_v52 = vmul.f32 %v862_v44, %v968_v10 }
  0xa4   : > { %v406_v53 = vmul.f32 %v863_v43, %v394_v40  ;;  %v405_v54 = vmul.f32 %v400_v51, %v971_v11  ;;  %v292_v55 = vmul.f32 %v287_v49, %v971_v11  ;;  %v293_v62 = vmul.f32 %v873_v41, %v277_v45 }
  0xa6   : > { %v408_v58 = vpack.c.bf16 %v406_v53, %v406_v53  ;;  %v407_v59 = vpack.c.bf16 %v405_v54, %v404_v52  ;;  %v294_v60 = vpack.c.bf16 %v292_v55, %v291_v50  ;;  %v295_v5 = vpack.c.bf16 %v293_v62, %v293_v62 }
  0xa8   : > { %413 = vrot.lane.b32.xlu2 %v408_v58, %s907_s9  ;;  %411 = vrot.lane.b32.xlu1 %v407_v59, %s907_s9  ;;  %v427_v24 = vpop.permute.xlu0 %426  ;;  %v429_v11 = vpop.permute.xlu1 %428 }
  0xa9   : > { %298 = vrot.lane.b32.xlu0 %v294_v60, %s908_s10  ;;  %v430_v10 = vrot.slane %v427_v24, 4  ;;  %v431_v31 = vrot.slane %v429_v11, 4  ;;  %v780_v11 = vld [vmem:[#allocation2] sm:$0xf] }
  0xab   : > { %v432_v32 = vsel %vm256_vm5, %v430_v10, %v431_v31  ;;  %v815_v31 = vld [vmem:[#allocation2 + $0x4] sm:$0xf] }
  0xb0   : > { %458 = vrot.lane.b32.xlu2 %v454_v9, %s906_s8  ;;  %300 = vrot.lane.b32.xlu1 %v295_v5, %s908_s10  ;;  %v350_v27 = vpop.permute.xlu0 %349  ;;  %s224_s10 = scalar_lea.vmem %s1062_s5, %s814_s7 }
  0xb1   : > { %334 = vrot.lane.b32.xlu0 %v329_v6, %s909_s11  ;;  %v352_v28 = vrot.slane %v350_v27, 4 }
  0xb3   : > { %v353_v29 = vsel %vm256_vm5, %v351_v26, %v352_v28 }
  0xb4   : > { %v355_v30 = vsel %vm354_vm6, %v348_v25, %v353_v29 }
  0xb5   : > { %357 = vst [vmem:[#allocation2 + $0x20] sm:$0xff] %v355_v30 }
  0xb8   : > { %381 = vrot.lane.b32.xlu2 %v376_v17, %s910_s12  ;;  %379 = vrot.lane.b32.xlu1 %v375_v18, %s910_s12 }
  0xbc   : > { %v796_v19 = vld [vmem:[#allocation2 + $0x20] sm:$0xf] }
  0xc0   : > { %332 = vrot.lane.b32.xlu2 %v328_v22, %s909_s11  ;;  %250 = vrot.lane.b32.xlu1 %v965_v7, %s911_s13  ;;  %v434_v7 = vsel %vm433_vm7, %v427_v24, %v432_v32  ;;  %v819_v22 = vld [vmem:[#allocation2 + $0x24] sm:$0xf] }
  0xc1   : > { %436 = vst [vmem:[#allocation2 + $0x38] sm:$0xff] %v434_v7 }
  0xc8   : > { %252 = vrot.lane.b32.xlu2 %v247_v23, %s911_s13  ;;  %v822_v61 = vld [vmem:[#allocation2 + $0x34] sm:$0xf0]  ;;  %v806_v2 = vld [vmem:[#allocation2 + $0x38] sm:$0xf0] }
 0x102   : > { %v414_v33 = vpop.permute.xlu2 %413 }
 0x103   : > { %v416_v46 = vrot.slane %v414_v33, 4 }
 0x10a   : > { %v459_v34 = vpop.permute.xlu2 %458 }
 0x10b   : > { %v462_v36 = vrot.slane %v459_v34, 4 }
 0x111   : > { %v461_v35 = vpop.permute.xlu0 %460 }
 0x112   : > { %v463_v37 = vrot.slane %v461_v35, 4  ;;  %v382_v40 = vpop.permute.xlu2 %381  ;;  %v469_v35 = vld [vmem:[%s1058_s1] sm:$0x3] }
 0x113   : > { %v384_v8 = vrot.slane %v382_v40, 4 }
 0x114   : > { %v464_v38 = vsel %vm256_vm5, %v462_v36, %v463_v37 }
 0x115   : > { %v466_v39 = vsel %vm465_vm8, %v459_v34, %v464_v38 }
 0x116   : > { %v504_v41 = vunpack.c.l.b16 %v466_v39  ;;  %v505_v42 = vunpack.c.h.b16 %v466_v39 }
 0x118   : > { %v514_v43 = vpack.c.b16 %v504_v41, %v504_v41  ;;  %v515_v44 = vpack.c.b16 %v505_v42, %v505_v42 }
 0x11a   : > { %v412_v45 = vpop.permute.xlu1 %411  ;;  %v530_v49 = vsel %vm256_vm5, %v514_v43, 0  ;;  %v533_v50 = vsel %vm256_vm5, %v515_v44, 0  ;;  %v333_v53 = vpop.permute.xlu2 %332 }
 0x11b   : > { %v415_v47 = vrot.slane %v412_v45, 4  ;;  %v299_v48 = vpop.permute.xlu0 %298  ;;  %538 = vmatpush.bf16.msra.mxu0 %v530_v49  ;;  %551 = vmatpush.bf16.msra.mxu1 %v533_v50  ;;  %v336_v58 = vrot.slane %v333_v53, 4 }
 0x11c   : > { %v302_v54 = vrot.slane %v299_v48, 4 }
 0x11d   : > { %v417_v51 = vsel %vm256_vm5, %v415_v47, %v416_v46 }
 0x11e   : > { %v419_v52 = vsel %vm418_vm9, %v412_v45, %v417_v51 }
 0x11f   : > { %421 = vst [vmem:[#allocation2 + $0x30] sm:$0xff] %v419_v52 }
 0x122   : > { %v301_v55 = vpop.permute.xlu1 %300  ;;  %v253_v14 = vpop.permute.xlu2 %252 }
 0x123   : > { %v303_v56 = vrot.slane %v301_v55, 4  ;;  %v335_v57 = vpop.permute.xlu0 %334  ;;  %v255_v15 = vrot.slane %v253_v14, 4 }
 0x124   : > { %v337_v59 = vrot.slane %v335_v57, 4 }
 0x125   : > { %v304_v60 = vsel %vm256_vm5, %v302_v54, %v303_v56 }
 0x126   : > { %v306_v62 = vsel %vm305_vm10, %v299_v48, %v304_v60  ;;  %v338_v63 = vsel %vm256_vm5, %v336_v58, %v337_v59  ;;  %v804_v0 = vld [vmem:[#allocation2 + $0x30] sm:$0xf]  ;;  %v821_v1 = vld [vmem:[#allocation2 + $0x34] sm:$0xf] }
 0x127   : > { %308 = vst [vmem:[#allocation2 + $0x10] sm:$0xff] %v306_v62  ;;  %v340_v3 = vsel %vm339_vm11, %v333_v53, %v338_v63  ;;  %v805_v4 = vor.u32 %v822_v61, %v804_v0  ;;  %v809_v5 = vor.u32 %v821_v1, %v806_v2 }
 0x128   : > { %342 = vst [vmem:[#allocation2 + $0x18] sm:$0xff] %v340_v3 }
 0x129   : > { %539 = vmatpush.bf16.msra.mxu0 %v805_v4  ;;  %552 = vmatpush.bf16.msra.mxu1 %v809_v5 }
 0x12a   : > { %v380_v6 = vpop.permute.xlu1 %379 }
 0x12b   : > { %v383_v9 = vrot.slane %v380_v6, 4 }
 0x12d   : > { %v385_v12 = vsel %vm256_vm5, %v383_v9, %v384_v8  ;;  %v592_v8 = vld [vmem:[%s1060_s3] sm:$0xf] }
 0x12e   : > { %v387_v13 = vsel %vm386_vm12, %v380_v6, %v385_v12  ;;  %v788_v26 = vld [vmem:[#allocation2 + $0x10] sm:$0xf]  ;;  %v817_v28 = vld [vmem:[#allocation2 + $0x14] sm:$0xf]  ;;  %v913_v6 = vmov 0   ;;  %vm709_vm12 = vcmask 1041408  }
 0x12f   : > { %389 = vst [vmem:[#allocation2 + $0x28] sm:$0xff] %v387_v13  ;;  %v818_v27 = vld [vmem:[#allocation2 + $0x14] sm:$0xf0]  ;;  %v790_v29 = vld [vmem:[#allocation2 + $0x18] sm:$0xf0]  ;;  %879 = vset.pattern.permute.xlu2 %v913_v6  ;;  %880 = vset.pattern.permute.xlu0 %v913_v6 }
 0x130   : > { %v789_v30 = vor.u32 %v818_v27, %v788_v26  ;;  %v793_v10 = vor.u32 %v817_v28, %v790_v29 }
 0x132   : > { %v251_v16 = vpop.permute.xlu1 %250 }
 0x133   : > { %v254_v17 = vrot.slane %v251_v16, 4 }
 0x135   : > { %v257_v18 = vsel %vm256_vm5, %v254_v17, %v255_v15  ;;  %v608_v15 = vld [vmem:[%s1061_s4] sm:$0xf] }
 0x136   : > { %v259_v20 = vsel %vm258_vm13, %v251_v16, %v257_v18  ;;  %v820_v21 = vld [vmem:[#allocation2 + $0x24] sm:$0xf0]  ;;  %v798_v23 = vld [vmem:[#allocation2 + $0x28] sm:$0xf0] }
 0x137   : > { %261 = vst [vmem:[#allocation2 + $0x8] sm:$0xff] %v259_v20  ;;  %v797_v24 = vor.u32 %v820_v21, %v796_v19  ;;  %v801_v25 = vor.u32 %v819_v22, %v798_v23 }
 0x139   : > { %540 = vmatpush.bf16.msra.mxu0 %v797_v24  ;;  %553 = vmatpush.bf16.msra.mxu1 %v801_v25 }
 0x13d   : > { %541 = vmatpush.bf16.msra.mxu0 %v789_v30  ;;  %554 = vmatpush.bf16.msra.mxu1 %v793_v10 }
 0x13e   : > { %v816_v32 = vld [vmem:[#allocation2 + $0x4] sm:$0xf0]  ;;  %v782_v7 = vld [vmem:[#allocation2 + $0x8] sm:$0xf0] }
 0x13f   : > { %v781_v33 = vor.u32 %v816_v32, %v780_v11  ;;  %v785_v34 = vor.u32 %v815_v31, %v782_v7 }
 0x141   : > { %542 = vmatpush.bf16.msra.mxu0 %v781_v33  ;;  %555 = vmatpush.bf16.msra.mxu1 %v785_v34 }
 0x144   : > { %810 = vmatmul.msk.bf16.vlgmr.msra.gmra.mxu0 %vm524_vm14, %v469_v35  ;;  %811 = vmatmul.msk.bf16.vlgmr.msra.gmra.mxu1 %vm524_vm14, %v469_v35 }
 0x1c1   : > { %v1012_v36 = vpop.f32.mrf.mxu0  ;;  %v1014_v37 = vpop.f32.mrf.mxu1 }
 0x1c2   : > { %v573_v38 = vmul.f32 %v1012_v36, %v1012_v36  ;;  %v574_v39 = vmul.f32 %v1014_v37, %v1014_v37  ;;  %v561_v40 = vsel %vm256_vm5, %v1012_v36, 0.0  ;;  %v562_v41 = vsel %vm256_vm5, %v1014_v37, 0.0 }
 0x1c3   : > { %v563_v42 = vadd.f32 %v562_v41, %v561_v40 }
 0x1c4   : > { %v575_v43 = vsel %vm256_vm5, %v573_v38, 0.0  ;;  %v576_v44 = vsel %vm256_vm5, %v574_v39, 0.0 }
 0x1c5   : > { %564 = vadd.xlane.f32.xlu0 %v563_v42  ;;  %v577_v45 = vadd.f32 %v576_v44, %v575_v43 }
 0x1c7   : > { %578 = vadd.xlane.f32.xlu1 %v577_v45 }
 0x1c9   : > { %v546_v46 = vpop.f32.mrf.mxu0  ;;  %v559_v47 = vpop.f32.mrf.mxu1 }
 0x238   : > { %v565_v48 = vpop.xlane.xlu0 %564 }
 0x239   : > { %v566_v49 = vrot.slane %v565_v48, 4 }
 0x23a   : > { %v579_v50 = vpop.xlane.xlu1 %578 }
 0x23b   : > { %v567_v51 = vadd.f32 %v566_v49, %v565_v48  ;;  %v580_v52 = vrot.slane %v579_v50, 4 }
 0x23d   : > { %v568_v53 = vrot.slane %v567_v51, 2  ;;  %v581_v54 = vadd.f32 %v580_v52, %v579_v50 }
 0x23f   : > { %v582_v55 = vrot.slane %v581_v54, 2  ;;  %v569_v56 = vadd.f32 %v568_v53, %v567_v51 }
 0x241   : > { %v583_v57 = vadd.f32 %v582_v55, %v581_v54  ;;  %v570_v58 = vrot.slane %v569_v56, 1 }
 0x243   : > { %v571_v59 = vadd.f32 %v570_v58, %v569_v56  ;;  %v584_v60 = vrot.slane %v583_v57, 1 }
 0x245   : > { %824 = vpush %v571_v59  ;;  %v585_v61 = vadd.f32 %v584_v60, %v583_v57 }
 0x247   : > { %826 = vpush %v585_v61 }
 0x276   : > { %s825_s16 = spop %824 }
 0x277   : > { %s587_s17 = smul.f32 0.0009765625, %s825_s16 }
 0x278   : > { %s827_s20 = spop %826 }
 0x279   : > { %s589_s21 = smul.f32 %s587_s17, %s587_s17  ;;  %v609_v13 = vstv %s587_s17 }
 0x27a   : > { %s588_s22 = smul.f32 0.0009765625, %s827_s20 }
 0x27c   : > { %s590_s23 = ssub.f32 %s588_s22, %s589_s21 }
 0x27e   : > { %s591_s25 = smax.f32 %s912_s24, %s590_s23 }
 0x27f   : > { %s593_s26 = sadd.f32 1e-05, %s591_s25 }
 0x281   : > { %v594_v62 = vstv %s593_s26 }
 0x282   : > { %881 = vrsqrt.f32 %v594_v62  ;;  %vm601_vm0 = vweird.f32 %v594_v62 }
 0x288   : > { %v882_v63 = vpop.eup %881 }
 0x289   : > { %v596_v0 = vmul.f32 %v882_v63, %v594_v62  ;;  %vm602_vm15 = vweird.f32 %v882_v63 }
 0x28a   : > { %vm603_vm1 = vmor %vm601_vm0, %vm602_vm15 }
 0x28b   : > { %v597_v1 = vmul.f32 %v882_v63, %v596_v0 }
 0x28d   : > { %v598_v2 = vmul.f32 0.5, %v597_v1 }
 0x28f   : > { %v599_v3 = vsub.f32 1.5, %v598_v2 }
 0x291   : > { %v600_v4 = vmul.f32 %v882_v63, %v599_v3 }
 0x293   : > { %v604_v5 = vsel %vm603_vm1, %v882_v63, %v600_v4 }
 0x294   : > { %828 = vpush %v604_v5 }
 0x2c5   : > { %s829_s29 = spop %828 }
 0x2c6   : > { %v606_v9 = vstv %s829_s29 }
 0x2c7   : > { %v607_v12 = vmul.f32 %v606_v9, %v592_v8 }
 0x2c9   : > { %614 = vperm.xlu2 %879, %v607_v12   ;;  %v610_v14 = vmul.f32 %v609_v13, %v607_v12 }
 0x2cb   : > { %v611_v16 = vsub.f32 %v608_v15, %v610_v14 }
 0x2d1   : > { %621 = vperm.xlu2 %879, %v611_v16   ;;  %v914_v16 = vmov -1.0  }
 0x323   : > { %v615_v17 = vpop.permute.xlu2 %614 }
 0x324   : > { %v617_v18 = vmul.f32 %v615_v17, %v1012_v36  ;;  %v618_v19 = vmul.f32 %v615_v17, %v1014_v37 }
 0x32b   : > { %v622_v20 = vpop.permute.xlu2 %621 }
 0x32c   : > { %v1034_v21 = vadd.f32 %v622_v20, %v617_v18  ;;  %v1036_v22 = vadd.f32 %v622_v20, %v618_v19 }
 0x32e   : > { %v1039_v23 = vmul.f32 0.70710677, %v1034_v21  ;;  %v1042_v24 = vmul.f32 0.70710677, %v1036_v22 }
 0x330   : > { %v634_v25 = vand.u32 2147483647, %v1039_v23  ;;  %v635_v26 = vand.u32 2147483647, %v1042_v24  ;;  %vm630_vm10 = vcmp.ge.f32.partialorder %v1039_v23, 0.0  ;;  %vm631_vm11 = vcmp.ge.f32.partialorder %v1042_v24, 0.0 }
 0x331   : > { %v632_v17 = vsel %vm630_vm10, 1.0, %v914_v16  ;;  %v633_v19 = vsel %vm631_vm11, 1.0, %v914_v16 }
 0x332   : > { %v636_v27 = vmul.f32 0.3275911, %v634_v25  ;;  %v637_v28 = vmul.f32 0.3275911, %v635_v26  ;;  %v688_v47 = vsub.f32 0.0, %v634_v25  ;;  %v689_v50 = vsub.f32 0.0, %v635_v26 }
 0x334   : > { %v638_v29 = vadd.f32 1.0, %v636_v27  ;;  %v639_v30 = vadd.f32 1.0, %v637_v28  ;;  %v690_v54 = vmul.f32 %v688_v47, %v634_v25  ;;  %v691_v56 = vmul.f32 %v689_v50, %v635_v26 }
 0x335   : > { %v626_v26 = vmul.f32 0.5, %v1034_v21  ;;  %v627_v28 = vmul.f32 0.5, %v1036_v22 }
 0x336   : > { %883 = vrcp.f32 %v638_v29  ;;  %v651_v33 = vand.u32 2147483648, %v638_v29  ;;  %v649_v36 = vand.u32 2147483647, %v638_v29  ;;  %v666_v37 = vand.u32 2147483648, %v639_v30 }
 0x337   : > { %885 = vrcp.f32 %v639_v30  ;;  %v664_v39 = vand.u32 2147483647, %v639_v30  ;;  %vm645_vm4 = vweird.f32 %v638_v29  ;;  %vm660_vm6 = vweird.f32 %v639_v30 }
 0x338   : > { %v652_v41 = vor.u32 1.1754944e-38, %v651_v33  ;;  %vm650_vm7 = vcmp.eq.f32.partialorder %v649_v36, 8.507059e+37  ;;  %v667_v44 = vor.u32 1.1754944e-38, %v666_v37  ;;  %v692_v60 = vmul.f32 1.442695, %v690_v54 }
 0x339   : > { %vm665_vm9 = vcmp.eq.f32.partialorder %v664_v39, 8.507059e+37  ;;  %v694_v62 = vmul.f32 1.442695, %v691_v56 }
 0x33a   : > { %887 = vpow2.f32 %v692_v60 }
 0x33b   : > { %889 = vpow2.f32 %v694_v62 }
 0x33c   : > { %v884_v10 = vpop.eup %883 }
 0x33d   : > { %v886_v11 = vpop.eup %885  ;;  %v641_v31 = vmul.f32 %v884_v10, %v638_v29  ;;  %vm646_vm2 = vweird.f32 %v884_v10 }
 0x33e   : > { %v656_v32 = vmul.f32 %v886_v11, %v639_v30  ;;  %vm661_vm3 = vweird.f32 %v886_v11  ;;  %vm647_vm5 = vmor %vm645_vm4, %vm646_vm2 }
 0x33f   : > { %v642_v7 = vsub.f32 1.0, %v641_v31  ;;  %vm662_vm8 = vmor %vm660_vm6, %vm661_vm3 }
 0x340   : > { %v657_v34 = vsub.f32 1.0, %v656_v32  ;;  %v888_v8 = vpop.eup %887 }
 0x341   : > { %v643_v35 = vmul.f32 %v884_v10, %v642_v7  ;;  %v890_v12 = vpop.eup %889 }
 0x342   : > { %v658_v38 = vmul.f32 %v886_v11, %v657_v34 }
 0x343   : > { %v644_v40 = vadd.f32 %v884_v10, %v643_v35 }
 0x344   : > { %v659_v42 = vadd.f32 %v886_v11, %v658_v38 }
 0x345   : > { %v648_v43 = vsel %vm647_vm5, %v884_v10, %v644_v40 }
 0x346   : > { %v653_v45 = vsel %vm650_vm7, %v652_v41, %v648_v43  ;;  %v663_v46 = vsel %vm662_vm8, %v886_v11, %v659_v42 }
 0x347   : > { %v668_v48 = vsel %vm665_vm9, %v667_v44, %v663_v46  ;;  %v670_v49 = vmul.f32 1.0614054, %v653_v45 }
 0x348   : > { %v671_v51 = vmul.f32 1.0614054, %v668_v48 }
 0x349   : > { %v672_v52 = vadd.f32 -1.4531521, %v670_v49 }
 0x34a   : > { %v673_v53 = vadd.f32 -1.4531521, %v671_v51 }
 0x34b   : > { %v674_v55 = vmul.f32 %v672_v52, %v653_v45 }
 0x34c   : > { %v675_v57 = vmul.f32 %v673_v53, %v668_v48 }
 0x34d   : > { %v676_v58 = vadd.f32 1.4214138, %v674_v55 }
 0x34e   : > { %v677_v59 = vadd.f32 1.4214138, %v675_v57 }
 0x34f   : > { %v678_v61 = vmul.f32 %v676_v58, %v653_v45 }
 0x350   : > { %v679_v63 = vmul.f32 %v677_v59, %v668_v48 }
 0x351   : > { %v680_v0 = vadd.f32 -0.28449672, %v678_v61 }
 0x352   : > { %v681_v1 = vadd.f32 -0.28449672, %v679_v63 }
 0x353   : > { %v682_v2 = vmul.f32 %v680_v0, %v653_v45 }
 0x354   : > { %v683_v3 = vmul.f32 %v681_v1, %v668_v48 }
 0x355   : > { %v684_v4 = vadd.f32 0.2548296, %v682_v2 }
 0x356   : > { %v685_v5 = vadd.f32 0.2548296, %v683_v3 }
 0x357   : > { %v686_v6 = vmul.f32 %v684_v4, %v653_v45 }
 0x358   : > { %v687_v9 = vmul.f32 %v685_v5, %v668_v48 }
 0x359   : > { %v696_v13 = vmul.f32 %v888_v8, %v686_v6 }
 0x35a   : > { %v697_v14 = vmul.f32 %v890_v12, %v687_v9 }
 0x35b   : > { %v698_v15 = vsub.f32 1.0, %v696_v13 }
 0x35c   : > { %v699_v18 = vsub.f32 1.0, %v697_v14 }
 0x35d   : > { %v700_v20 = vmul.f32 %v698_v15, %v632_v17 }
 0x35e   : > { %v701_v25 = vmul.f32 %v699_v18, %v633_v19 }
 0x35f   : > { %v702_v27 = vadd.f32 1.0, %v700_v20 }
 0x360   : > { %v703_v29 = vadd.f32 1.0, %v701_v25 }
 0x361   : > { %v704_v30 = vmul.f32 %v702_v27, %v626_v26 }
 0x362   : > { %v705_v23 = vmul.f32 %v703_v29, %v627_v28 }
 0x364   : > { %v706_v10 = vpack.c.bf16 %v705_v23, %v704_v30 }
 0x366   : > { %v708_v24 = vrot.slane %v706_v10, 2 }
 0x368   : > { %v712_v11 = vsel %vm709_vm12, %v706_v10, %v708_v24 }
 0x369   : > { %714 = vst [vmem:[%s224_s10] sm:$0xf] %v712_v11 }
 0x36a PF: > { %s15_s18 = sadd.s32 1, %s897_s18  }
 0x36b   : > { %p12_p4 = scmp.ge.s32.totalorder %s15_s18, 4  }
 0x36d   :  { %14 = sbr.rel (!%p12_p4) target bundleno = 1 (0x1), region = 70 }

// kernel: up_mass_forward.7
= control target key start
LH: loop header
LB: loop body
LE: loop exit
PB: predicated region body
PF: predicated region fallthrough
CT: control target
= control target key end

     0   :  { %s882_s18 = smov 0   ;;  %s985_s0 = inlined_call_operand.vmem [shape: bf16[2,8,290], index: 0, kind: input, shape index: {}]   ;;  %s986_s1 = inlined_call_operand.vmem [shape: bf16[4,72], index: 1, kind: input, shape index: {}]   ;;  %s987_s2 = inlined_call_operand.vmem [shape: bf16[2,256], index: 2, kind: input, shape index: {}]   ;;  %s988_s3 = inlined_call_operand.vmem [shape: f32[1,4,1], index: 3, kind: input, shape index: {}]   ;;  %s989_s4 = inlined_call_operand.vmem [shape: f32[2,4,1], index: 4, kind: input, shape index: {}]   ;;  %s990_s5 = inlined_call_operand.vmem [shape: f32[2,4,256], index: 5, kind: output, shape index: {}]  }
   0x1 LB: > { %s716_s19 = sadd.s32 4294967295, %s835_s18   ;;  %p720_p0 = scmp.ge.s32.totalorder %s835_s18, 1  ;;  %s835_s18 = sphi %s882_s18, %s15_s18  }
   0x2   : > { %p196_p1 = scmp.lt.s32.totalorder %s835_s18, 3 }
   0x4   : > { %p197_p2 = pnand %p720_p0, %p196_p1 }
   0x5   : > { %p228_p3 = scmp.lt.s32.totalorder (!%p197_p2), %s716_s19, 1  ;;  %s837_s26 = smov (!%p197_p2), 16  }
   0x6   : > { %200 = sbr.rel (%p197_p2) target bundleno = 818 (0x332), region = 40  ;;  %s838_s27 = smov (!%p197_p2), 111  }
   0x7   : > { %s839_s28 = smov (!%p197_p2), 18   ;;  %s840_s29 = smov (!%p197_p2), 34  }
   0x8   : > { %s841_s30 = smov (!%p197_p2), 2   ;;  %s842_s6 = smov (!%p197_p2), 32  }
   0x9   : > { %s843_s7 = smov (!%p197_p2), 95   ;;  %s844_s8 = smov (!%p197_p2), 94  }
   0xa   : > { %s845_s9 = smov (!%p197_p2), 96   ;;  %s846_s10 = smov (!%p197_p2), 126  }
   0xb   : > { %v243_v0 = vld [vmem:[%s987_s2] sm:$0x3]  ;;  %s992_s19 = smov (!%p228_p3, %s716_s19), 1  ;;  %vm303_vm0 = vcmask 15360   ;;  %vm416_vm1 = vcmask 261120   ;;  %vm463_vm2 = vcmask 277504  }
   0xc   : > { %246 = vst [vmem:[#allocation1] ss:$9 sm:$0xff] %v243_v0  ;;  %s770_s22 = smul.u32 12, %s992_s19  ;;  %vm384_vm3 = vcmask 146432   ;;  %s847_s11 = smov 112   ;;  %vm337_vm4 = vcmask 130048  }
   0xd   : > { %s848_s12 = smov 110   ;;  %s849_s13 = smov 127   ;;  %vm273_vm5 = vcmask 1043456   ;;  %vm371_vm6 = vcmask 908288   ;;  %vm450_vm7 = vcmask 777216   ;;  %vm482_vm8 = vcmask 769024  }
   0xe   : > { %s899_s25 = scalar_lea.vmem %s985_s0, %s770_s22  ;;  %vm435_vm9 = vcmask 785408   ;;  %vm322_vm10 = vcmask 1031168   ;;  %vm356_vm11 = vcmask 916480   ;;  %vm403_vm12 = vcmask 900096   ;;  %s850_s24 = smov 0.0  }
   0xf   : > { %v902_v7 = vld [vmem:[%s899_s25] sm:$0xff]  ;;  %v361_v27 = vld [vmem:[%s899_s25 + $0x8] sm:$0xf]  ;;  %vm275_vm13 = vcmask 1039360   ;;  %vm541_vm14 = vcmask 588800  }
  0x10   : > { %v905_v10 = vunpack.c.l.bf16 %v902_v7  ;;  %v908_v11 = vunpack.c.h.bf16 %v902_v7  ;;  %v440_v28 = vld [vmem:[%s899_s25 + $0x8] sm:$0xf] }
  0x11   : > { %v455_v29 = vld [vmem:[%s899_s25 + $0x8] sm:$0xf] }
  0x12   : > { %v458_v32 = vunpack.c.l.bf16 %v455_v29  ;;  %v408_v35 = vld [vmem:[%s899_s25 + $0x8] sm:$0xf] }
  0x13   : > { %v247_v1 = vld [vmem:[#allocation1] sm:$0xff]  ;;  %v248_v2 = vld [vmem:[#allocation1 + $0x9] sm:$0xff]  ;;  %v411_v40 = vunpack.c.l.bf16 %v408_v35 }
  0x14   : > { %281 = vst [vmem:[#allocation1] ss:$9 sm:$0xff] %v243_v0  ;;  %v249_v3 = vpack.i.b16 %v247_v1, %v247_v1  ;;  %v252_v4 = vpack.i.b16 %v248_v2, %v248_v2  ;;  %v280_v37 = vld [vmem:[%s899_s25 + $0x8] sm:$0xf] }
  0x15   : > { %v294_v45 = vunpack.c.l.bf16 %v280_v37  ;;  %v327_v47 = vld [vmem:[%s899_s25 + $0x8] sm:$0xf] }
  0x16   : > { %v251_v5 = vperm.slane %v249_v3, 0  ;;  %v254_v6 = vperm.slane %v252_v4, 0  ;;  %v330_v57 = vunpack.c.l.bf16 %v327_v47  ;;  %v376_v4 = vld [vmem:[%s899_s25 + $0x8] sm:$0xf] }
  0x18   : > { %v257_v8 = vunpack.c.l.bf16 %v251_v5  ;;  %v258_v9 = vunpack.c.l.bf16 %v254_v6 }
  0x1a   : > { %v259_v12 = vmul.f32 %v257_v8, %v905_v10  ;;  %v260_v13 = vmul.f32 %v258_v9, %v908_v11  ;;  %v820_v14 = vpack.i.bf16 %v258_v9, %v257_v8  ;;  %v379_v8 = vunpack.c.l.bf16 %v376_v4 }
  0x1b   : > { %v282_v15 = vld [vmem:[#allocation1] sm:$0xff]  ;;  %v283_v16 = vld [vmem:[#allocation1 + $0x9] sm:$0xff] }
  0x1c   : > { %v284_v17 = vshrl.u32 %v282_v15, 16  ;;  %v288_v18 = vshrl.u32 %v283_v16, 16  ;;  %v261_v19 = vpack.c.bf16 %v260_v13, %v259_v12  ;;  %821 = vrot.lane.b32.xlu2 %v820_v14, %s837_s26 }
  0x1e   : > { %v285_v20 = vpack.i.b16 %v284_v17, %v284_v17  ;;  %v289_v21 = vpack.i.b16 %v288_v18, %v288_v18  ;;  %262 = vst [vmem:[#allocation2] sm:$0xff] %v261_v19 }
  0x20   : > { %v287_v22 = vperm.slane %v285_v20, 0  ;;  %v291_v23 = vperm.slane %v289_v21, 0 }
  0x22   : > { %v295_v24 = vunpack.c.l.bf16 %v287_v22  ;;  %v296_v25 = vunpack.c.l.bf16 %v291_v23  ;;  %v264_v23 = vld [vmem:[%s899_s25 + $0x8] sm:$0xf] }
  0x24   : > { %v810_v26 = vpack.i.bf16 %v296_v25, %v295_v24  ;;  %364 = vrot.lane.b32.xlu2 %v902_v7, %s838_s27 }
  0x26   : > { %811 = vrot.lane.b32.xlu1 %v810_v26, %s839_s28  ;;  %801 = vrot.lane.b32.xlu0 %v810_v26, %s840_s29 }
  0x2e   : > { %816 = vrot.lane.b32.xlu1 %v810_v26, %s841_s30  ;;  %806 = vrot.lane.b32.xlu0 %v820_v14, %s842_s6  ;;  %s722_s30 = sshll.u32 %s992_s19, 2 }
  0x36   : > { %443 = vrot.lane.b32.xlu0 %v902_v7, %s843_s7  ;;  %445 = vrot.lane.b32.xlu1 %v440_v28, %s843_s7 }
  0x3e   : > { %366 = vrot.lane.b32.xlu0 %v361_v27, %s838_s27 }
  0x76   : > { %v822_v46 = vpop.permute.xlu2 %821 }
  0x77   : > { %v824_v56 = vunpack.i.h.bf16 %v822_v46  ;;  %v823_v16 = vunpack.i.l.bf16 %v822_v46 }
  0x79   : > { %v344_v63 = vmul.f32 %v824_v56, %v330_v57  ;;  %v338_v19 = vsel %vm337_vm4, %v823_v16, %v824_v56  ;;  %v342_v20 = vmul.f32 %v823_v16, %v905_v10 }
  0x7a   : > { %v343_v21 = vmul.f32 %v338_v19, %v908_v11 }
  0x7b   : > { %v346_v6 = vpack.c.bf16 %v344_v63, %v344_v63 }
  0x7c   : > { %v345_v22 = vpack.c.bf16 %v343_v21, %v342_v20 }
  0x7e   : > { %v365_v25 = vpop.permute.xlu2 %364 }
  0x7f   : > { %v368_v26 = vrot.slane %v365_v25, 4 }
  0x98   : > { %v812_v30 = vpop.permute.xlu1 %811  ;;  %v802_v31 = vpop.permute.xlu0 %801 }
  0x99   : > { %v804_v33 = vunpack.i.h.bf16 %v802_v31  ;;  %v803_v48 = vunpack.i.l.bf16 %v802_v31  ;;  %v814_v2 = vunpack.i.h.bf16 %v812_v30  ;;  %v813_v3 = vunpack.i.l.bf16 %v812_v30 }
  0x9b   : > { %v470_v34 = vmul.f32 %v804_v33, %v458_v32  ;;  %v464_v61 = vsel %vm463_vm2, %v803_v48, %v804_v33  ;;  %v468_v0 = vmul.f32 %v803_v48, %v905_v10  ;;  %v385_v12 = vsel %vm384_vm3, %v813_v3, %v814_v2 }
  0x9c   : > { %v469_v1 = vmul.f32 %v464_v61, %v908_v11  ;;  %v389_v13 = vmul.f32 %v813_v3, %v905_v10  ;;  %v391_v14 = vmul.f32 %v814_v2, %v379_v8  ;;  %v390_v15 = vmul.f32 %v385_v12, %v908_v11 }
  0x9d   : > { %v472_v36 = vpack.c.bf16 %v470_v34, %v470_v34 }
  0x9e   : > { %v471_v9 = vpack.c.bf16 %v469_v1, %v468_v0  ;;  %v393_v17 = vpack.c.bf16 %v391_v14, %v391_v14  ;;  %v392_v18 = vpack.c.bf16 %v390_v15, %v389_v13 }
  0x9f   : > { %477 = vrot.lane.b32.xlu0 %v472_v36, %s844_s8 }
  0xa0   : > { %v817_v38 = vpop.permute.xlu1 %816  ;;  %v807_v39 = vpop.permute.xlu0 %806 }
  0xa1   : > { %v819_v41 = vunpack.i.h.bf16 %v817_v38  ;;  %v818_v42 = vunpack.i.l.bf16 %v817_v38  ;;  %v809_v43 = vunpack.i.h.bf16 %v807_v39  ;;  %v808_v44 = vunpack.i.l.bf16 %v807_v39 }
  0xa3   : > { %v304_v49 = vsel %vm303_vm0, %v818_v42, %v819_v41  ;;  %v308_v50 = vmul.f32 %v818_v42, %v905_v10  ;;  %v417_v51 = vsel %vm416_vm1, %v808_v44, %v809_v43  ;;  %v421_v52 = vmul.f32 %v808_v44, %v905_v10 }
  0xa4   : > { %v423_v53 = vmul.f32 %v809_v43, %v411_v40  ;;  %v422_v54 = vmul.f32 %v417_v51, %v908_v11  ;;  %v309_v55 = vmul.f32 %v304_v49, %v908_v11  ;;  %v310_v62 = vmul.f32 %v819_v41, %v294_v45 }
  0xa6   : > { %v425_v58 = vpack.c.bf16 %v423_v53, %v423_v53  ;;  %v424_v59 = vpack.c.bf16 %v422_v54, %v421_v52  ;;  %v311_v60 = vpack.c.bf16 %v309_v55, %v308_v50  ;;  %v312_v5 = vpack.c.bf16 %v310_v62, %v310_v62 }
  0xa8   : > { %430 = vrot.lane.b32.xlu2 %v425_v58, %s845_s9  ;;  %428 = vrot.lane.b32.xlu1 %v424_v59, %s845_s9  ;;  %v444_v24 = vpop.permute.xlu0 %443  ;;  %v446_v11 = vpop.permute.xlu1 %445  ;;  %s761_s9 = sshll.u32 %s992_s19, 3 }
  0xa9   : > { %315 = vrot.lane.b32.xlu0 %v311_v60, %s846_s10  ;;  %v447_v10 = vrot.slane %v444_v24, 4  ;;  %v448_v31 = vrot.slane %v446_v11, 4  ;;  %v727_v11 = vld [vmem:[#allocation2] sm:$0xf] }
  0xab   : > { %v449_v32 = vsel %vm273_vm5, %v447_v10, %v448_v31  ;;  %v762_v31 = vld [vmem:[#allocation2 + $0x4] sm:$0xf] }
  0xb0   : > { %475 = vrot.lane.b32.xlu2 %v471_v9, %s844_s8  ;;  %317 = vrot.lane.b32.xlu1 %v312_v5, %s846_s10  ;;  %v367_v27 = vpop.permute.xlu0 %366  ;;  %s236_s8 = scalar_lea.vmem %s989_s4, %s722_s30 }
  0xb1   : > { %351 = vrot.lane.b32.xlu0 %v346_v6, %s847_s11  ;;  %v369_v28 = vrot.slane %v367_v27, 4 }
  0xb3   : > { %v370_v29 = vsel %vm273_vm5, %v368_v26, %v369_v28 }
  0xb4   : > { %v372_v30 = vsel %vm371_vm6, %v365_v25, %v370_v29 }
  0xb5   : > { %374 = vst [vmem:[#allocation2 + $0x20] sm:$0xff] %v372_v30 }
  0xb8   : > { %398 = vrot.lane.b32.xlu2 %v393_v17, %s848_s12  ;;  %396 = vrot.lane.b32.xlu1 %v392_v18, %s848_s12  ;;  %s241_s12 = scalar_lea.vmem %s990_s5, %s761_s9 }
  0xbc   : > { %v743_v19 = vld [vmem:[#allocation2 + $0x20] sm:$0xf] }
  0xc0   : > { %349 = vrot.lane.b32.xlu2 %v345_v22, %s847_s11  ;;  %267 = vrot.lane.b32.xlu1 %v902_v7, %s849_s13  ;;  %v451_v7 = vsel %vm450_vm7, %v444_v24, %v449_v32  ;;  %v766_v22 = vld [vmem:[#allocation2 + $0x24] sm:$0xf] }
  0xc1   : > { %453 = vst [vmem:[#allocation2 + $0x38] sm:$0xff] %v451_v7 }
  0xc8   : > { %269 = vrot.lane.b32.xlu2 %v264_v23, %s849_s13  ;;  %v769_v61 = vld [vmem:[#allocation2 + $0x34] sm:$0xf0]  ;;  %v753_v2 = vld [vmem:[#allocation2 + $0x38] sm:$0xf0] }
 0x102   : > { %v431_v33 = vpop.permute.xlu2 %430 }
 0x103   : > { %v433_v46 = vrot.slane %v431_v33, 4 }
 0x10a   : > { %v476_v34 = vpop.permute.xlu2 %475 }
 0x10b   : > { %v479_v36 = vrot.slane %v476_v34, 4 }
 0x111   : > { %v478_v35 = vpop.permute.xlu0 %477 }
 0x112   : > { %v480_v37 = vrot.slane %v478_v35, 4  ;;  %v399_v40 = vpop.permute.xlu2 %398  ;;  %v486_v35 = vld [vmem:[%s986_s1] sm:$0x3] }
 0x113   : > { %v401_v8 = vrot.slane %v399_v40, 4 }
 0x114   : > { %v481_v38 = vsel %vm273_vm5, %v479_v36, %v480_v37 }
 0x115   : > { %v483_v39 = vsel %vm482_vm8, %v476_v34, %v481_v38 }
 0x116   : > { %v521_v41 = vunpack.c.l.b16 %v483_v39  ;;  %v522_v42 = vunpack.c.h.b16 %v483_v39 }
 0x118   : > { %v531_v43 = vpack.c.b16 %v521_v41, %v521_v41  ;;  %v532_v44 = vpack.c.b16 %v522_v42, %v522_v42 }
 0x11a   : > { %v429_v45 = vpop.permute.xlu1 %428  ;;  %v547_v49 = vsel %vm273_vm5, %v531_v43, 0  ;;  %v550_v50 = vsel %vm273_vm5, %v532_v44, 0  ;;  %v350_v53 = vpop.permute.xlu2 %349 }
 0x11b   : > { %v432_v47 = vrot.slane %v429_v45, 4  ;;  %v316_v48 = vpop.permute.xlu0 %315  ;;  %555 = vmatpush.bf16.msra.mxu0 %v547_v49  ;;  %568 = vmatpush.bf16.msra.mxu1 %v550_v50  ;;  %v353_v58 = vrot.slane %v350_v53, 4 }
 0x11c   : > { %v319_v54 = vrot.slane %v316_v48, 4 }
 0x11d   : > { %v434_v51 = vsel %vm273_vm5, %v432_v47, %v433_v46 }
 0x11e   : > { %v436_v52 = vsel %vm435_vm9, %v429_v45, %v434_v51 }
 0x11f   : > { %438 = vst [vmem:[#allocation2 + $0x30] sm:$0xff] %v436_v52 }
 0x122   : > { %v318_v55 = vpop.permute.xlu1 %317  ;;  %v270_v14 = vpop.permute.xlu2 %269 }
 0x123   : > { %v320_v56 = vrot.slane %v318_v55, 4  ;;  %v352_v57 = vpop.permute.xlu0 %351  ;;  %v272_v15 = vrot.slane %v270_v14, 4 }
 0x124   : > { %v354_v59 = vrot.slane %v352_v57, 4 }
 0x125   : > { %v321_v60 = vsel %vm273_vm5, %v319_v54, %v320_v56 }
 0x126   : > { %v323_v62 = vsel %vm322_vm10, %v316_v48, %v321_v60  ;;  %v355_v63 = vsel %vm273_vm5, %v353_v58, %v354_v59  ;;  %v751_v0 = vld [vmem:[#allocation2 + $0x30] sm:$0xf]  ;;  %v768_v1 = vld [vmem:[#allocation2 + $0x34] sm:$0xf] }
 0x127   : > { %325 = vst [vmem:[#allocation2 + $0x10] sm:$0xff] %v323_v62  ;;  %v357_v3 = vsel %vm356_vm11, %v350_v53, %v355_v63  ;;  %v752_v4 = vor.u32 %v769_v61, %v751_v0  ;;  %v756_v5 = vor.u32 %v768_v1, %v753_v2 }
 0x128   : > { %359 = vst [vmem:[#allocation2 + $0x18] sm:$0xff] %v357_v3 }
 0x129   : > { %556 = vmatpush.bf16.msra.mxu0 %v752_v4  ;;  %569 = vmatpush.bf16.msra.mxu1 %v756_v5 }
 0x12a   : > { %v397_v6 = vpop.permute.xlu1 %396 }
 0x12b   : > { %v400_v9 = vrot.slane %v397_v6, 4 }
 0x12d   : > { %v402_v12 = vsel %vm273_vm5, %v400_v9, %v401_v8  ;;  %v609_v8 = vld [vmem:[%s988_s3] sm:$0xf] }
 0x12e   : > { %v404_v13 = vsel %vm403_vm12, %v397_v6, %v402_v12  ;;  %v735_v26 = vld [vmem:[#allocation2 + $0x10] sm:$0xf]  ;;  %v764_v28 = vld [vmem:[#allocation2 + $0x14] sm:$0xf]  ;;  %v851_v6 = vmov 0  }
 0x12f   : > { %406 = vst [vmem:[#allocation2 + $0x28] sm:$0xff] %v404_v13  ;;  %v765_v27 = vld [vmem:[#allocation2 + $0x14] sm:$0xf0]  ;;  %v737_v29 = vld [vmem:[#allocation2 + $0x18] sm:$0xf0]  ;;  %825 = vset.pattern.permute.xlu2 %v851_v6  ;;  %826 = vset.pattern.permute.xlu0 %v851_v6 }
 0x130   : > { %v736_v30 = vor.u32 %v765_v27, %v735_v26  ;;  %v740_v10 = vor.u32 %v764_v28, %v737_v29 }
 0x132   : > { %v268_v16 = vpop.permute.xlu1 %267 }
 0x133   : > { %v271_v17 = vrot.slane %v268_v16, 4 }
 0x135   : > { %v274_v18 = vsel %vm273_vm5, %v271_v17, %v272_v15  ;;  %v625_v15 = vld [vmem:[%s236_s8] sm:$0xf] }
 0x136   : > { %v276_v20 = vsel %vm275_vm13, %v268_v16, %v274_v18  ;;  %v767_v21 = vld [vmem:[#allocation2 + $0x24] sm:$0xf0]  ;;  %v745_v23 = vld [vmem:[#allocation2 + $0x28] sm:$0xf0] }
 0x137   : > { %278 = vst [vmem:[#allocation2 + $0x8] sm:$0xff] %v276_v20  ;;  %v744_v24 = vor.u32 %v767_v21, %v743_v19  ;;  %v748_v25 = vor.u32 %v766_v22, %v745_v23 }
 0x139   : > { %557 = vmatpush.bf16.msra.mxu0 %v744_v24  ;;  %570 = vmatpush.bf16.msra.mxu1 %v748_v25 }
 0x13d   : > { %558 = vmatpush.bf16.msra.mxu0 %v736_v30  ;;  %571 = vmatpush.bf16.msra.mxu1 %v740_v10 }
 0x13e   : > { %v763_v32 = vld [vmem:[#allocation2 + $0x4] sm:$0xf0]  ;;  %v729_v7 = vld [vmem:[#allocation2 + $0x8] sm:$0xf0] }
 0x13f   : > { %v728_v33 = vor.u32 %v763_v32, %v727_v11  ;;  %v732_v34 = vor.u32 %v762_v31, %v729_v7 }
 0x141   : > { %559 = vmatpush.bf16.msra.mxu0 %v728_v33  ;;  %572 = vmatpush.bf16.msra.mxu1 %v732_v34 }
 0x144   : > { %757 = vmatmul.msk.bf16.vlgmr.msra.gmra.mxu0 %vm541_vm14, %v486_v35  ;;  %758 = vmatmul.msk.bf16.vlgmr.msra.gmra.mxu1 %vm541_vm14, %v486_v35 }
 0x1c1   : > { %v949_v36 = vpop.f32.mrf.mxu0  ;;  %v951_v37 = vpop.f32.mrf.mxu1 }
 0x1c2   : > { %v590_v38 = vmul.f32 %v949_v36, %v949_v36  ;;  %v591_v39 = vmul.f32 %v951_v37, %v951_v37  ;;  %v578_v40 = vsel %vm273_vm5, %v949_v36, 0.0  ;;  %v579_v41 = vsel %vm273_vm5, %v951_v37, 0.0 }
 0x1c3   : > { %v580_v42 = vadd.f32 %v579_v41, %v578_v40 }
 0x1c4   : > { %v592_v43 = vsel %vm273_vm5, %v590_v38, 0.0  ;;  %v593_v44 = vsel %vm273_vm5, %v591_v39, 0.0 }
 0x1c5   : > { %581 = vadd.xlane.f32.xlu0 %v580_v42  ;;  %v594_v45 = vadd.f32 %v593_v44, %v592_v43 }
 0x1c7   : > { %595 = vadd.xlane.f32.xlu1 %v594_v45 }
 0x1c9   : > { %v563_v46 = vpop.f32.mrf.mxu0  ;;  %v576_v47 = vpop.f32.mrf.mxu1 }
 0x238   : > { %v582_v48 = vpop.xlane.xlu0 %581 }
 0x239   : > { %v583_v49 = vrot.slane %v582_v48, 4 }
 0x23a   : > { %v596_v50 = vpop.xlane.xlu1 %595 }
 0x23b   : > { %v584_v51 = vadd.f32 %v583_v49, %v582_v48  ;;  %v597_v52 = vrot.slane %v596_v50, 4 }
 0x23d   : > { %v585_v53 = vrot.slane %v584_v51, 2  ;;  %v598_v54 = vadd.f32 %v597_v52, %v596_v50 }
 0x23f   : > { %v599_v55 = vrot.slane %v598_v54, 2  ;;  %v586_v56 = vadd.f32 %v585_v53, %v584_v51 }
 0x241   : > { %v600_v57 = vadd.f32 %v599_v55, %v598_v54  ;;  %v587_v58 = vrot.slane %v586_v56, 1 }
 0x243   : > { %v588_v59 = vadd.f32 %v587_v58, %v586_v56  ;;  %v601_v60 = vrot.slane %v600_v57, 1 }
 0x245   : > { %771 = vpush %v588_v59  ;;  %v602_v61 = vadd.f32 %v601_v60, %v600_v57 }
 0x247   : > { %773 = vpush %v602_v61 }
 0x276   : > { %s772_s16 = spop %771 }
 0x277   : > { %s963_s17 = smul.f32 0.0009765625, %s772_s16 }
 0x278   : > { %s774_s20 = spop %773 }
 0x279   : > { %s606_s21 = smul.f32 %s963_s17, %s963_s17  ;;  %v626_v13 = vstv %s963_s17 }
 0x27a   : > { %s605_s22 = smul.f32 0.0009765625, %s774_s20 }
 0x27c   : > { %s607_s23 = ssub.f32 %s605_s22, %s606_s21 }
 0x27e   : > { %s608_s25 = smax.f32 %s850_s24, %s607_s23 }
 0x27f   : > { %s610_s26 = sadd.f32 1e-05, %s608_s25 }
 0x281   : > { %v611_v62 = vstv %s610_s26 }
 0x282   : > { %827 = vrsqrt.f32 %v611_v62  ;;  %vm618_vm0 = vweird.f32 %v611_v62 }
 0x288   : > { %v828_v63 = vpop.eup %827 }
 0x289   : > { %v613_v0 = vmul.f32 %v828_v63, %v611_v62  ;;  %vm619_vm15 = vweird.f32 %v828_v63 }
 0x28a   : > { %vm620_vm1 = vmor %vm618_vm0, %vm619_vm15 }
 0x28b   : > { %v614_v1 = vmul.f32 %v828_v63, %v613_v0 }
 0x28d   : > { %v615_v2 = vmul.f32 0.5, %v614_v1 }
 0x28f   : > { %v616_v3 = vsub.f32 1.5, %v615_v2 }
 0x291   : > { %v617_v4 = vmul.f32 %v828_v63, %v616_v3 }
 0x293   : > { %v621_v5 = vsel %vm620_vm1, %v828_v63, %v617_v4 }
 0x294   : > { %775 = vpush %v621_v5 }
 0x2c5   : > { %s776_s29 = spop %775 }
 0x2c6   : > { %v623_v9 = vstv %s776_s29 }
 0x2c7   : > { %v624_v12 = vmul.f32 %v623_v9, %v609_v8 }
 0x2c9   : > { %631 = vperm.xlu2 %825, %v624_v12   ;;  %v627_v14 = vmul.f32 %v626_v13, %v624_v12 }
 0x2cb   : > { %v628_v16 = vsub.f32 %v625_v15, %v627_v14 }
 0x2d1   : > { %638 = vperm.xlu2 %825, %v628_v16  }
 0x323   : > { %v632_v17 = vpop.permute.xlu2 %631 }
 0x324   : > { %v635_v18 = vmul.f32 %v632_v17, %v951_v37  ;;  %v634_v20 = vmul.f32 %v632_v17, %v949_v36 }
 0x32b   : > { %v639_v19 = vpop.permute.xlu2 %638 }
 0x32c   : > { %v642_v21 = vadd.f32 %v639_v19, %v635_v18  ;;  %v641_v22 = vadd.f32 %v639_v19, %v634_v20 }
 0x32e   : > { %v645_v23 = vrot.slane %v642_v21, 4 }
 0x330   : > { %v646_v24 = vsel %vm273_vm5, %v641_v22, %v645_v23 }
 0x331   : > { %648 = vst [vmem:[%s241_s12] sm:$0xff] %v646_v24 }
 0x332 PF: > { %s15_s18 = sadd.s32 1, %s835_s18  }
 0x333   : > { %p12_p4 = scmp.ge.s32.totalorder %s15_s18, 4  }
 0x335   :  { %14 = sbr.rel (!%p12_p4) target bundleno = 1 (0x1), region = 73 }

</bundles_post_ra>
